<compile_context>
chip_gen: v7x
topology: tpu7x:2x2x1
jax: 0.10.0
libtpu: 0.0.40
codegen_flags: <defaults>
</compile_context>

<pallas_src>
import functools
import math

import jax
import jax.numpy as jnp
from jax.experimental import pallas as pl
from jax.experimental.pallas import tpu as pltpu

# ----------------------------- small ViT config -----------------------------
B = 2             # batch
C = 3             # input channels (RGB)
IMG = 16          # image height = width
PS = 4            # patch size (stand-in for 14)
GRID = IMG // PS
NP = GRID * GRID  # 16 patch tokens
D = 32            # embed dim   (stand-in for 768)
H = 4             # heads       (stand-in for 12)
DH = D // H
MLP = 4 * D
DEPTH = 8         # blocks      (stand-in for 12)
N_LAST = 6        # n_last_blocks in ModelWithIntermediateLayers
T = NP + 1        # tokens incl. cls
BT = B * T
CPP = C * PS * PS
EPS = 1e-6
_SCALE = 1.0 / math.sqrt(DH)


# ------------------------------ in-kernel math ------------------------------
def _ln(x, g, b):
    mu = jnp.mean(x, axis=-1, keepdims=True)
    xc = x - mu
    var = jnp.mean(xc * xc, axis=-1, keepdims=True)
    return xc * jax.lax.rsqrt(var + EPS) * g + b


def _mm(x, w):
    # MXU matmul: bf16 operands, f32 accumulation.
    return jnp.dot(x.astype(jnp.bfloat16), w.astype(jnp.bfloat16),
                   preferred_element_type=jnp.float32)


# ------------------------------- fused kernel -------------------------------
def _vit_kernel(
    patches_ref, pw_ref, pb_ref, cls_ref, pos_ref,
    ln1g_ref, ln1b_ref, wqkv_ref, bqkv_ref, wproj_ref, bproj_ref,
    ln2g_ref, ln2b_ref, wfc1_ref, bfc1_ref, wfc2_ref, bfc2_ref,
    lnfg_ref, lnfb_ref,
    out_ref,
    x_scr, qkv_scr, attn_scr,
):
    l = pl.program_id(0)

    # ---- patch embed + cls token + pos embed, once, into persistent state ----
    @pl.when(l == 0)
    def _():
        tok = _mm(patches_ref[...], pw_ref[...]) + pb_ref[...]     # (B*NP, D)
        for b in range(B):
            x_scr[b * T : b * T + 1, :] = cls_ref[...] + pos_ref[0:1, :]
            x_scr[b * T + 1 : (b + 1) * T, :] = (
                tok[b * NP : (b + 1) * NP, :] + pos_ref[1:T, :]
            )

    x = x_scr[...]                                                 # (B*T, D) f32

    # ---- attention sub-block (pre-norm) ----
    h1 = _ln(x, ln1g_ref[0], ln1b_ref[0])
    qkv_scr[...] = _mm(h1, wqkv_ref[0]) + bqkv_ref[0]              # (B*T, 3D)
    for b in range(B):
        r0, r1 = b * T, (b + 1) * T
        for h in range(H):
            c0, c1 = h * DH, (h + 1) * DH
            qh = qkv_scr[r0:r1, c0:c1].astype(jnp.bfloat16)        # (T, DH)
            kh = qkv_scr[r0:r1, D + c0 : D + c1].astype(jnp.bfloat16)
            vh = qkv_scr[r0:r1, 2 * D + c0 : 2 * D + c1]
            # s = qh @ kh.T without materializing a transpose
            s = jax.lax.dot_general(
                qh, kh, dimension_numbers=(((1,), (1,)), ((), ())),
                preferred_element_type=jnp.float32) * _SCALE       # (T, T)
            m = jnp.max(s, axis=-1, keepdims=True)
            p = jnp.exp(s - m)
            p = p * pl.reciprocal(jnp.sum(p, axis=-1, keepdims=True),
                                  approx=True)
            attn_scr[r0:r1, c0:c1] = _mm(p, vh)                    # (T, DH)
    a = _mm(attn_scr[...], wproj_ref[0]) + bproj_ref[0]
    x = x + a

    # ---- MLP sub-block (pre-norm) ----
    h2 = _ln(x, ln2g_ref[0], ln2b_ref[0])
    # TODO(synk): DINOv2 uses exact (erf) GELU; tanh approximation used here.
    hh = jax.nn.gelu(_mm(h2, wfc1_ref[0]) + bfc1_ref[0], approximate=True)
    x = x + _mm(hh, wfc2_ref[0]) + bfc2_ref[0]

    x_scr[...] = x

    # ---- final-LayerNorm'ed intermediate for this layer ----
    out_ref[0] = _ln(x, lnfg_ref[...], lnfb_ref[...]).astype(out_ref.dtype)


# ------------------------------- parameters --------------------------------
def init_params(key):
    def nrm(k, shape, scale=0.02):
        return scale * jax.random.normal(k, shape, dtype=jnp.float32)

    k1, k2, k3, k4, k5, k6, k7 = jax.random.split(key, 7)
    return {
        "patch_w": nrm(k1, (CPP, D)),
        "patch_b": jnp.zeros((1, D), jnp.float32),
        "cls": nrm(k2, (1, D)),
        "pos": nrm(k3, (T, D)),
        "ln_f_g": jnp.ones((1, D), jnp.float32),
        "ln_f_b": jnp.zeros((1, D), jnp.float32),
        "blocks": {
            "ln1_g": jnp.ones((DEPTH, 1, D), jnp.float32),
            "ln1_b": jnp.zeros((DEPTH, 1, D), jnp.float32),
            "w_qkv": nrm(k4, (DEPTH, D, 3 * D)),
            "b_qkv": jnp.zeros((DEPTH, 1, 3 * D), jnp.float32),
            "w_proj": nrm(k5, (DEPTH, D, D)),
            "b_proj": jnp.zeros((DEPTH, 1, D), jnp.float32),
            "ln2_g": jnp.ones((DEPTH, 1, D), jnp.float32),
            "ln2_b": jnp.zeros((DEPTH, 1, D), jnp.float32),
            "w_fc1": nrm(k6, (DEPTH, D, MLP)),
            "b_fc1": jnp.zeros((DEPTH, 1, MLP), jnp.float32),
            "w_fc2": nrm(k7, (DEPTH, MLP, D)),
            "b_fc2": jnp.zeros((DEPTH, 1, D), jnp.float32),
        },
    }


# -------------------------------- forward ----------------------------------
def patchify(x):
    # NCHW -> (B, NP, C*PS*PS); patch pixel order matches the flattening of a
    # torch Conv2d(kernel=PS, stride=PS) weight (C, ph, pw).
    xb = x.reshape(B, C, GRID, PS, GRID, PS)
    xb = xb.transpose(0, 2, 4, 1, 3, 5)
    return xb.reshape(B, NP, CPP)


def vit_forward(params, x):
    patches = patchify(x).reshape(B * NP, CPP)
    blk = params["blocks"]

    full2d = lambda shape: pl.BlockSpec(shape, lambda l: (0, 0))
    perlayer = lambda shape: pl.BlockSpec(shape, lambda l: (l, 0, 0))

    in_specs = [
        full2d((B * NP, CPP)),        # patches
        full2d((CPP, D)),             # patch_w
        full2d((1, D)),               # patch_b
        full2d((1, D)),               # cls
        full2d((T, D)),               # pos
        perlayer((1, 1, D)),          # ln1_g
        perlayer((1, 1, D)),          # ln1_b
        perlayer((1, D, 3 * D)),      # w_qkv
        perlayer((1, 1, 3 * D)),      # b_qkv
        perlayer((1, D, D)),          # w_proj
        perlayer((1, 1, D)),          # b_proj
        perlayer((1, 1, D)),          # ln2_g
        perlayer((1, 1, D)),          # ln2_b
        perlayer((1, D, MLP)),        # w_fc1
        perlayer((1, 1, MLP)),        # b_fc1
        perlayer((1, MLP, D)),        # w_fc2
        perlayer((1, 1, D)),          # b_fc2
        full2d((1, D)),               # ln_f_g
        full2d((1, D)),               # ln_f_b
    ]

    out = pl.pallas_call(
        _vit_kernel,
        out_shape=jax.ShapeDtypeStruct((DEPTH, BT, D), jnp.float32),
        grid=(DEPTH,),
        in_specs=in_specs,
        out_specs=pl.BlockSpec((1, BT, D), lambda l: (l, 0, 0)),
        scratch_shapes=[
            pltpu.VMEM((BT, D), jnp.float32),        # x_scr (persists across layers)
            pltpu.VMEM((BT, 3 * D), jnp.float32),    # qkv_scr
            pltpu.VMEM((BT, D), jnp.float32),        # attn_scr
        ],
        compiler_params=pltpu.CompilerParams(
            dimension_semantics=("arbitrary",)),
    )(
        patches, params["patch_w"], params["patch_b"], params["cls"], params["pos"],
        blk["ln1_g"], blk["ln1_b"], blk["w_qkv"], blk["b_qkv"],
        blk["w_proj"], blk["b_proj"], blk["ln2_g"], blk["ln2_b"],
        blk["w_fc1"], blk["b_fc1"], blk["w_fc2"], blk["b_fc2"],
        params["ln_f_g"], params["ln_f_b"],
    )

    # get_intermediate_layers(norm=True, return_class_token=True): the kernel
    # already applied the final LayerNorm per layer; keep the last N_LAST.
    results = []
    for i in range(DEPTH - N_LAST, DEPTH):
        o = out[i].reshape(B, T, D)
        results.append((o[:, 1:, :], o[:, 0, :]))
    return tuple(results)


# ---------------------------------- main ------------------------------------
if __name__ == "__main__":
    key = jax.random.PRNGKey(0)
    pkey, xkey = jax.random.split(key)
    params = init_params(pkey)
    x = jax.random.normal(xkey, (B, C, IMG, IMG), dtype=jnp.float32)  # NCHW

    fwd = jax.jit(vit_forward)
    out = fwd(params, x)
    jax.block_until_ready(out)

    assert len(out) == N_LAST
    assert out[0][0].shape == (B, NP, D) and out[0][1].shape == (B, D)
    print("KERNEL_OK")
</pallas_src>

<mosaic_0001>
module attributes {stable_mosaic.version = 11 : i64} {
  func.func @_vit_kernel(%arg0: i32, %arg1: memref<32x48xf32, #tpu.memory_space<vmem>>, %arg2: memref<48x32xf32, #tpu.memory_space<vmem>>, %arg3: memref<1x32xf32, #tpu.memory_space<vmem>>, %arg4: memref<1x32xf32, #tpu.memory_space<vmem>>, %arg5: memref<17x32xf32, #tpu.memory_space<vmem>>, %arg6: memref<1x1x32xf32, #tpu.memory_space<vmem>>, %arg7: memref<1x1x32xf32, #tpu.memory_space<vmem>>, %arg8: memref<1x32x96xf32, #tpu.memory_space<vmem>>, %arg9: memref<1x1x96xf32, #tpu.memory_space<vmem>>, %arg10: memref<1x32x32xf32, #tpu.memory_space<vmem>>, %arg11: memref<1x1x32xf32, #tpu.memory_space<vmem>>, %arg12: memref<1x1x32xf32, #tpu.memory_space<vmem>>, %arg13: memref<1x1x32xf32, #tpu.memory_space<vmem>>, %arg14: memref<1x32x128xf32, #tpu.memory_space<vmem>>, %arg15: memref<1x1x128xf32, #tpu.memory_space<vmem>>, %arg16: memref<1x128x32xf32, #tpu.memory_space<vmem>>, %arg17: memref<1x1x32xf32, #tpu.memory_space<vmem>>, %arg18: memref<1x32xf32, #tpu.memory_space<vmem>>, %arg19: memref<1x32xf32, #tpu.memory_space<vmem>>, %arg20: memref<1x34x32xf32, #tpu.memory_space<vmem>>, %arg21: memref<34x32xf32, #tpu.memory_space<vmem>>, %arg22: memref<34x96xf32, #tpu.memory_space<vmem>>, %arg23: memref<34x32xf32, #tpu.memory_space<vmem>>) attributes {dimension_semantics = [#tpu.dimension_semantics<arbitrary>], iteration_bounds = array<i64: 8>, scalar_prefetch = 0 : i64, scratch_operands = 3 : i64, tpu.core_type = #tpu.core_type<tc>, window_params = [{pipeline_mode = #tpu.pipeline_mode<synchronous>, transform_indices = @transform_0, window_bounds = array<i64: 32, 48>}, {pipeline_mode = #tpu.pipeline_mode<synchronous>, transform_indices = @transform_1, window_bounds = array<i64: 48, 32>}, {pipeline_mode = #tpu.pipeline_mode<synchronous>, transform_indices = @transform_2, window_bounds = array<i64: 1, 32>}, {pipeline_mode = #tpu.pipeline_mode<synchronous>, transform_indices = @transform_3, window_bounds = array<i64: 1, 32>}, {pipeline_mode = #tpu.pipeline_mode<synchronous>, transform_indices = @transform_4, window_bounds = array<i64: 17, 32>}, {transform_indices = @transform_5, window_bounds = array<i64: 1, 1, 32>}, {transform_indices = @transform_6, window_bounds = array<i64: 1, 1, 32>}, {transform_indices = @transform_7, window_bounds = array<i64: 1, 32, 96>}, {transform_indices = @transform_8, window_bounds = array<i64: 1, 1, 96>}, {transform_indices = @transform_9, window_bounds = array<i64: 1, 32, 32>}, {transform_indices = @transform_10, window_bounds = array<i64: 1, 1, 32>}, {transform_indices = @transform_11, window_bounds = array<i64: 1, 1, 32>}, {transform_indices = @transform_12, window_bounds = array<i64: 1, 1, 32>}, {transform_indices = @transform_13, window_bounds = array<i64: 1, 32, 128>}, {transform_indices = @transform_14, window_bounds = array<i64: 1, 1, 128>}, {transform_indices = @transform_15, window_bounds = array<i64: 1, 128, 32>}, {transform_indices = @transform_16, window_bounds = array<i64: 1, 1, 32>}, {pipeline_mode = #tpu.pipeline_mode<synchronous>, transform_indices = @transform_17, window_bounds = array<i64: 1, 32>}, {pipeline_mode = #tpu.pipeline_mode<synchronous>, transform_indices = @transform_18, window_bounds = array<i64: 1, 32>}, {transform_indices = @transform_19, window_bounds = array<i64: 1, 34, 32>}]} {
    %c0_i32 = arith.constant 0 : i32
    %0 = arith.cmpi eq, %arg0, %c0_i32 : i32
    %1 = arith.extui %0 : i1 to i32
    %c0_i32_0 = arith.constant 0 : i32
    %2 = arith.cmpi ne, %1, %c0_i32_0 : i32
    scf.if %2 {
      %c0_165 = arith.constant 0 : index
      %c0_166 = arith.constant 0 : index
      %307 = vector.load %arg1[%c0_165, %c0_166] : memref<32x48xf32, #tpu.memory_space<vmem>>, vector<32x48xf32>
      %c0_167 = arith.constant 0 : index
      %c0_168 = arith.constant 0 : index
      %308 = vector.load %arg2[%c0_167, %c0_168] : memref<48x32xf32, #tpu.memory_space<vmem>>, vector<48x32xf32>
      %309 = arith.truncf %307 : vector<32x48xf32> to vector<32x48xbf16>
      %310 = arith.truncf %308 : vector<48x32xf32> to vector<48x32xbf16>
      %cst_169 = arith.constant dense<0.000000e+00> : vector<32x32xf32>
      %311 = tpu.matmul %309, %310, %cst_169 {dimension_numbers = #tpu.dot_dimension_numbers<[1], [0], [0], [1], [0, 0, 1, 1], [], []>} : vector<32x48xbf16>, vector<48x32xbf16>, vector<32x32xf32> -> vector<32x32xf32>
      %c0_170 = arith.constant 0 : index
      %c0_171 = arith.constant 0 : index
      %312 = vector.load %arg3[%c0_170, %c0_171] : memref<1x32xf32, #tpu.memory_space<vmem>>, vector<1x32xf32>
      %313 = vector.broadcast %312 : vector<1x32xf32> to vector<32x32xf32>
      %314 = arith.addf %311, %313 : vector<32x32xf32>
      %c0_172 = arith.constant 0 : index
      %c0_173 = arith.constant 0 : index
      %315 = vector.load %arg4[%c0_172, %c0_173] : memref<1x32xf32, #tpu.memory_space<vmem>>, vector<1x32xf32>
      %c0_174 = arith.constant 0 : index
      %c0_175 = arith.constant 0 : index
      %316 = vector.load %arg5[%c0_174, %c0_175] : memref<17x32xf32, #tpu.memory_space<vmem>>, vector<1x32xf32>
      %317 = arith.addf %315, %316 : vector<1x32xf32>
      %c0_176 = arith.constant 0 : index
      %c0_177 = arith.constant 0 : index
      %318 = vector.load %arg21[%c0_176, %c0_177] : memref<34x32xf32, #tpu.memory_space<vmem>>, vector<1x32xf32>
      tpu.vector_store %arg21[%c0_176, %c0_177], %317 {strides = array<i32>} : memref<34x32xf32, #tpu.memory_space<vmem>>, vector<1x32xf32>,
      %319 = vector.extract_strided_slice %314 {offsets = [0, 0], sizes = [16, 32], strides = [1, 1]} : vector<32x32xf32> to vector<16x32xf32>
      %c1 = arith.constant 1 : index
      %c0_178 = arith.constant 0 : index
      %320 = vector.load %arg5[%c1, %c0_178] : memref<17x32xf32, #tpu.memory_space<vmem>>, vector<16x32xf32>
      %321 = arith.addf %319, %320 : vector<16x32xf32>
      %c1_179 = arith.constant 1 : index
      %c0_180 = arith.constant 0 : index
      %322 = vector.load %arg21[%c1_179, %c0_180] : memref<34x32xf32, #tpu.memory_space<vmem>>, vector<16x32xf32>
      tpu.vector_store %arg21[%c1_179, %c0_180], %321 {strides = array<i32>} : memref<34x32xf32, #tpu.memory_space<vmem>>, vector<16x32xf32>,
      %c0_181 = arith.constant 0 : index
      %c0_182 = arith.constant 0 : index
      %323 = vector.load %arg4[%c0_181, %c0_182] : memref<1x32xf32, #tpu.memory_space<vmem>>, vector<1x32xf32>
      %c0_183 = arith.constant 0 : index
      %c0_184 = arith.constant 0 : index
      %324 = vector.load %arg5[%c0_183, %c0_184] : memref<17x32xf32, #tpu.memory_space<vmem>>, vector<1x32xf32>
      %325 = arith.addf %323, %324 : vector<1x32xf32>
      %c17_185 = arith.constant 17 : index
      %c0_186 = arith.constant 0 : index
      %326 = vector.load %arg21[%c17_185, %c0_186] : memref<34x32xf32, #tpu.memory_space<vmem>>, vector<1x32xf32>
      tpu.vector_store %arg21[%c17_185, %c0_186], %325 {strides = array<i32>} : memref<34x32xf32, #tpu.memory_space<vmem>>, vector<1x32xf32>,
      %327 = vector.extract_strided_slice %314 {offsets = [16, 0], sizes = [16, 32], strides = [1, 1]} : vector<32x32xf32> to vector<16x32xf32>
      %c1_187 = arith.constant 1 : index
      %c0_188 = arith.constant 0 : index
      %328 = vector.load %arg5[%c1_187, %c0_188] : memref<17x32xf32, #tpu.memory_space<vmem>>, vector<16x32xf32>
      %329 = arith.addf %327, %328 : vector<16x32xf32>
      %c18 = arith.constant 18 : index
      %c0_189 = arith.constant 0 : index
      %330 = vector.load %arg21[%c18, %c0_189] : memref<34x32xf32, #tpu.memory_space<vmem>>, vector<16x32xf32>
      tpu.vector_store %arg21[%c18, %c0_189], %329 {strides = array<i32>} : memref<34x32xf32, #tpu.memory_space<vmem>>, vector<16x32xf32>,
    } else {
    }
    %c0 = arith.constant 0 : index
    %c0_1 = arith.constant 0 : index
    %3 = vector.load %arg21[%c0, %c0_1] : memref<34x32xf32, #tpu.memory_space<vmem>>, vector<34x32xf32>
    %c0_2 = arith.constant 0 : index
    %c0_3 = arith.constant 0 : index
    %c0_4 = arith.constant 0 : index
    %4 = vector.load %arg6[%c0_2, %c0_3, %c0_4] : memref<1x1x32xf32, #tpu.memory_space<vmem>>, vector<1x1x32xf32>
    %5 = vector.shape_cast %4 : vector<1x1x32xf32> to vector<1x32xf32>
    %c0_5 = arith.constant 0 : index
    %c0_6 = arith.constant 0 : index
    %c0_7 = arith.constant 0 : index
    %6 = vector.load %arg7[%c0_5, %c0_6, %c0_7] : memref<1x1x32xf32, #tpu.memory_space<vmem>>, vector<1x1x32xf32>
    %7 = vector.shape_cast %6 : vector<1x1x32xf32> to vector<1x32xf32>
    %cst = arith.constant dense<0.000000e+00> : vector<34xf32>
    %8 = vector.multi_reduction <add>, %3, %cst [1] : vector<34x32xf32> to vector<34xf32>
    %9 = vector.shape_cast %8 : vector<34xf32> to vector<34x1xf32>
    %cst_8 = arith.constant 3.200000e+01 : f32
    %10 = vector.broadcast %cst_8 : f32 to vector<34x1xf32>
    %11 = arith.divf %9, %10 : vector<34x1xf32>
    %12 = vector.broadcast %11 : vector<34x1xf32> to vector<34x32xf32>
    %13 = arith.subf %3, %12 : vector<34x32xf32>
    %14 = arith.mulf %13, %13 : vector<34x32xf32>
    %cst_9 = arith.constant dense<0.000000e+00> : vector<34xf32>
    %15 = vector.multi_reduction <add>, %14, %cst_9 [1] : vector<34x32xf32> to vector<34xf32>
    %16 = vector.shape_cast %15 : vector<34xf32> to vector<34x1xf32>
    %cst_10 = arith.constant 3.200000e+01 : f32
    %17 = vector.broadcast %cst_10 : f32 to vector<34x1xf32>
    %18 = arith.divf %16, %17 : vector<34x1xf32>
    %cst_11 = arith.constant 9.99999997E-7 : f32
    %19 = vector.broadcast %cst_11 : f32 to vector<34x1xf32>
    %20 = arith.addf %18, %19 : vector<34x1xf32>
    %21 = math.rsqrt %20 : vector<34x1xf32>
    %22 = vector.broadcast %21 : vector<34x1xf32> to vector<34x32xf32>
    %23 = arith.mulf %13, %22 : vector<34x32xf32>
    %24 = vector.broadcast %5 : vector<1x32xf32> to vector<34x32xf32>
    %25 = arith.mulf %23, %24 : vector<34x32xf32>
    %26 = vector.broadcast %7 : vector<1x32xf32> to vector<34x32xf32>
    %27 = arith.addf %25, %26 : vector<34x32xf32>
    %c0_12 = arith.constant 0 : index
    %c0_13 = arith.constant 0 : index
    %c0_14 = arith.constant 0 : index
    %28 = vector.load %arg8[%c0_12, %c0_13, %c0_14] : memref<1x32x96xf32, #tpu.memory_space<vmem>>, vector<1x32x96xf32>
    %29 = vector.shape_cast %28 : vector<1x32x96xf32> to vector<32x96xf32>
    %30 = arith.truncf %27 : vector<34x32xf32> to vector<34x32xbf16>
    %31 = arith.truncf %29 : vector<32x96xf32> to vector<32x96xbf16>
    %cst_15 = arith.constant dense<0.000000e+00> : vector<34x96xf32>
    %32 = tpu.matmul %30, %31, %cst_15 {dimension_numbers = #tpu.dot_dimension_numbers<[1], [0], [0], [1], [0, 0, 1, 1], [], []>} : vector<34x32xbf16>, vector<32x96xbf16>, vector<34x96xf32> -> vector<34x96xf32>
    %c0_16 = arith.constant 0 : index
    %c0_17 = arith.constant 0 : index
    %c0_18 = arith.constant 0 : index
    %33 = vector.load %arg9[%c0_16, %c0_17, %c0_18] : memref<1x1x96xf32, #tpu.memory_space<vmem>>, vector<1x1x96xf32>
    %34 = vector.shape_cast %33 : vector<1x1x96xf32> to vector<1x96xf32>
    %35 = vector.broadcast %34 : vector<1x96xf32> to vector<34x96xf32>
    %36 = arith.addf %32, %35 : vector<34x96xf32>
    %c0_19 = arith.constant 0 : index
    %c0_20 = arith.constant 0 : index
    %37 = vector.load %arg22[%c0_19, %c0_20] : memref<34x96xf32, #tpu.memory_space<vmem>>, vector<34x96xf32>
    tpu.vector_store %arg22[%c0_19, %c0_20], %36 {strides = array<i32>} : memref<34x96xf32, #tpu.memory_space<vmem>>, vector<34x96xf32>,
    %c0_21 = arith.constant 0 : index
    %c0_22 = arith.constant 0 : index
    %38 = vector.load %arg22[%c0_21, %c0_22] : memref<34x96xf32, #tpu.memory_space<vmem>>, vector<17x8xf32>
    %39 = arith.truncf %38 : vector<17x8xf32> to vector<17x8xbf16>
    %c0_23 = arith.constant 0 : index
    %c32 = arith.constant 32 : index
    %40 = vector.load %arg22[%c0_23, %c32] : memref<34x96xf32, #tpu.memory_space<vmem>>, vector<17x8xf32>
    %41 = arith.truncf %40 : vector<17x8xf32> to vector<17x8xbf16>
    %c0_24 = arith.constant 0 : index
    %c64 = arith.constant 64 : index
    %42 = vector.load %arg22[%c0_24, %c64] : memref<34x96xf32, #tpu.memory_space<vmem>>, vector<17x8xf32>
    %cst_25 = arith.constant dense<0.000000e+00> : vector<17x17xf32>
    %43 = tpu.matmul %39, %41, %cst_25 {dimension_numbers = #tpu.dot_dimension_numbers<[1], [1], [0], [0], [0, 0, 1, 0], [], []>} : vector<17x8xbf16>, vector<17x8xbf16>, vector<17x17xf32> -> vector<17x17xf32>
    %cst_26 = arith.constant 0.353553385 : f32
    %44 = vector.broadcast %cst_26 : f32 to vector<17x17xf32>
    %45 = arith.mulf %43, %44 : vector<17x17xf32>
    %cst_27 = arith.constant dense<0xFF800000> : vector<17xf32>
    %46 = vector.multi_reduction <maximumf>, %45, %cst_27 [1] : vector<17x17xf32> to vector<17xf32>
    %47 = vector.shape_cast %46 : vector<17xf32> to vector<17x1xf32>
    %48 = vector.broadcast %47 : vector<17x1xf32> to vector<17x17xf32>
    %49 = arith.subf %45, %48 : vector<17x17xf32>
    %50 = math.exp %49 : vector<17x17xf32>
    %cst_28 = arith.constant dense<0.000000e+00> : vector<17xf32>
    %51 = vector.multi_reduction <add>, %50, %cst_28 [1] : vector<17x17xf32> to vector<17xf32>
    %52 = vector.shape_cast %51 : vector<17xf32> to vector<17x1xf32>
    %53 = tpu.reciprocal %52 {approx = true} : vector<17x1xf32> -> vector<17x1xf32>
    %54 = vector.broadcast %53 : vector<17x1xf32> to vector<17x17xf32>
    %55 = arith.mulf %50, %54 : vector<17x17xf32>
    %56 = arith.truncf %55 : vector<17x17xf32> to vector<17x17xbf16>
    %57 = arith.truncf %42 : vector<17x8xf32> to vector<17x8xbf16>
    %cst_29 = arith.constant dense<0.000000e+00> : vector<17x8xf32>
    %58 = tpu.matmul %56, %57, %cst_29 {dimension_numbers = #tpu.dot_dimension_numbers<[1], [0], [0], [1], [0, 0, 1, 1], [], []>} : vector<17x17xbf16>, vector<17x8xbf16>, vector<17x8xf32> -> vector<17x8xf32>
    %c0_30 = arith.constant 0 : index
    %c0_31 = arith.constant 0 : index
    %59 = vector.load %arg23[%c0_30, %c0_31] : memref<34x32xf32, #tpu.memory_space<vmem>>, vector<17x8xf32>
    tpu.vector_store %arg23[%c0_30, %c0_31], %58 {strides = array<i32>} : memref<34x32xf32, #tpu.memory_space<vmem>>, vector<17x8xf32>,
    %c0_32 = arith.constant 0 : index
    %c8 = arith.constant 8 : index
    %60 = vector.load %arg22[%c0_32, %c8] : memref<34x96xf32, #tpu.memory_space<vmem>>, vector<17x8xf32>
    %61 = arith.truncf %60 : vector<17x8xf32> to vector<17x8xbf16>
    %c0_33 = arith.constant 0 : index
    %c40 = arith.constant 40 : index
    %62 = vector.load %arg22[%c0_33, %c40] : memref<34x96xf32, #tpu.memory_space<vmem>>, vector<17x8xf32>
    %63 = arith.truncf %62 : vector<17x8xf32> to vector<17x8xbf16>
    %c0_34 = arith.constant 0 : index
    %c72 = arith.constant 72 : index
    %64 = vector.load %arg22[%c0_34, %c72] : memref<34x96xf32, #tpu.memory_space<vmem>>, vector<17x8xf32>
    %cst_35 = arith.constant dense<0.000000e+00> : vector<17x17xf32>
    %65 = tpu.matmul %61, %63, %cst_35 {dimension_numbers = #tpu.dot_dimension_numbers<[1], [1], [0], [0], [0, 0, 1, 0], [], []>} : vector<17x8xbf16>, vector<17x8xbf16>, vector<17x17xf32> -> vector<17x17xf32>
    %cst_36 = arith.constant 0.353553385 : f32
    %66 = vector.broadcast %cst_36 : f32 to vector<17x17xf32>
    %67 = arith.mulf %65, %66 : vector<17x17xf32>
    %cst_37 = arith.constant dense<0xFF800000> : vector<17xf32>
    %68 = vector.multi_reduction <maximumf>, %67, %cst_37 [1] : vector<17x17xf32> to vector<17xf32>
    %69 = vector.shape_cast %68 : vector<17xf32> to vector<17x1xf32>
    %70 = vector.broadcast %69 : vector<17x1xf32> to vector<17x17xf32>
    %71 = arith.subf %67, %70 : vector<17x17xf32>
    %72 = math.exp %71 : vector<17x17xf32>
    %cst_38 = arith.constant dense<0.000000e+00> : vector<17xf32>
    %73 = vector.multi_reduction <add>, %72, %cst_38 [1] : vector<17x17xf32> to vector<17xf32>
    %74 = vector.shape_cast %73 : vector<17xf32> to vector<17x1xf32>
    %75 = tpu.reciprocal %74 {approx = true} : vector<17x1xf32> -> vector<17x1xf32>
    %76 = vector.broadcast %75 : vector<17x1xf32> to vector<17x17xf32>
    %77 = arith.mulf %72, %76 : vector<17x17xf32>
    %78 = arith.truncf %77 : vector<17x17xf32> to vector<17x17xbf16>
    %79 = arith.truncf %64 : vector<17x8xf32> to vector<17x8xbf16>
    %cst_39 = arith.constant dense<0.000000e+00> : vector<17x8xf32>
    %80 = tpu.matmul %78, %79, %cst_39 {dimension_numbers = #tpu.dot_dimension_numbers<[1], [0], [0], [1], [0, 0, 1, 1], [], []>} : vector<17x17xbf16>, vector<17x8xbf16>, vector<17x8xf32> -> vector<17x8xf32>
    %c0_40 = arith.constant 0 : index
    %c8_41 = arith.constant 8 : index
    %81 = vector.load %arg23[%c0_40, %c8_41] : memref<34x32xf32, #tpu.memory_space<vmem>>, vector<17x8xf32>
    tpu.vector_store %arg23[%c0_40, %c8_41], %80 {strides = array<i32>} : memref<34x32xf32, #tpu.memory_space<vmem>>, vector<17x8xf32>,
    %c0_42 = arith.constant 0 : index
    %c16 = arith.constant 16 : index
    %82 = vector.load %arg22[%c0_42, %c16] : memref<34x96xf32, #tpu.memory_space<vmem>>, vector<17x8xf32>
    %83 = arith.truncf %82 : vector<17x8xf32> to vector<17x8xbf16>
    %c0_43 = arith.constant 0 : index
    %c48 = arith.constant 48 : index
    %84 = vector.load %arg22[%c0_43, %c48] : memref<34x96xf32, #tpu.memory_space<vmem>>, vector<17x8xf32>
    %85 = arith.truncf %84 : vector<17x8xf32> to vector<17x8xbf16>
    %c0_44 = arith.constant 0 : index
    %c80 = arith.constant 80 : index
    %86 = vector.load %arg22[%c0_44, %c80] : memref<34x96xf32, #tpu.memory_space<vmem>>, vector<17x8xf32>
    %cst_45 = arith.constant dense<0.000000e+00> : vector<17x17xf32>
    %87 = tpu.matmul %83, %85, %cst_45 {dimension_numbers = #tpu.dot_dimension_numbers<[1], [1], [0], [0], [0, 0, 1, 0], [], []>} : vector<17x8xbf16>, vector<17x8xbf16>, vector<17x17xf32> -> vector<17x17xf32>
    %cst_46 = arith.constant 0.353553385 : f32
    %88 = vector.broadcast %cst_46 : f32 to vector<17x17xf32>
    %89 = arith.mulf %87, %88 : vector<17x17xf32>
    %cst_47 = arith.constant dense<0xFF800000> : vector<17xf32>
    %90 = vector.multi_reduction <maximumf>, %89, %cst_47 [1] : vector<17x17xf32> to vector<17xf32>
    %91 = vector.shape_cast %90 : vector<17xf32> to vector<17x1xf32>
    %92 = vector.broadcast %91 : vector<17x1xf32> to vector<17x17xf32>
    %93 = arith.subf %89, %92 : vector<17x17xf32>
    %94 = math.exp %93 : vector<17x17xf32>
    %cst_48 = arith.constant dense<0.000000e+00> : vector<17xf32>
    %95 = vector.multi_reduction <add>, %94, %cst_48 [1] : vector<17x17xf32> to vector<17xf32>
    %96 = vector.shape_cast %95 : vector<17xf32> to vector<17x1xf32>
    %97 = tpu.reciprocal %96 {approx = true} : vector<17x1xf32> -> vector<17x1xf32>
    %98 = vector.broadcast %97 : vector<17x1xf32> to vector<17x17xf32>
    %99 = arith.mulf %94, %98 : vector<17x17xf32>
    %100 = arith.truncf %99 : vector<17x17xf32> to vector<17x17xbf16>
    %101 = arith.truncf %86 : vector<17x8xf32> to vector<17x8xbf16>
    %cst_49 = arith.constant dense<0.000000e+00> : vector<17x8xf32>
    %102 = tpu.matmul %100, %101, %cst_49 {dimension_numbers = #tpu.dot_dimension_numbers<[1], [0], [0], [1], [0, 0, 1, 1], [], []>} : vector<17x17xbf16>, vector<17x8xbf16>, vector<17x8xf32> -> vector<17x8xf32>
    %c0_50 = arith.constant 0 : index
    %c16_51 = arith.constant 16 : index
    %103 = vector.load %arg23[%c0_50, %c16_51] : memref<34x32xf32, #tpu.memory_space<vmem>>, vector<17x8xf32>
    tpu.vector_store %arg23[%c0_50, %c16_51], %102 {strides = array<i32>} : memref<34x32xf32, #tpu.memory_space<vmem>>, vector<17x8xf32>,
    %c0_52 = arith.constant 0 : index
    %c24 = arith.constant 24 : index
    %104 = vector.load %arg22[%c0_52, %c24] : memref<34x96xf32, #tpu.memory_space<vmem>>, vector<17x8xf32>
    %105 = arith.truncf %104 : vector<17x8xf32> to vector<17x8xbf16>
    %c0_53 = arith.constant 0 : index
    %c56 = arith.constant 56 : index
    %106 = vector.load %arg22[%c0_53, %c56] : memref<34x96xf32, #tpu.memory_space<vmem>>, vector<17x8xf32>
    %107 = arith.truncf %106 : vector<17x8xf32> to vector<17x8xbf16>
    %c0_54 = arith.constant 0 : index
    %c88 = arith.constant 88 : index
    %108 = vector.load %arg22[%c0_54, %c88] : memref<34x96xf32, #tpu.memory_space<vmem>>, vector<17x8xf32>
    %cst_55 = arith.constant dense<0.000000e+00> : vector<17x17xf32>
    %109 = tpu.matmul %105, %107, %cst_55 {dimension_numbers = #tpu.dot_dimension_numbers<[1], [1], [0], [0], [0, 0, 1, 0], [], []>} : vector<17x8xbf16>, vector<17x8xbf16>, vector<17x17xf32> -> vector<17x17xf32>
    %cst_56 = arith.constant 0.353553385 : f32
    %110 = vector.broadcast %cst_56 : f32 to vector<17x17xf32>
    %111 = arith.mulf %109, %110 : vector<17x17xf32>
    %cst_57 = arith.constant dense<0xFF800000> : vector<17xf32>
    %112 = vector.multi_reduction <maximumf>, %111, %cst_57 [1] : vector<17x17xf32> to vector<17xf32>
    %113 = vector.shape_cast %112 : vector<17xf32> to vector<17x1xf32>
    %114 = vector.broadcast %113 : vector<17x1xf32> to vector<17x17xf32>
    %115 = arith.subf %111, %114 : vector<17x17xf32>
    %116 = math.exp %115 : vector<17x17xf32>
    %cst_58 = arith.constant dense<0.000000e+00> : vector<17xf32>
    %117 = vector.multi_reduction <add>, %116, %cst_58 [1] : vector<17x17xf32> to vector<17xf32>
    %118 = vector.shape_cast %117 : vector<17xf32> to vector<17x1xf32>
    %119 = tpu.reciprocal %118 {approx = true} : vector<17x1xf32> -> vector<17x1xf32>
    %120 = vector.broadcast %119 : vector<17x1xf32> to vector<17x17xf32>
    %121 = arith.mulf %116, %120 : vector<17x17xf32>
    %122 = arith.truncf %121 : vector<17x17xf32> to vector<17x17xbf16>
    %123 = arith.truncf %108 : vector<17x8xf32> to vector<17x8xbf16>
    %cst_59 = arith.constant dense<0.000000e+00> : vector<17x8xf32>
    %124 = tpu.matmul %122, %123, %cst_59 {dimension_numbers = #tpu.dot_dimension_numbers<[1], [0], [0], [1], [0, 0, 1, 1], [], []>} : vector<17x17xbf16>, vector<17x8xbf16>, vector<17x8xf32> -> vector<17x8xf32>
    %c0_60 = arith.constant 0 : index
    %c24_61 = arith.constant 24 : index
    %125 = vector.load %arg23[%c0_60, %c24_61] : memref<34x32xf32, #tpu.memory_space<vmem>>, vector<17x8xf32>
    tpu.vector_store %arg23[%c0_60, %c24_61], %124 {strides = array<i32>} : memref<34x32xf32, #tpu.memory_space<vmem>>, vector<17x8xf32>,
    %c17 = arith.constant 17 : index
    %c0_62 = arith.constant 0 : index
    %126 = vector.load %arg22[%c17, %c0_62] : memref<34x96xf32, #tpu.memory_space<vmem>>, vector<17x8xf32>
    %127 = arith.truncf %126 : vector<17x8xf32> to vector<17x8xbf16>
    %c17_63 = arith.constant 17 : index
    %c32_64 = arith.constant 32 : index
    %128 = vector.load %arg22[%c17_63, %c32_64] : memref<34x96xf32, #tpu.memory_space<vmem>>, vector<17x8xf32>
    %129 = arith.truncf %128 : vector<17x8xf32> to vector<17x8xbf16>
    %c17_65 = arith.constant 17 : index
    %c64_66 = arith.constant 64 : index
    %130 = vector.load %arg22[%c17_65, %c64_66] : memref<34x96xf32, #tpu.memory_space<vmem>>, vector<17x8xf32>
    %cst_67 = arith.constant dense<0.000000e+00> : vector<17x17xf32>
    %131 = tpu.matmul %127, %129, %cst_67 {dimension_numbers = #tpu.dot_dimension_numbers<[1], [1], [0], [0], [0, 0, 1, 0], [], []>} : vector<17x8xbf16>, vector<17x8xbf16>, vector<17x17xf32> -> vector<17x17xf32>
    %cst_68 = arith.constant 0.353553385 : f32
    %132 = vector.broadcast %cst_68 : f32 to vector<17x17xf32>
    %133 = arith.mulf %131, %132 : vector<17x17xf32>
    %cst_69 = arith.constant dense<0xFF800000> : vector<17xf32>
    %134 = vector.multi_reduction <maximumf>, %133, %cst_69 [1] : vector<17x17xf32> to vector<17xf32>
    %135 = vector.shape_cast %134 : vector<17xf32> to vector<17x1xf32>
    %136 = vector.broadcast %135 : vector<17x1xf32> to vector<17x17xf32>
    %137 = arith.subf %133, %136 : vector<17x17xf32>
    %138 = math.exp %137 : vector<17x17xf32>
    %cst_70 = arith.constant dense<0.000000e+00> : vector<17xf32>
    %139 = vector.multi_reduction <add>, %138, %cst_70 [1] : vector<17x17xf32> to vector<17xf32>
    %140 = vector.shape_cast %139 : vector<17xf32> to vector<17x1xf32>
    %141 = tpu.reciprocal %140 {approx = true} : vector<17x1xf32> -> vector<17x1xf32>
    %142 = vector.broadcast %141 : vector<17x1xf32> to vector<17x17xf32>
    %143 = arith.mulf %138, %142 : vector<17x17xf32>
    %144 = arith.truncf %143 : vector<17x17xf32> to vector<17x17xbf16>
    %145 = arith.truncf %130 : vector<17x8xf32> to vector<17x8xbf16>
    %cst_71 = arith.constant dense<0.000000e+00> : vector<17x8xf32>
    %146 = tpu.matmul %144, %145, %cst_71 {dimension_numbers = #tpu.dot_dimension_numbers<[1], [0], [0], [1], [0, 0, 1, 1], [], []>} : vector<17x17xbf16>, vector<17x8xbf16>, vector<17x8xf32> -> vector<17x8xf32>
    %c17_72 = arith.constant 17 : index
    %c0_73 = arith.constant 0 : index
    %147 = vector.load %arg23[%c17_72, %c0_73] : memref<34x32xf32, #tpu.memory_space<vmem>>, vector<17x8xf32>
    tpu.vector_store %arg23[%c17_72, %c0_73], %146 {strides = array<i32>} : memref<34x32xf32, #tpu.memory_space<vmem>>, vector<17x8xf32>,
    %c17_74 = arith.constant 17 : index
    %c8_75 = arith.constant 8 : index
    %148 = vector.load %arg22[%c17_74, %c8_75] : memref<34x96xf32, #tpu.memory_space<vmem>>, vector<17x8xf32>
    %149 = arith.truncf %148 : vector<17x8xf32> to vector<17x8xbf16>
    %c17_76 = arith.constant 17 : index
    %c40_77 = arith.constant 40 : index
    %150 = vector.load %arg22[%c17_76, %c40_77] : memref<34x96xf32, #tpu.memory_space<vmem>>, vector<17x8xf32>
    %151 = arith.truncf %150 : vector<17x8xf32> to vector<17x8xbf16>
    %c17_78 = arith.constant 17 : index
    %c72_79 = arith.constant 72 : index
    %152 = vector.load %arg22[%c17_78, %c72_79] : memref<34x96xf32, #tpu.memory_space<vmem>>, vector<17x8xf32>
    %cst_80 = arith.constant dense<0.000000e+00> : vector<17x17xf32>
    %153 = tpu.matmul %149, %151, %cst_80 {dimension_numbers = #tpu.dot_dimension_numbers<[1], [1], [0], [0], [0, 0, 1, 0], [], []>} : vector<17x8xbf16>, vector<17x8xbf16>, vector<17x17xf32> -> vector<17x17xf32>
    %cst_81 = arith.constant 0.353553385 : f32
    %154 = vector.broadcast %cst_81 : f32 to vector<17x17xf32>
    %155 = arith.mulf %153, %154 : vector<17x17xf32>
    %cst_82 = arith.constant dense<0xFF800000> : vector<17xf32>
    %156 = vector.multi_reduction <maximumf>, %155, %cst_82 [1] : vector<17x17xf32> to vector<17xf32>
    %157 = vector.shape_cast %156 : vector<17xf32> to vector<17x1xf32>
    %158 = vector.broadcast %157 : vector<17x1xf32> to vector<17x17xf32>
    %159 = arith.subf %155, %158 : vector<17x17xf32>
    %160 = math.exp %159 : vector<17x17xf32>
    %cst_83 = arith.constant dense<0.000000e+00> : vector<17xf32>
    %161 = vector.multi_reduction <add>, %160, %cst_83 [1] : vector<17x17xf32> to vector<17xf32>
    %162 = vector.shape_cast %161 : vector<17xf32> to vector<17x1xf32>
    %163 = tpu.reciprocal %162 {approx = true} : vector<17x1xf32> -> vector<17x1xf32>
    %164 = vector.broadcast %163 : vector<17x1xf32> to vector<17x17xf32>
    %165 = arith.mulf %160, %164 : vector<17x17xf32>
    %166 = arith.truncf %165 : vector<17x17xf32> to vector<17x17xbf16>
    %167 = arith.truncf %152 : vector<17x8xf32> to vector<17x8xbf16>
    %cst_84 = arith.constant dense<0.000000e+00> : vector<17x8xf32>
    %168 = tpu.matmul %166, %167, %cst_84 {dimension_numbers = #tpu.dot_dimension_numbers<[1], [0], [0], [1], [0, 0, 1, 1], [], []>} : vector<17x17xbf16>, vector<17x8xbf16>, vector<17x8xf32> -> vector<17x8xf32>
    %c17_85 = arith.constant 17 : index
    %c8_86 = arith.constant 8 : index
    %169 = vector.load %arg23[%c17_85, %c8_86] : memref<34x32xf32, #tpu.memory_space<vmem>>, vector<17x8xf32>
    tpu.vector_store %arg23[%c17_85, %c8_86], %168 {strides = array<i32>} : memref<34x32xf32, #tpu.memory_space<vmem>>, vector<17x8xf32>,
    %c17_87 = arith.constant 17 : index
    %c16_88 = arith.constant 16 : index
    %170 = vector.load %arg22[%c17_87, %c16_88] : memref<34x96xf32, #tpu.memory_space<vmem>>, vector<17x8xf32>
    %171 = arith.truncf %170 : vector<17x8xf32> to vector<17x8xbf16>
    %c17_89 = arith.constant 17 : index
    %c48_90 = arith.constant 48 : index
    %172 = vector.load %arg22[%c17_89, %c48_90] : memref<34x96xf32, #tpu.memory_space<vmem>>, vector<17x8xf32>
    %173 = arith.truncf %172 : vector<17x8xf32> to vector<17x8xbf16>
    %c17_91 = arith.constant 17 : index
    %c80_92 = arith.constant 80 : index
    %174 = vector.load %arg22[%c17_91, %c80_92] : memref<34x96xf32, #tpu.memory_space<vmem>>, vector<17x8xf32>
    %cst_93 = arith.constant dense<0.000000e+00> : vector<17x17xf32>
    %175 = tpu.matmul %171, %173, %cst_93 {dimension_numbers = #tpu.dot_dimension_numbers<[1], [1], [0], [0], [0, 0, 1, 0], [], []>} : vector<17x8xbf16>, vector<17x8xbf16>, vector<17x17xf32> -> vector<17x17xf32>
    %cst_94 = arith.constant 0.353553385 : f32
    %176 = vector.broadcast %cst_94 : f32 to vector<17x17xf32>
    %177 = arith.mulf %175, %176 : vector<17x17xf32>
    %cst_95 = arith.constant dense<0xFF800000> : vector<17xf32>
    %178 = vector.multi_reduction <maximumf>, %177, %cst_95 [1] : vector<17x17xf32> to vector<17xf32>
    %179 = vector.shape_cast %178 : vector<17xf32> to vector<17x1xf32>
    %180 = vector.broadcast %179 : vector<17x1xf32> to vector<17x17xf32>
    %181 = arith.subf %177, %180 : vector<17x17xf32>
    %182 = math.exp %181 : vector<17x17xf32>
    %cst_96 = arith.constant dense<0.000000e+00> : vector<17xf32>
    %183 = vector.multi_reduction <add>, %182, %cst_96 [1] : vector<17x17xf32> to vector<17xf32>
    %184 = vector.shape_cast %183 : vector<17xf32> to vector<17x1xf32>
    %185 = tpu.reciprocal %184 {approx = true} : vector<17x1xf32> -> vector<17x1xf32>
    %186 = vector.broadcast %185 : vector<17x1xf32> to vector<17x17xf32>
    %187 = arith.mulf %182, %186 : vector<17x17xf32>
    %188 = arith.truncf %187 : vector<17x17xf32> to vector<17x17xbf16>
    %189 = arith.truncf %174 : vector<17x8xf32> to vector<17x8xbf16>
    %cst_97 = arith.constant dense<0.000000e+00> : vector<17x8xf32>
    %190 = tpu.matmul %188, %189, %cst_97 {dimension_numbers = #tpu.dot_dimension_numbers<[1], [0], [0], [1], [0, 0, 1, 1], [], []>} : vector<17x17xbf16>, vector<17x8xbf16>, vector<17x8xf32> -> vector<17x8xf32>
    %c17_98 = arith.constant 17 : index
    %c16_99 = arith.constant 16 : index
    %191 = vector.load %arg23[%c17_98, %c16_99] : memref<34x32xf32, #tpu.memory_space<vmem>>, vector<17x8xf32>
    tpu.vector_store %arg23[%c17_98, %c16_99], %190 {strides = array<i32>} : memref<34x32xf32, #tpu.memory_space<vmem>>, vector<17x8xf32>,
    %c17_100 = arith.constant 17 : index
    %c24_101 = arith.constant 24 : index
    %192 = vector.load %arg22[%c17_100, %c24_101] : memref<34x96xf32, #tpu.memory_space<vmem>>, vector<17x8xf32>
    %193 = arith.truncf %192 : vector<17x8xf32> to vector<17x8xbf16>
    %c17_102 = arith.constant 17 : index
    %c56_103 = arith.constant 56 : index
    %194 = vector.load %arg22[%c17_102, %c56_103] : memref<34x96xf32, #tpu.memory_space<vmem>>, vector<17x8xf32>
    %195 = arith.truncf %194 : vector<17x8xf32> to vector<17x8xbf16>
    %c17_104 = arith.constant 17 : index
    %c88_105 = arith.constant 88 : index
    %196 = vector.load %arg22[%c17_104, %c88_105] : memref<34x96xf32, #tpu.memory_space<vmem>>, vector<17x8xf32>
    %cst_106 = arith.constant dense<0.000000e+00> : vector<17x17xf32>
    %197 = tpu.matmul %193, %195, %cst_106 {dimension_numbers = #tpu.dot_dimension_numbers<[1], [1], [0], [0], [0, 0, 1, 0], [], []>} : vector<17x8xbf16>, vector<17x8xbf16>, vector<17x17xf32> -> vector<17x17xf32>
    %cst_107 = arith.constant 0.353553385 : f32
    %198 = vector.broadcast %cst_107 : f32 to vector<17x17xf32>
    %199 = arith.mulf %197, %198 : vector<17x17xf32>
    %cst_108 = arith.constant dense<0xFF800000> : vector<17xf32>
    %200 = vector.multi_reduction <maximumf>, %199, %cst_108 [1] : vector<17x17xf32> to vector<17xf32>
    %201 = vector.shape_cast %200 : vector<17xf32> to vector<17x1xf32>
    %202 = vector.broadcast %201 : vector<17x1xf32> to vector<17x17xf32>
    %203 = arith.subf %199, %202 : vector<17x17xf32>
    %204 = math.exp %203 : vector<17x17xf32>
    %cst_109 = arith.constant dense<0.000000e+00> : vector<17xf32>
    %205 = vector.multi_reduction <add>, %204, %cst_109 [1] : vector<17x17xf32> to vector<17xf32>
    %206 = vector.shape_cast %205 : vector<17xf32> to vector<17x1xf32>
    %207 = tpu.reciprocal %206 {approx = true} : vector<17x1xf32> -> vector<17x1xf32>
    %208 = vector.broadcast %207 : vector<17x1xf32> to vector<17x17xf32>
    %209 = arith.mulf %204, %208 : vector<17x17xf32>
    %210 = arith.truncf %209 : vector<17x17xf32> to vector<17x17xbf16>
    %211 = arith.truncf %196 : vector<17x8xf32> to vector<17x8xbf16>
    %cst_110 = arith.constant dense<0.000000e+00> : vector<17x8xf32>
    %212 = tpu.matmul %210, %211, %cst_110 {dimension_numbers = #tpu.dot_dimension_numbers<[1], [0], [0], [1], [0, 0, 1, 1], [], []>} : vector<17x17xbf16>, vector<17x8xbf16>, vector<17x8xf32> -> vector<17x8xf32>
    %c17_111 = arith.constant 17 : index
    %c24_112 = arith.constant 24 : index
    %213 = vector.load %arg23[%c17_111, %c24_112] : memref<34x32xf32, #tpu.memory_space<vmem>>, vector<17x8xf32>
    tpu.vector_store %arg23[%c17_111, %c24_112], %212 {strides = array<i32>} : memref<34x32xf32, #tpu.memory_space<vmem>>, vector<17x8xf32>,
    %c0_113 = arith.constant 0 : index
    %c0_114 = arith.constant 0 : index
    %214 = vector.load %arg23[%c0_113, %c0_114] : memref<34x32xf32, #tpu.memory_space<vmem>>, vector<34x32xf32>
    %c0_115 = arith.constant 0 : index
    %c0_116 = arith.constant 0 : index
    %c0_117 = arith.constant 0 : index
    %215 = vector.load %arg10[%c0_115, %c0_116, %c0_117] : memref<1x32x32xf32, #tpu.memory_space<vmem>>, vector<1x32x32xf32>
    %216 = vector.shape_cast %215 : vector<1x32x32xf32> to vector<32x32xf32>
    %217 = arith.truncf %214 : vector<34x32xf32> to vector<34x32xbf16>
    %218 = arith.truncf %216 : vector<32x32xf32> to vector<32x32xbf16>
    %cst_118 = arith.constant dense<0.000000e+00> : vector<34x32xf32>
    %219 = tpu.matmul %217, %218, %cst_118 {dimension_numbers = #tpu.dot_dimension_numbers<[1], [0], [0], [1], [0, 0, 1, 1], [], []>} : vector<34x32xbf16>, vector<32x32xbf16>, vector<34x32xf32> -> vector<34x32xf32>
    %c0_119 = arith.constant 0 : index
    %c0_120 = arith.constant 0 : index
    %c0_121 = arith.constant 0 : index
    %220 = vector.load %arg11[%c0_119, %c0_120, %c0_121] : memref<1x1x32xf32, #tpu.memory_space<vmem>>, vector<1x1x32xf32>
    %221 = vector.shape_cast %220 : vector<1x1x32xf32> to vector<1x32xf32>
    %222 = vector.broadcast %221 : vector<1x32xf32> to vector<34x32xf32>
    %223 = arith.addf %219, %222 : vector<34x32xf32>
    %224 = arith.addf %3, %223 : vector<34x32xf32>
    %c0_122 = arith.constant 0 : index
    %c0_123 = arith.constant 0 : index
    %c0_124 = arith.constant 0 : index
    %225 = vector.load %arg12[%c0_122, %c0_123, %c0_124] : memref<1x1x32xf32, #tpu.memory_space<vmem>>, vector<1x1x32xf32>
    %226 = vector.shape_cast %225 : vector<1x1x32xf32> to vector<1x32xf32>
    %c0_125 = arith.constant 0 : index
    %c0_126 = arith.constant 0 : index
    %c0_127 = arith.constant 0 : index
    %227 = vector.load %arg13[%c0_125, %c0_126, %c0_127] : memref<1x1x32xf32, #tpu.memory_space<vmem>>, vector<1x1x32xf32>
    %228 = vector.shape_cast %227 : vector<1x1x32xf32> to vector<1x32xf32>
    %cst_128 = arith.constant dense<0.000000e+00> : vector<34xf32>
    %229 = vector.multi_reduction <add>, %224, %cst_128 [1] : vector<34x32xf32> to vector<34xf32>
    %230 = vector.shape_cast %229 : vector<34xf32> to vector<34x1xf32>
    %cst_129 = arith.constant 3.200000e+01 : f32
    %231 = vector.broadcast %cst_129 : f32 to vector<34x1xf32>
    %232 = arith.divf %230, %231 : vector<34x1xf32>
    %233 = vector.broadcast %232 : vector<34x1xf32> to vector<34x32xf32>
    %234 = arith.subf %224, %233 : vector<34x32xf32>
    %235 = arith.mulf %234, %234 : vector<34x32xf32>
    %cst_130 = arith.constant dense<0.000000e+00> : vector<34xf32>
    %236 = vector.multi_reduction <add>, %235, %cst_130 [1] : vector<34x32xf32> to vector<34xf32>
    %237 = vector.shape_cast %236 : vector<34xf32> to vector<34x1xf32>
    %cst_131 = arith.constant 3.200000e+01 : f32
    %238 = vector.broadcast %cst_131 : f32 to vector<34x1xf32>
    %239 = arith.divf %237, %238 : vector<34x1xf32>
    %cst_132 = arith.constant 9.99999997E-7 : f32
    %240 = vector.broadcast %cst_132 : f32 to vector<34x1xf32>
    %241 = arith.addf %239, %240 : vector<34x1xf32>
    %242 = math.rsqrt %241 : vector<34x1xf32>
    %243 = vector.broadcast %242 : vector<34x1xf32> to vector<34x32xf32>
    %244 = arith.mulf %234, %243 : vector<34x32xf32>
    %245 = vector.broadcast %226 : vector<1x32xf32> to vector<34x32xf32>
    %246 = arith.mulf %244, %245 : vector<34x32xf32>
    %247 = vector.broadcast %228 : vector<1x32xf32> to vector<34x32xf32>
    %248 = arith.addf %246, %247 : vector<34x32xf32>
    %c0_133 = arith.constant 0 : index
    %c0_134 = arith.constant 0 : index
    %c0_135 = arith.constant 0 : index
    %249 = vector.load %arg14[%c0_133, %c0_134, %c0_135] : memref<1x32x128xf32, #tpu.memory_space<vmem>>, vector<1x32x128xf32>
    %250 = vector.shape_cast %249 : vector<1x32x128xf32> to vector<32x128xf32>
    %251 = arith.truncf %248 : vector<34x32xf32> to vector<34x32xbf16>
    %252 = arith.truncf %250 : vector<32x128xf32> to vector<32x128xbf16>
    %cst_136 = arith.constant dense<0.000000e+00> : vector<34x128xf32>
    %253 = tpu.matmul %251, %252, %cst_136 {dimension_numbers = #tpu.dot_dimension_numbers<[1], [0], [0], [1], [0, 0, 1, 1], [], []>} : vector<34x32xbf16>, vector<32x128xbf16>, vector<34x128xf32> -> vector<34x128xf32>
    %c0_137 = arith.constant 0 : index
    %c0_138 = arith.constant 0 : index
    %c0_139 = arith.constant 0 : index
    %254 = vector.load %arg15[%c0_137, %c0_138, %c0_139] : memref<1x1x128xf32, #tpu.memory_space<vmem>>, vector<1x1x128xf32>
    %255 = vector.shape_cast %254 : vector<1x1x128xf32> to vector<1x128xf32>
    %256 = vector.broadcast %255 : vector<1x128xf32> to vector<34x128xf32>
    %257 = arith.addf %253, %256 : vector<34x128xf32>
    %258 = arith.mulf %257, %257 : vector<34x128xf32>
    %259 = arith.mulf %257, %258 : vector<34x128xf32>
    %cst_140 = arith.constant 4.471500e-02 : f32
    %260 = vector.broadcast %cst_140 : f32 to vector<34x128xf32>
    %261 = arith.mulf %260, %259 : vector<34x128xf32>
    %262 = arith.addf %257, %261 : vector<34x128xf32>
    %cst_141 = arith.constant 0.797884583 : f32
    %263 = vector.broadcast %cst_141 : f32 to vector<34x128xf32>
    %264 = arith.mulf %263, %262 : vector<34x128xf32>
    %265 = math.tanh %264 : vector<34x128xf32>
    %cst_142 = arith.constant 1.000000e+00 : f32
    %266 = vector.broadcast %cst_142 : f32 to vector<34x128xf32>
    %267 = arith.addf %266, %265 : vector<34x128xf32>
    %cst_143 = arith.constant 5.000000e-01 : f32
    %268 = vector.broadcast %cst_143 : f32 to vector<34x128xf32>
    %269 = arith.mulf %268, %267 : vector<34x128xf32>
    %270 = arith.mulf %257, %269 : vector<34x128xf32>
    %c0_144 = arith.constant 0 : index
    %c0_145 = arith.constant 0 : index
    %c0_146 = arith.constant 0 : index
    %271 = vector.load %arg16[%c0_144, %c0_145, %c0_146] : memref<1x128x32xf32, #tpu.memory_space<vmem>>, vector<1x128x32xf32>
    %272 = vector.shape_cast %271 : vector<1x128x32xf32> to vector<128x32xf32>
    %273 = arith.truncf %270 : vector<34x128xf32> to vector<34x128xbf16>
    %274 = arith.truncf %272 : vector<128x32xf32> to vector<128x32xbf16>
    %cst_147 = arith.constant dense<0.000000e+00> : vector<34x32xf32>
    %275 = tpu.matmul %273, %274, %cst_147 {dimension_numbers = #tpu.dot_dimension_numbers<[1], [0], [0], [1], [0, 0, 1, 1], [], []>} : vector<34x128xbf16>, vector<128x32xbf16>, vector<34x32xf32> -> vector<34x32xf32>
    %276 = arith.addf %224, %275 : vector<34x32xf32>
    %c0_148 = arith.constant 0 : index
    %c0_149 = arith.constant 0 : index
    %c0_150 = arith.constant 0 : index
    %277 = vector.load %arg17[%c0_148, %c0_149, %c0_150] : memref<1x1x32xf32, #tpu.memory_space<vmem>>, vector<1x1x32xf32>
    %278 = vector.shape_cast %277 : vector<1x1x32xf32> to vector<1x32xf32>
    %279 = vector.broadcast %278 : vector<1x32xf32> to vector<34x32xf32>
    %280 = arith.addf %276, %279 : vector<34x32xf32>
    %c0_151 = arith.constant 0 : index
    %c0_152 = arith.constant 0 : index
    %281 = vector.load %arg21[%c0_151, %c0_152] : memref<34x32xf32, #tpu.memory_space<vmem>>, vector<34x32xf32>
    tpu.vector_store %arg21[%c0_151, %c0_152], %280 {strides = array<i32>} : memref<34x32xf32, #tpu.memory_space<vmem>>, vector<34x32xf32>,
    %c0_153 = arith.constant 0 : index
    %c0_154 = arith.constant 0 : index
    %282 = vector.load %arg18[%c0_153, %c0_154] : memref<1x32xf32, #tpu.memory_space<vmem>>, vector<1x32xf32>
    %c0_155 = arith.constant 0 : index
    %c0_156 = arith.constant 0 : index
    %283 = vector.load %arg19[%c0_155, %c0_156] : memref<1x32xf32, #tpu.memory_space<vmem>>, vector<1x32xf32>
    %cst_157 = arith.constant dense<0.000000e+00> : vector<34xf32>
    %284 = vector.multi_reduction <add>, %280, %cst_157 [1] : vector<34x32xf32> to vector<34xf32>
    %285 = vector.shape_cast %284 : vector<34xf32> to vector<34x1xf32>
    %cst_158 = arith.constant 3.200000e+01 : f32
    %286 = vector.broadcast %cst_158 : f32 to vector<34x1xf32>
    %287 = arith.divf %285, %286 : vector<34x1xf32>
    %288 = vector.broadcast %287 : vector<34x1xf32> to vector<34x32xf32>
    %289 = arith.subf %280, %288 : vector<34x32xf32>
    %290 = arith.mulf %289, %289 : vector<34x32xf32>
    %cst_159 = arith.constant dense<0.000000e+00> : vector<34xf32>
    %291 = vector.multi_reduction <add>, %290, %cst_159 [1] : vector<34x32xf32> to vector<34xf32>
    %292 = vector.shape_cast %291 : vector<34xf32> to vector<34x1xf32>
    %cst_160 = arith.constant 3.200000e+01 : f32
    %293 = vector.broadcast %cst_160 : f32 to vector<34x1xf32>
    %294 = arith.divf %292, %293 : vector<34x1xf32>
    %cst_161 = arith.constant 9.99999997E-7 : f32
    %295 = vector.broadcast %cst_161 : f32 to vector<34x1xf32>
    %296 = arith.addf %294, %295 : vector<34x1xf32>
    %297 = math.rsqrt %296 : vector<34x1xf32>
    %298 = vector.broadcast %297 : vector<34x1xf32> to vector<34x32xf32>
    %299 = arith.mulf %289, %298 : vector<34x32xf32>
    %300 = vector.broadcast %282 : vector<1x32xf32> to vector<34x32xf32>
    %301 = arith.mulf %299, %300 : vector<34x32xf32>
    %302 = vector.broadcast %283 : vector<1x32xf32> to vector<34x32xf32>
    %303 = arith.addf %301, %302 : vector<34x32xf32>
    %c0_162 = arith.constant 0 : index
    %c0_163 = arith.constant 0 : index
    %c0_164 = arith.constant 0 : index
    %304 = vector.load %arg20[%c0_162, %c0_163, %c0_164] : memref<1x34x32xf32, #tpu.memory_space<vmem>>, vector<1x34x32xf32>
    %305 = vector.shape_cast %304 : vector<1x34x32xf32> to vector<34x32xf32>
    %306 = vector.shape_cast %303 : vector<34x32xf32> to vector<1x34x32xf32>
    tpu.vector_store %arg20[%c0_162, %c0_163, %c0_164], %306 {strides = array<i32>} : memref<1x34x32xf32, #tpu.memory_space<vmem>>, vector<1x34x32xf32>,
    return
  }
  func.func @transform_0(%arg0: i32) -> (i32, i32) {
    %c0_i32 = arith.constant 0 : i32
    %c0_i32_0 = arith.constant 0 : i32
    %c0_i32_1 = arith.constant 0 : i32
    return %c0_i32, %c0_i32_0 : i32, i32
  }
  func.func @transform_1(%arg0: i32) -> (i32, i32) {
    %c0_i32 = arith.constant 0 : i32
    %c0_i32_0 = arith.constant 0 : i32
    %c0_i32_1 = arith.constant 0 : i32
    return %c0_i32, %c0_i32_0 : i32, i32
  }
  func.func @transform_2(%arg0: i32) -> (i32, i32) {
    %c0_i32 = arith.constant 0 : i32
    %c0_i32_0 = arith.constant 0 : i32
    %c0_i32_1 = arith.constant 0 : i32
    return %c0_i32, %c0_i32_0 : i32, i32
  }
  func.func @transform_3(%arg0: i32) -> (i32, i32) {
    %c0_i32 = arith.constant 0 : i32
    %c0_i32_0 = arith.constant 0 : i32
    %c0_i32_1 = arith.constant 0 : i32
    return %c0_i32, %c0_i32_0 : i32, i32
  }
  func.func @transform_4(%arg0: i32) -> (i32, i32) {
    %c0_i32 = arith.constant 0 : i32
    %c0_i32_0 = arith.constant 0 : i32
    %c0_i32_1 = arith.constant 0 : i32
    return %c0_i32, %c0_i32_0 : i32, i32
  }
  func.func @transform_5(%arg0: i32) -> (i32, i32, i32) {
    %c0_i32 = arith.constant 0 : i32
    %c0_i32_0 = arith.constant 0 : i32
    %c0_i32_1 = arith.constant 0 : i32
    return %arg0, %c0_i32, %c0_i32_0 : i32, i32, i32
  }
  func.func @transform_6(%arg0: i32) -> (i32, i32, i32) {
    %c0_i32 = arith.constant 0 : i32
    %c0_i32_0 = arith.constant 0 : i32
    %c0_i32_1 = arith.constant 0 : i32
    return %arg0, %c0_i32, %c0_i32_0 : i32, i32, i32
  }
  func.func @transform_7(%arg0: i32) -> (i32, i32, i32) {
    %c0_i32 = arith.constant 0 : i32
    %c0_i32_0 = arith.constant 0 : i32
    %c0_i32_1 = arith.constant 0 : i32
    return %arg0, %c0_i32, %c0_i32_0 : i32, i32, i32
  }
  func.func @transform_8(%arg0: i32) -> (i32, i32, i32) {
    %c0_i32 = arith.constant 0 : i32
    %c0_i32_0 = arith.constant 0 : i32
    %c0_i32_1 = arith.constant 0 : i32
    return %arg0, %c0_i32, %c0_i32_0 : i32, i32, i32
  }
  func.func @transform_9(%arg0: i32) -> (i32, i32, i32) {
    %c0_i32 = arith.constant 0 : i32
    %c0_i32_0 = arith.constant 0 : i32
    %c0_i32_1 = arith.constant 0 : i32
    return %arg0, %c0_i32, %c0_i32_0 : i32, i32, i32
  }
  func.func @transform_10(%arg0: i32) -> (i32, i32, i32) {
    %c0_i32 = arith.constant 0 : i32
    %c0_i32_0 = arith.constant 0 : i32
    %c0_i32_1 = arith.constant 0 : i32
    return %arg0, %c0_i32, %c0_i32_0 : i32, i32, i32
  }
  func.func @transform_11(%arg0: i32) -> (i32, i32, i32) {
    %c0_i32 = arith.constant 0 : i32
    %c0_i32_0 = arith.constant 0 : i32
    %c0_i32_1 = arith.constant 0 : i32
    return %arg0, %c0_i32, %c0_i32_0 : i32, i32, i32
  }
  func.func @transform_12(%arg0: i32) -> (i32, i32, i32) {
    %c0_i32 = arith.constant 0 : i32
    %c0_i32_0 = arith.constant 0 : i32
    %c0_i32_1 = arith.constant 0 : i32
    return %arg0, %c0_i32, %c0_i32_0 : i32, i32, i32
  }
  func.func @transform_13(%arg0: i32) -> (i32, i32, i32) {
    %c0_i32 = arith.constant 0 : i32
    %c0_i32_0 = arith.constant 0 : i32
    %c0_i32_1 = arith.constant 0 : i32
    return %arg0, %c0_i32, %c0_i32_0 : i32, i32, i32
  }
  func.func @transform_14(%arg0: i32) -> (i32, i32, i32) {
    %c0_i32 = arith.constant 0 : i32
    %c0_i32_0 = arith.constant 0 : i32
    %c0_i32_1 = arith.constant 0 : i32
    return %arg0, %c0_i32, %c0_i32_0 : i32, i32, i32
  }
  func.func @transform_15(%arg0: i32) -> (i32, i32, i32) {
    %c0_i32 = arith.constant 0 : i32
    %c0_i32_0 = arith.constant 0 : i32
    %c0_i32_1 = arith.constant 0 : i32
    return %arg0, %c0_i32, %c0_i32_0 : i32, i32, i32
  }
  func.func @transform_16(%arg0: i32) -> (i32, i32, i32) {
    %c0_i32 = arith.constant 0 : i32
    %c0_i32_0 = arith.constant 0 : i32
    %c0_i32_1 = arith.constant 0 : i32
    return %arg0, %c0_i32, %c0_i32_0 : i32, i32, i32
  }
  func.func @transform_17(%arg0: i32) -> (i32, i32) {
    %c0_i32 = arith.constant 0 : i32
    %c0_i32_0 = arith.constant 0 : i32
    %c0_i32_1 = arith.constant 0 : i32
    return %c0_i32, %c0_i32_0 : i32, i32
  }
  func.func @transform_18(%arg0: i32) -> (i32, i32) {
    %c0_i32 = arith.constant 0 : i32
    %c0_i32_0 = arith.constant 0 : i32
    %c0_i32_1 = arith.constant 0 : i32
    return %c0_i32, %c0_i32_0 : i32, i32
  }
  func.func @transform_19(%arg0: i32) -> (i32, i32, i32) {
    %c0_i32 = arith.constant 0 : i32
    %c0_i32_0 = arith.constant 0 : i32
    %c0_i32_1 = arith.constant 0 : i32
    return %arg0, %c0_i32, %c0_i32_0 : i32, i32, i32
  }
}

</mosaic_0001>

<bundles_post_ra>
// kernel: squeeze.22
= control target key start
LH: loop header
LB: loop body
LE: loop exit
PB: predicated region body
PF: predicated region fallthrough
CT: control target
= control target key end

     0   :  { %vm3_vm0 = vcmask 261120   ;;  %s79_s0 = inlined_call_operand.vmem [shape: f32[1,34,32], index: 0, kind: input, shape index: {}]   ;;  %s80_s1 = inlined_call_operand.vmem [shape: f32[2,17,32], index: 1, kind: output, shape index: {}]  }
   0x1   :  { %v2_v0 = vld [vmem:[%s79_s0] sm:$0xff]   ;;  %v27_v1 = vld [vmem:[%s79_s0 + $0x8] sm:$0xff]   ;;  %v29_v2 = vld [vmem:[%s79_s0 + $0x10] sm:$0xff]  }
   0x2   :  { %4 = vst.msk [vmem:[%s80_s1] sm:$0xff] %vm3_vm0, %v2_v0   ;;  %28 = vst.msk [vmem:[%s80_s1 + $0x8] sm:$0xff] %vm3_vm0, %v27_v1   ;;  %v32_v3 = vld [vmem:[%s79_s0 + $0x18] sm:$0xff]   ;;  %v34_v4 = vld [vmem:[%s79_s0 + $0x20] sm:$0x3]  }
   0x3   :  { %30 = vst.msk [vmem:[%s80_s1 + $0x10] ss:$8 sm:$0x3] %vm3_vm0, %v29_v2   ;;  %31 = vst.msk [vmem:[%s80_s1 + $0x17] sm:$0xfc] %vm3_vm0, %v29_v2  }
   0x4   :  { %33 = vst.msk [vmem:[%s80_s1 + $0x1f] sm:$0xff] %vm3_vm0, %v32_v3   ;;  %35 = vst.msk [vmem:[%s80_s1 + $0x27] sm:$0x3] %vm3_vm0, %v34_v4  }

// kernel: vit_forward.1
= control target key start
LH: loop header
LB: loop body
LE: loop exit
PB: predicated region body
PF: predicated region fallthrough
CT: control target
= control target key end

     0   :  { %s4643_s0 = inlined_call_operand.vmem [shape: f32[32,48], index: 0, kind: input, shape index: {}]   ;;  %s4644_s1 = inlined_call_operand.vmem [shape: f32[48,32], index: 1, kind: input, shape index: {}]   ;;  %s4645_s2 = inlined_call_operand.vmem [shape: f32[1,32], index: 2, kind: input, shape index: {}]   ;;  %s4646_s3 = inlined_call_operand.vmem [shape: f32[1,32], index: 3, kind: input, shape index: {}]   ;;  %s4647_s4 = inlined_call_operand.vmem [shape: f32[17,32], index: 4, kind: input, shape index: {}]   ;;  %s4648_s5 = inlined_call_operand.vmem [shape: f32[8,1,32], index: 5, kind: input, shape index: {}]   ;;  %s4649_s6 = inlined_call_operand.vmem [shape: f32[8,1,32], index: 6, kind: input, shape index: {}]   ;;  %s4650_s7 = inlined_call_operand.vmem [shape: f32[8,32,96], index: 7, kind: input, shape index: {}]   ;;  %s4651_s8 = inlined_call_operand.vmem [shape: f32[8,1,96], index: 8, kind: input, shape index: {}]   ;;  %s4652_s9 = inlined_call_operand.vmem [shape: f32[8,32,32], index: 9, kind: input, shape index: {}]   ;;  %s4653_s10 = inlined_call_operand.vmem [shape: f32[8,1,32], index: 10, kind: input, shape index: {}]   ;;  %s4654_s11 = inlined_call_operand.vmem [shape: f32[8,1,32], index: 11, kind: input, shape index: {}]   ;;  %s4655_s12 = inlined_call_operand.vmem [shape: f32[8,1,32], index: 12, kind: input, shape index: {}]   ;;  %s4656_s13 = inlined_call_operand.vmem [shape: f32[8,32,128], index: 13, kind: input, shape index: {}]   ;;  %s4657_s14 = inlined_call_operand.vmem [shape: f32[8,1,128], index: 14, kind: input, shape index: {}]   ;;  %s4658_s15 = inlined_call_operand.vmem [shape: f32[8,128,32], index: 15, kind: input, shape index: {}]   ;;  %s4659_s16 = inlined_call_operand.vmem [shape: f32[8,1,32], index: 16, kind: input, shape index: {}]   ;;  %s4660_s17 = inlined_call_operand.vmem [shape: f32[1,32], index: 17, kind: input, shape index: {}]   ;;  %s4661_s18 = inlined_call_operand.vmem [shape: f32[1,32], index: 18, kind: input, shape index: {}]   ;;  %s4662_s19 = inlined_call_operand.vmem [shape: f32[8,34,32], index: 19, kind: output, shape index: {}]  }
   0x1   :  { %4668 = sst [smem:[#allocation7_spill]] %s4643_s0  ;;  %s3926_s0 = smov 0  }
   0x2   :  { %4669 = sst [smem:[#allocation8_spill]] %s4644_s1 }
   0x3   :  { %4670 = sst [smem:[#allocation9_spill]] %s4645_s2 }
   0x4   :  { %4671 = sst [smem:[#allocation10_spill]] %s4646_s3 }
   0x5   :  { %4672 = sst [smem:[#allocation11_spill]] %s4649_s6 }
   0x6   :  { %4673 = sst [smem:[#allocation12_spill]] %s4650_s7 }
   0x7   :  { %4674 = sst [smem:[#allocation13_spill]] %s4652_s9 }
   0x8   :  { %4675 = sst [smem:[#allocation14_spill]] %s4660_s17 }
   0x9   :  { %4676 = sst [smem:[#allocation15_spill]] %s4661_s18 }
   0xa LB: > { %4677 = sst [smem:[#allocation5_spill]] %s3807_s0  ;;  %s3234_s30 = sadd.s32 4294967295, %s3807_s0   ;;  %s3807_s0 = sphi %s3926_s0, %s29_s0  }
   0xb   : > { %p3238_p0 = scmp.ge.s32.totalorder %s3807_s0, 1  ;;  %p631_p1 = scmp.lt.s32.totalorder %s3807_s0, 9 }
   0xd   : > { %p632_p2 = pnand %p3238_p0, %p631_p1 }
   0xf   : > { %635 = sbr.rel (%p632_p2) target bundleno = 5947 (0x173b), region = 96 }
  0x16   : > { %p726_p3 = scmp.lt.s32.totalorder %s3234_s30, 7  ;;  %s4679_s7 = sld [smem:[#allocation12_spill]] }
  0x17   : > { %s4680_s9 = sld [smem:[#allocation13_spill]]  ;;  %p3248_p4 = scmp.ne.s32.totalorder %s3234_s30, 0 }
  0x18   : > { %s3934_s20 = scalar_select %p726_p3, %s3234_s30, 7 }
  0x19   : > { %779 = sbr.rel (%p3248_p4) target bundleno = 267 (0x10b), region = 100  ;;  %s4682_s0 = sld [smem:[#allocation8_spill]] (!%p3248_p4)  ;;  %vm802_vm0 = vcmask (!%p3248_p4), 392192   ;;  %v859_v16 = vld [vmem:[%s4647_s4] sm:$0x1] (!%p3248_p4)  ;;  %vm861_vm1 = vcmask (!%p3248_p4), 253952  }
  0x1a   : > { %s3305_s25 = sshll.u32 %s3934_s20, 5  ;;  %s769_s3 = scalar_lea.vmem %s4659_s16, %s3934_s20  ;;  %v871_v19 = vld [vmem:[%s4647_s4] sm:$0x1] (!%p3248_p4)  ;;  %v874_v23 = vld [vmem:[%s4647_s4 + $0x1] sm:$0xff] (!%p3248_p4)  ;;  %vm867_vm2 = vcmask (!%p3248_p4), 261120   ;;  %v875_v28 = vld [vmem:[%s4647_s4 + $0x9] sm:$0xff] (!%p3248_p4) }
  0x1b   : > { %s3634_s26 = smul.u32 40, %s3934_s20  ;;  %s4684_s29 = sld [smem:[#allocation7_spill]] (!%p3248_p4) }
  0x1c   : > { %s3952_s21 = scalar_lea.vmem %s4679_s7, %s3305_s25  ;;  %s3974_s7 = scalar_lea.vmem %s4656_s13, %s3305_s25 }
  0x1d   : > { %s3957_s18 = scalar_lea.vmem %s4680_s9, %s3305_s25  ;;  %s3994_s25 = scalar_lea.vmem %s4662_s19, %s3634_s26 }
  0x1e   : > { %4681 = sst [smem:[#allocation6_spill]] %s3957_s18  ;;  %s3308_s18 = sshll.u32 %s3934_s20, 7 }
  0x1f   : > { %s3984_s2 = scalar_lea.vmem %s4658_s15, %s3308_s18  ;;  %s4683_s1 = smov (!%p3248_p4), %s4682_s0  ;;  %v784_v0 = vld [vmem:[%s4682_s0] sm:$0xff] (!%p3248_p4) }
  0x20   : > { %v785_v1 = vld [vmem:[%s4683_s1 + $0x8] sm:$0xff]  ;;  %v786_v2 = vld [vmem:[%s4683_s1 + $0x10] sm:$0xff]  ;;  %v787_v4 = vld [vmem:[%s4683_s1 + $0x18] sm:$0xff]  ;;  %s4685_s27 = sld [smem:[#allocation10_spill]]  ;;  %s4686_s23 = sld [smem:[#allocation9_spill]] }
  0x21   : > { %v792_v3 = vpack.c.bf16 %v785_v1, %v784_v0  ;;  %v788_v5 = vld [vmem:[%s4683_s1 + $0x20] sm:$0xff]  ;;  %v793_v6 = vpack.c.bf16 %v787_v4, %v786_v2  ;;  %v789_v7 = vld [vmem:[%s4683_s1 + $0x28] sm:$0xff]  ;;  %v782_v12 = vld [vmem:[%s4684_s29 + $0x10] sm:$0xff] }
  0x22   : > { %v780_v8 = vld [vmem:[%s4684_s29] sm:$0xff]  ;;  %v781_v9 = vld [vmem:[%s4684_s29 + $0x8] sm:$0xff]  ;;  %v794_v11 = vpack.c.bf16 %v789_v7, %v788_v5  ;;  %v783_v13 = vld [vmem:[%s4684_s29 + $0x18] sm:$0xff] }
  0x23   : > { %3404 = vmatprep.subr.bf16.mxu0 %v792_v3  ;;  %v790_v10 = vpack.c.bf16 %v781_v9, %v780_v8  ;;  %v791_v14 = vpack.c.bf16 %v783_v13, %v782_v12 }
  0x24   : > { %3405 = vmatpush3.bf16.msra.mxu0 %v792_v3 }
  0x25   : > { %3406 = vmatprep.subr.bf16.mxu0 %v793_v6  ;;  %3410 = vmatprep.mubr.msk.bf16.mxu0 %vm802_vm0, %v790_v10 }
  0x26   : > { %v858_v15 = vld [vmem:[%s4685_s27] sm:$0x1] }
  0x27   : > { %v870_v17 = vld [vmem:[%s4685_s27] sm:$0x1]  ;;  %v860_v18 = vadd.f32 %v859_v16, %v858_v15 }
  0x28   : > { %3407 = vmatpush3.bf16.msra.mxu0 %v793_v6  ;;  %v872_v20 = vadd.f32 %v871_v19, %v870_v17  ;;  %v3249_v21 = vld [vmem:[%s4686_s23] ss:$0 sm:$0xff] }
  0x29   : > { %3408 = vmatprep.subr.bf16.mxu0 %v794_v11  ;;  %862 = vst.msk [vmem:[#allocation2] sm:$0x1] %vm861_vm1, %v860_v18 }
  0x2a   : > { %873 = vst.msk [vmem:[#allocation2 + $0x11] sm:$0x1] %vm861_vm1, %v872_v20 }
  0x2c   : > { %3409 = vmatpush3.bf16.msra.mxu0 %v794_v11 }
  0x2f   : > { %3411 = vmatmul.mubr.msk.bf16.vlgmr.msra.gmra.mrb[0].mxu0 %vm802_vm0, %v791_v14 }
 0x102   : > { %v3412_v22 = vpop.f32.mrb[0].mxu0 }
 0x103   : > { %v852_v24 = vadd.f32 %v3412_v22, %v3249_v21  ;;  %v843_v25 = vpop.f32.mrb[1].mxu0 }
 0x104   : > { %v844_v26 = vadd.f32 %v3249_v21, %v843_v25  ;;  %v3413_v27 = vpop.f32.mrb[2].mxu0 }
 0x105   : > { %v876_v29 = vadd.f32 %v874_v23, %v852_v24  ;;  %v855_v30 = vadd.f32 %v3413_v27, %v3249_v21  ;;  %v846_v31 = vpop.f32.mrb[3].mxu0 }
 0x106   : > { %v865_v32 = vadd.f32 %v874_v23, %v844_v26  ;;  %v847_v33 = vadd.f32 %v3249_v21, %v846_v31 }
 0x107   : > { %878 = vst.msk [vmem:[#allocation2 + $0x12] sm:$0xff] %vm867_vm2, %v876_v29  ;;  %v877_v34 = vadd.f32 %v875_v28, %v855_v30 }
 0x108   : > { %868 = vst.msk [vmem:[#allocation2 + $0x1] sm:$0xff] %vm867_vm2, %v865_v32  ;;  %v866_v35 = vadd.f32 %v875_v28, %v847_v33 }
 0x109   : > { %879 = vst.msk [vmem:[#allocation2 + $0x1a] sm:$0xff] %vm867_vm2, %v877_v34 }
 0x10a   : > { %869 = vst.msk [vmem:[#allocation2 + $0x9] sm:$0xff] %vm867_vm2, %v866_v35 }
 0x10b PF: > { %vm887_vm3 = vcmask 261120   ;;  %vm900_vm4 = vcmask 254976   ;;  %v977_v2 = vld [vmem:[%s3952_s21] sm:$0xff]  ;;  %v978_v3 = vld [vmem:[%s3952_s21 + $0x8] sm:$0xff]  ;;  %v979_v4 = vld [vmem:[%s3952_s21 + $0x10] sm:$0xff]  ;;  %v3809_v5 = vmov 0.0   ;;  %s4687_s0 = scalar_lea.vmem %s4648_s5, %s3934_s20  ;;  %s4690_s30 = scalar_lea.vmem %s4651_s8, %s3934_s20 }
 0x10c   : > { %3414 = vmatprep.subr.bf16.mxu1 %v3809_v5  ;;  %v984_v6 = vpack.c.bf16 %v978_v3, %v977_v2  ;;  %v980_v7 = vld [vmem:[%s3952_s21 + $0x18] sm:$0xff]  ;;  %vm3810_vm5 = vmmov 0   ;;  %v3252_v28 = vld [vmem:[%s4687_s0] ss:$0 sm:$0xff]  ;;  %s4688_s22 = sld [smem:[#allocation11_spill]]  ;;  %vm1058_vm6 = vcmask 785408  }
 0x10d   : > { %3418 = vmatprep.mubr.msk.bf16.mxu1 %vm3810_vm5, %v3809_v5  ;;  %v985_v8 = vpack.c.bf16 %v980_v7, %v979_v4  ;;  %vm1076_vm7 = vcmask 64512   ;;  %s3811_s26 = smov 96   ;;  %s3812_s9 = smov 88   ;;  %vm1063_vm8 = vcmask 779264   ;;  %vm1140_vm9 = vcmask 138240  }
 0x10e   : > { %3415 = vmatpush3.bf16.msra.mxu1 %v984_v6  ;;  %s3813_s21 = smov 120   ;;  %s3814_s28 = smov 112   ;;  %vm1147_vm10 = vcmask 131072   ;;  %vm1188_vm11 = vcmask 1040384   ;;  %vm1244_vm12 = vcmask 57344   ;;  %vm1433_vm13 = vcmask 130112  }
 0x10f   : > { %v880_v36 = vld [vmem:[#allocation2] sm:$0xff]  ;;  %3416 = vmatprep.subr.bf16.mxu1 %v3809_v5  ;;  %s3815_s0 = smov 80   ;;  %s3816_s17 = smov 64   ;;  %vm1625_vm14 = vcmask 195712   ;;  %vm1817_vm15 = vcmask 261312   ;;  %vm1436_vm0 = vcmask 122944  }
 0x110   : > { %v888_v39 = vsel %vm887_vm3, %v880_v36, 0.0  ;;  %v883_v41 = vld [vmem:[#allocation2 + $0x18] sm:$0xff]  ;;  %v884_v62 = vld [vmem:[#allocation2 + $0x20] sm:$0x3]  ;;  %s3817_s18 = smov 56   ;;  %s3820_s23 = smov 104  }
 0x111   : > { %v882_v37 = vld [vmem:[#allocation2 + $0x10] sm:$0xff]  ;;  %v881_v38 = vld [vmem:[#allocation2 + $0x8] sm:$0xff]  ;;  %889 = vadd.xlane.f32.xlu0 %v888_v39  ;;  %v897_v43 = vsel %vm887_vm3, %v883_v41, 0.0  ;;  %v901_v0 = vsel %vm900_vm4, %v884_v62, 0.0  ;;  %s3822_s6 = smov 40   ;;  %vm1628_vm1 = vcmask 188544  }
 0x112   : > { %v894_v40 = vsel %vm887_vm3, %v882_v37, 0.0  ;;  %v891_v42 = vsel %vm887_vm3, %v881_v38, 0.0  ;;  %3417 = vmatpush3.bf16.msra.mxu1 %v985_v8  ;;  %s4689_s24 = scalar_lea.vmem %s4688_s22, %s3934_s20  ;;  %s3818_s22 = smov 48   ;;  %vm1820_vm2 = vcmask 254144  }
 0x113   : > { %895 = vadd.xlane.f32.xlu1 %v894_v40  ;;  %v3253_v33 = vld [vmem:[%s4689_s24] ss:$0 sm:$0xff]  ;;  %s3819_s24 = smov 72  }
 0x115   : > { %892 = vadd.xlane.f32.xlu0 %v891_v42 }
 0x117   : > { %898 = vadd.xlane.f32.xlu1 %v897_v43 }
 0x19e   : > { %v890_v44 = vpop.xlane.xlu0 %889 }
 0x19f   : > { %v905_v46 = vmul.f32 0.03125, %v890_v44 }
 0x1a0   : > { %v896_v45 = vpop.xlane.xlu1 %895 }
 0x1a1   : > { %v907_v47 = vmul.f32 0.03125, %v896_v45  ;;  %v910_v48 = vsub.f32 %v880_v36, %v905_v46 }
 0x1a2   : > { %v893_v50 = vpop.xlane.xlu0 %892 }
 0x1a3   : > { %v4051_v49 = vsub.f32 %v882_v37, %v907_v47  ;;  %v906_v52 = vmul.f32 0.03125, %v893_v50  ;;  %v915_v54 = vmul.f32 %v910_v48, %v910_v48 }
 0x1a4   : > { %v899_v51 = vpop.xlane.xlu1 %898 }
 0x1a5   : > { %v908_v53 = vmul.f32 0.03125, %v899_v51  ;;  %v917_v55 = vmul.f32 %v4051_v49, %v4051_v49  ;;  %v911_v56 = vsub.f32 %v881_v38, %v906_v52  ;;  %v920_v58 = vsel %vm887_vm3, %v915_v54, 0.0  ;;  %v4097_v54 = vld [vmem:[%s4690_s30] ss:$0 sm:$0xff]  ;;  %s3823_s30 = smov 8  }
 0x1a6   : > { %921 = vadd.xlane.f32.xlu0 %v920_v58 }
 0x1a7   : > { %v4055_v57 = vsub.f32 %v883_v41, %v908_v53  ;;  %v926_v59 = vsel %vm887_vm3, %v917_v55, 0.0  ;;  %v916_v60 = vmul.f32 %v911_v56, %v911_v56 }
 0x1a9   : > { %v918_v61 = vmul.f32 %v4055_v57, %v4055_v57  ;;  %v923_v63 = vsel %vm887_vm3, %v916_v60, 0.0 }
 0x1aa   : > { %927 = vadd.xlane.f32.xlu0 %v926_v59  ;;  %924 = vadd.xlane.f32.xlu1 %v923_v63 }
 0x1ab   : > { %v929_v1 = vsel %vm887_vm3, %v918_v61, 0.0 }
 0x1ae   : > { %902 = vadd.xlane.f32.xlu0 %v901_v0  ;;  %930 = vadd.xlane.f32.xlu1 %v929_v1 }
 0x233   : > { %v922_v9 = vpop.xlane.xlu0 %921 }
 0x234   : > { %v935_v10 = vmul.f32 0.03125, %v922_v9 }
 0x236   : > { %v940_v11 = vadd.f32 1e-06, %v935_v10 }
 0x237   : > { %v925_v12 = vpop.xlane.xlu1 %924  ;;  %v928_v13 = vpop.xlane.xlu0 %927 }
 0x238   : > { %3660 = vrsqrt.f32 %v940_v11  ;;  %v936_v14 = vmul.f32 0.03125, %v925_v12  ;;  %v937_v15 = vmul.f32 0.03125, %v928_v13 }
 0x23a   : > { %v941_v16 = vadd.f32 1e-06, %v936_v14  ;;  %v942_v17 = vadd.f32 1e-06, %v937_v15 }
 0x23b   : > { %v931_v18 = vpop.xlane.xlu1 %930  ;;  %v903_v19 = vpop.xlane.xlu0 %902 }
 0x23c   : > { %3662 = vrsqrt.f32 %v941_v16  ;;  %v938_v20 = vmul.f32 0.03125, %v931_v18  ;;  %v909_v21 = vmul.f32 0.03125, %v903_v19 }
 0x23d   : > { %3664 = vrsqrt.f32 %v942_v17 }
 0x23e   : > { %v943_v22 = vadd.f32 1e-06, %v938_v20  ;;  %v914_v23 = vsub.f32 %v884_v62, %v909_v21 }
 0x240   : > { %3666 = vrsqrt.f32 %v943_v22  ;;  %v919_v24 = vmul.f32 %v914_v23, %v914_v23 }
 0x242   : > { %v3661_v25 = vpop.eup %3660  ;;  %v932_v26 = vsel %vm900_vm4, %v919_v24, 0.0 }
 0x243   : > { %933 = vadd.xlane.f32.xlu1 %v932_v26  ;;  %v950_v27 = vmul.f32 %v3661_v25, %v910_v48 }
 0x245   : > { %v961_v31 = vmul.f32 %v3252_v28, %v950_v27 }
 0x246   : > { %v3663_v29 = vpop.eup %3662 }
 0x247   : > { %v951_v30 = vmul.f32 %v3663_v29, %v911_v56  ;;  %v3665_v32 = vpop.eup %3664  ;;  %v972_v36 = vadd.f32 %v3253_v33, %v961_v31 }
 0x248   : > { %v952_v38 = vmul.f32 %v3665_v32, %v4051_v49 }
 0x249   : > { %v962_v34 = vmul.f32 %v3252_v28, %v951_v30 }
 0x24a   : > { %v3667_v35 = vpop.eup %3666  ;;  %v963_v42 = vmul.f32 %v3252_v28, %v952_v38 }
 0x24b   : > { %v973_v37 = vadd.f32 %v3253_v33, %v962_v34  ;;  %v953_v39 = vmul.f32 %v3667_v35, %v4055_v57 }
 0x24c   : > { %v974_v44 = vadd.f32 %v3253_v33, %v963_v42 }
 0x24d   : > { %v981_v40 = vpack.c.bf16 %v973_v37, %v972_v36  ;;  %v964_v41 = vmul.f32 %v3252_v28, %v953_v39 }
 0x24f   : > { %3419 = vmatmul.mubr.msk.bf16.vlgmr.msra.gmra.mrb[0].mxu1 %vm887_vm3, %v981_v40  ;;  %v975_v43 = vadd.f32 %v3253_v33, %v964_v41 }
 0x250   : > { %3422 = vmatprep.mubr.msk.bf16.mxu1 %vm3810_vm5, %v3809_v5 }
 0x251   : > { %v982_v45 = vpack.c.bf16 %v975_v43, %v974_v44 }
 0x257   : > { %3423 = vmatmul.mubr.msk.bf16.gmra.mrb[4].mxu1 %vm887_vm3, %v982_v45 }
 0x258   : > { %3426 = vmatprep.mubr.msk.bf16.mxu1 %vm3810_vm5, %v3809_v5 }
 0x2d0   : > { %v934_v46 = vpop.xlane.xlu1 %933 }
 0x2d1   : > { %v939_v47 = vmul.f32 0.03125, %v934_v46 }
 0x2d3   : > { %v944_v48 = vadd.f32 1e-06, %v939_v47 }
 0x2d5   : > { %3668 = vrsqrt.f32 %v944_v48 }
 0x2df   : > { %v3669_v49 = vpop.eup %3668 }
 0x2e0   : > { %v954_v50 = vmul.f32 %v3669_v49, %v914_v23 }
 0x2e2   : > { %v965_v51 = vmul.f32 %v3252_v28, %v954_v50 }
 0x2e4   : > { %v976_v52 = vadd.f32 %v3253_v33, %v965_v51 }
 0x2e6   : > { %v983_v53 = vpack.c.bf16 %v976_v52, %v976_v52 }
 0x2e8   : > { %3427 = vmatmul.mubr.msk.bf16.gmra.mrb[8].mxu1 %vm887_vm3, %v983_v53 }
 0x322   : > { %v1036_v55 = vpop.f32.mrb[0].mxu1 }
 0x323   : > { %v1037_v56 = vadd.f32 %v4097_v54, %v1036_v55  ;;  %v3420_v57 = vpop.f32.mrb[1].mxu1 }
 0x324   : > { %v1039_v58 = vpop.f32.mrb[2].mxu1 }
 0x325   : > { %1059 = vst.msk [vmem:[#allocation3] sm:$0xff] %vm1058_vm6, %v1037_v56  ;;  %v1040_v59 = vadd.f32 %v4097_v54, %v1039_v58  ;;  %v3421_v60 = vpop.f32.mrb[3].mxu1 }
 0x327   : > { %1060 = vst.msk [vmem:[#allocation3 + $0x8] sm:$0xff] %vm1058_vm6, %v1040_v59 }
 0x32a   : > { %v1044_v61 = vpop.f32.mrb[4].mxu1 }
 0x32b   : > { %v1045_v62 = vadd.f32 %v4097_v54, %v1044_v61  ;;  %v3424_v63 = vpop.f32.mrb[5].mxu1 }
 0x32c   : > { %v1047_v0 = vpop.f32.mrb[6].mxu1  ;;  %v1065_v3 = vld [vmem:[#allocation3] sm:$0xff] }
 0x32d   : > { %1061 = vst.msk [vmem:[#allocation3 + $0x10] sm:$0xff] %vm1058_vm6, %v1045_v62  ;;  %v1048_v1 = vadd.f32 %v4097_v54, %v1047_v0  ;;  %v3425_v2 = vpop.f32.mrb[7].mxu1 }
 0x32e   : > { %v1066_v4 = vld [vmem:[#allocation3 + $0x8] sm:$0xff] }
 0x32f   : > { %1062 = vst.msk [vmem:[#allocation3 + $0x18] sm:$0xff] %vm1058_vm6, %v1048_v1  ;;  %v4107_v6 = vpack.c.bf16 %v1066_v4, %v1065_v3 }
 0x331   : > { %1072 = vrot.lane.b32.xlu0 %v4107_v6, %s3811_s26  ;;  %1257 = vrot.lane.b32.xlu1 %v4107_v6, %s3812_s9 }
 0x332   : > { %3434 = vmatprep.mubr.msk.bf16.mxu1 %vm1076_vm7, %v4107_v6 }
 0x334   : > { %v1067_v7 = vld [vmem:[#allocation3 + $0x10] sm:$0x1] }
 0x335   : > { %v1248_v8 = vld [vmem:[#allocation3 + $0x10] sm:$0x1]  ;;  %1253 = vrot.lane.b32.xlu0 %v4107_v6, %s3813_s21  ;;  %v4117_v9 = vpack.c.bf16 %v1067_v7, %v1067_v7 }
 0x336   : > { %v4121_v10 = vpack.c.bf16 %v1248_v8, %v1248_v8  ;;  %v1440_v11 = vld [vmem:[#allocation3 + $0x10] sm:$0x1] }
 0x337   : > { %1074 = vrot.lane.b32.xlu1 %v4117_v9, %s3811_s26  ;;  %v4131_v12 = vpack.c.bf16 %v1440_v11, %v1440_v11 }
 0x339   : > { %1255 = vrot.lane.b32.xlu0 %v4121_v10, %s3813_s21 }
 0x33b   : > { %1259 = vrot.lane.b32.xlu1 %v4121_v10, %s3812_s9 }
 0x33d   : > { %1445 = vrot.lane.b32.xlu0 %v4107_v6, %s3814_s28 }
 0x33f   : > { %1449 = vrot.lane.b32.xlu1 %v4107_v6, %s3815_s0 }
 0x343   : > { %1451 = vrot.lane.b32.xlu1 %v4131_v12, %s3815_s0 }
 0x347   : > { %1447 = vrot.lane.b32.xlu1 %v4131_v12, %s3814_s28 }
 0x3a3   : > { %v1258_v13 = vpop.permute.xlu1 %1257  ;;  %v1073_v14 = vpop.permute.xlu0 %1072 }
 0x3a4   : > { %3618 = vmatprep.subr.msk.bf16.mxu1 %vm1076_vm7, %v1073_v14  ;;  %3620 = vmatprep.subr.msk.bf16.mxu0 %vm1076_vm7, %v1258_v13  ;;  %v1084_v15 = vsel %vm1076_vm7, %v1073_v14, 0  ;;  %v1268_v16 = vsel %vm1076_vm7, %v1258_v13, 0 }
 0x3a5   : > { %3431 = vmatpush3.bf16.xpose.msra.mxu1 %v1084_v15  ;;  %3447 = vmatpush3.bf16.xpose.msra.mxu0 %v1268_v16 }
 0x3a7   : > { %v1254_v17 = vpop.permute.xlu0 %1253 }
 0x3a8   : > { %3450 = vmatprep.mubr.msk.bf16.mxu0 %vm1076_vm7, %v1254_v17 }
 0x3a9   : > { %v1075_v18 = vpop.permute.xlu1 %1074 }
 0x3aa   : > { %3619 = vmatprep.subr.msk.bf16.mxu1 %vm1076_vm7, %v1075_v18  ;;  %v1087_v19 = vsel %vm1076_vm7, %v1075_v18, 0 }
 0x3ab   : > { %v1256_v22 = vpop.permute.xlu0 %1255 }
 0x3ad   : > { %v1260_v20 = vpop.permute.xlu1 %1259  ;;  %3433 = vmatpush3.bf16.xpose.msra.mxu1 %v1087_v19 }
 0x3ae   : > { %3621 = vmatprep.subr.msk.bf16.mxu0 %vm1076_vm7, %v1260_v20  ;;  %v1271_v21 = vsel %vm1076_vm7, %v1260_v20, 0 }
 0x3af   : > { %3449 = vmatpush3.bf16.xpose.msra.mxu0 %v1271_v21  ;;  %v1446_v24 = vpop.permute.xlu0 %1445 }
 0x3b1   : > { %v1450_v23 = vpop.permute.xlu1 %1449 }
 0x3b2   : > { %3622 = vmatprep.subr.msk.bf16.mxu0 %vm1076_vm7, %v1450_v23  ;;  %v1460_v25 = vsel %vm1076_vm7, %v1450_v23, 0 }
 0x3b4   : > { %3435 = vmatmul.mubr.msk.bf16.vlgmr.msra.gmra.mrb[12].mxu1 %vm1076_vm7, %v4117_v9 }
 0x3b5   : > { %v1452_v26 = vpop.permute.xlu1 %1451 }
 0x3b6   : > { %3451 = vmatmul.mubr.msk.bf16.vlgmr.msra.gmra.mrb[0].mxu0 %vm1076_vm7, %v1256_v22  ;;  %v1463_v31 = vsel %vm1076_vm7, %v1452_v26, 0 }
 0x3b7   : > { %3463 = vmatpush3.bf16.xpose.msra.mxu0 %v1460_v25  ;;  %3466 = vmatprep.mubr.msk.bf16.mxu0 %vm1076_vm7, %v1446_v24 }
 0x3b8   : > { %3623 = vmatprep.subr.msk.bf16.mxu0 %vm1076_vm7, %v1452_v26 }
 0x3b9   : > { %v1448_v33 = vpop.permute.xlu1 %1447 }
 0x3bb   : > { %v1052_v27 = vpop.f32.mrb[8].mxu1 }
 0x3bc   : > { %v1053_v28 = vadd.f32 %v4097_v54, %v1052_v27  ;;  %v3428_v29 = vpop.f32.mrb[9].mxu1 }
 0x3bd   : > { %v1055_v30 = vpop.f32.mrb[10].mxu1 }
 0x3be   : > { %1064 = vst.msk [vmem:[#allocation3 + $0x20] sm:$0x3] %vm1063_vm8, %v1053_v28  ;;  %v3429_v32 = vpop.f32.mrb[11].mxu1 }
 0x3bf   : > { %3465 = vmatpush3.bf16.xpose.msra.mxu0 %v1463_v31 }
 0x3c6   : > { %3467 = vmatmul.mubr.msk.bf16.vlgmr.msra.gmra.mrb[4].mxu0 %vm1076_vm7, %v1448_v33 }
 0x487   : > { %v3436_v34 = vpop.f32.mrb[12].mxu1 }
 0x488   : > { %v1123_v35 = vpop.f32.mrb[13].mxu1  ;;  %v1139_v41 = vmul.f32 0.35355338, %v3436_v34 }
 0x489   : > { %v1137_v36 = vmul.f32 0.35355338, %v1123_v35  ;;  %v3437_v37 = vpop.f32.mrb[14].mxu1  ;;  %v3452_v38 = vpop.f32.mrb[0].mxu0 }
 0x48a   : > { %v1126_v39 = vpop.f32.mrb[15].mxu1  ;;  %v1307_v40 = vpop.f32.mrb[1].mxu0  ;;  %v1323_v46 = vmul.f32 0.35355338, %v3452_v38  ;;  %v1148_v49 = vsel %vm1147_vm10, %v1139_v41, -inf }
 0x48b   : > { %v1138_v42 = vmul.f32 0.35355338, %v1126_v39  ;;  %v3453_v43 = vpop.f32.mrb[2].mxu0  ;;  %v1141_v44 = vsel %vm1140_vm9, %v1137_v36, -inf  ;;  %v1321_v48 = vmul.f32 0.35355338, %v1307_v40 }
 0x48c   : > { %1142 = vmax.xlane.f32.xlu0 %v1141_v44  ;;  %v1310_v45 = vpop.f32.mrb[3].mxu0  ;;  %v1330_v50 = vsel %vm1147_vm10, %v1323_v46, -inf }
 0x48d   : > { %v1144_v47 = vsel %vm1140_vm9, %v1138_v42, -inf  ;;  %v1322_v51 = vmul.f32 0.35355338, %v1310_v45  ;;  %v1324_v52 = vsel %vm1140_vm9, %v1321_v48, -inf }
 0x48e   : > { %1145 = vmax.xlane.f32.xlu1 %v1144_v47 }
 0x48f   : > { %v1327_v53 = vsel %vm1140_vm9, %v1322_v51, -inf }
 0x490   : > { %1149 = vmax.xlane.f32.xlu0 %v1148_v49 }
 0x492   : > { %1331 = vmax.xlane.f32.xlu1 %v1330_v50 }
 0x494   : > { %1325 = vmax.xlane.f32.xlu0 %v1324_v52 }
 0x498   : > { %1328 = vmax.xlane.f32.xlu0 %v1327_v53 }
 0x499   : > { %v3468_v54 = vpop.f32.mrb[4].mxu0 }
 0x49a   : > { %v1499_v55 = vpop.f32.mrb[5].mxu0  ;;  %v1515_v59 = vmul.f32 0.35355338, %v3468_v54 }
 0x49b   : > { %v1513_v56 = vmul.f32 0.35355338, %v1499_v55  ;;  %v3469_v57 = vpop.f32.mrb[6].mxu0 }
 0x49c   : > { %v1502_v58 = vpop.f32.mrb[7].mxu0  ;;  %v1522_v63 = vsel %vm1147_vm10, %v1515_v59, -inf }
 0x49d   : > { %v1514_v60 = vmul.f32 0.35355338, %v1502_v58  ;;  %v1516_v61 = vsel %vm1140_vm9, %v1513_v56, -inf }
 0x49e   : > { %1517 = vmax.xlane.f32.xlu0 %v1516_v61 }
 0x49f   : > { %v1519_v62 = vsel %vm1140_vm9, %v1514_v60, -inf }
 0x4a0   : > { %1520 = vmax.xlane.f32.xlu1 %v1519_v62 }
 0x4a2   : > { %1523 = vmax.xlane.f32.xlu0 %v1522_v63 }
 0x4b1   : > { %1177 = vrot.lane.b32.xlu1 %v4107_v6, %s3816_s17 }
 0x519   : > { %v1143_v0 = vpop.xlane.xlu0 %1142 }
 0x51a   : > { %v1151_v1 = vsub.f32 %v1137_v36, %v1143_v0 }
 0x51b   : > { %v1146_v2 = vpop.xlane.xlu1 %1145 }
 0x51c   : > { %v1154_v7 = vmul.f32 1.442695, %v1151_v1  ;;  %v1152_v14 = vsub.f32 %v1138_v42, %v1146_v2 }
 0x51d   : > { %v1150_v3 = vpop.xlane.xlu0 %1149 }
 0x51e   : > { %v1153_v4 = vsub.f32 %v1139_v41, %v1150_v3  ;;  %v1156_v19 = vmul.f32 1.442695, %v1152_v14  ;;  %v3821_v3 = vmov 0  }
 0x51f   : > { %v1332_v8 = vpop.xlane.xlu1 %1331 }
 0x520   : > { %v1158_v11 = vmul.f32 1.442695, %v1153_v4  ;;  %v1335_v13 = vsub.f32 %v1323_v46, %v1332_v8  ;;  %v4222_v4 = vsel %vm1188_vm11, 65535, %v3821_v3 }
 0x521   : > { %v1326_v15 = vpop.xlane.xlu0 %1325 }
 0x522   : > { %3670 = vpow2.f32 %v1158_v11  ;;  %v1340_v16 = vmul.f32 1.442695, %v1335_v13  ;;  %v1333_v17 = vsub.f32 %v1321_v48, %v1326_v15 }
 0x523   : > { %3672 = vpow2.f32 %v1154_v7 }
 0x524   : > { %3674 = vpow2.f32 %v1340_v16  ;;  %v1336_v18 = vmul.f32 1.442695, %v1333_v17 }
 0x525   : > { %v1329_v20 = vpop.xlane.xlu0 %1328 }
 0x526   : > { %3676 = vpow2.f32 %v1336_v18  ;;  %v1334_v21 = vsub.f32 %v1322_v51, %v1329_v20  ;;  %v1632_v51 = vld [vmem:[#allocation3 + $0x10] sm:$0x1] }
 0x527   : > { %3678 = vpow2.f32 %v1156_v19  ;;  %v4210_v52 = vpack.c.bf16 %v1632_v51, %v1632_v51 }
 0x528   : > { %v1338_v22 = vmul.f32 1.442695, %v1334_v21 }
 0x52a   : > { %3680 = vpow2.f32 %v1338_v22 }
 0x52b   : > { %v1518_v23 = vpop.xlane.xlu0 %1517 }
 0x52c   : > { %v4167_v24 = vpop.eup %3670  ;;  %v1525_v29 = vsub.f32 %v1513_v56, %v1518_v23 }
 0x52d   : > { %v4169_v25 = vpop.eup %3672  ;;  %v1521_v26 = vpop.xlane.xlu1 %1520  ;;  %v1166_v27 = vsel %vm1147_vm10, %v4167_v24, 0.0 }
 0x52e   : > { %v4173_v28 = vpop.eup %3674  ;;  %1167 = vadd.xlane.f32.xlu1 %v1166_v27  ;;  %v1160_v35 = vsel %vm1140_vm9, %v4169_v25, 0.0  ;;  %v1528_v36 = vmul.f32 1.442695, %v1525_v29  ;;  %v1526_v37 = vsub.f32 %v1514_v60, %v1521_v26 }
 0x52f   : > { %v1524_v30 = vpop.xlane.xlu0 %1523  ;;  %v1348_v31 = vsel %vm1147_vm10, %v4173_v28, 0.0 }
 0x530   : > { %v4177_v32 = vpop.eup %3676  ;;  %v1527_v33 = vsub.f32 %v1515_v59, %v1524_v30  ;;  %1349 = vadd.xlane.f32.xlu0 %v1348_v31  ;;  %v1530_v43 = vmul.f32 1.442695, %v1526_v37 }
 0x531   : > { %v1178_v34 = vpop.permute.xlu1 %1177  ;;  %v3679_v39 = vpop.eup %3678  ;;  %v1342_v40 = vsel %vm1140_vm9, %v4177_v32, 0.0 }
 0x532   : > { %v1532_v38 = vmul.f32 1.442695, %v1527_v33  ;;  %3438 = vmatprep.subr.bf16.mxu1 %v1178_v34  ;;  %1161 = vadd.xlane.f32.xlu1 %v1160_v35  ;;  %v1163_v44 = vsel %vm1140_vm9, %v3679_v39, 0.0 }
 0x533   : > { %3439 = vmatpush3.bf16.msra.mxu1 %v1178_v34 }
 0x534   : > { %v4183_v41 = vpop.eup %3680  ;;  %3682 = vpow2.f32 %v1532_v38  ;;  %1343 = vadd.xlane.f32.xlu0 %v1342_v40 }
 0x535   : > { %v1345_v42 = vsel %vm1140_vm9, %v4183_v41, 0.0  ;;  %3684 = vpow2.f32 %v1528_v36 }
 0x536   : > { %1346 = vadd.xlane.f32.xlu1 %v1345_v42  ;;  %3686 = vpow2.f32 %v1530_v43 }
 0x538   : > { %1164 = vadd.xlane.f32.xlu0 %v1163_v44 }
 0x53e   : > { %v4188_v45 = vpop.eup %3682 }
 0x53f   : > { %v1540_v46 = vsel %vm1147_vm10, %v4188_v45, 0.0  ;;  %v4192_v47 = vpop.eup %3684 }
 0x540   : > { %1541 = vadd.xlane.f32.xlu0 %v1540_v46  ;;  %v1534_v48 = vsel %vm1140_vm9, %v4192_v47, 0.0  ;;  %v4196_v49 = vpop.eup %3686 }
 0x541   : > { %v1537_v50 = vsel %vm1140_vm9, %v4196_v49, 0.0 }
 0x544   : > { %1535 = vadd.xlane.f32.xlu0 %v1534_v48 }
 0x547   : > { %1359 = vrot.lane.b32.xlu1 %v4107_v6, %s3817_s18 }
 0x548   : > { %1538 = vadd.xlane.f32.xlu0 %v1537_v50 }
 0x54b   : > { %1361 = vrot.lane.b32.xlu1 %v4121_v10, %s3817_s18 }
 0x54f   : > { %1551 = vrot.lane.b32.xlu1 %v4107_v6, %s3818_s22 }
 0x553   : > { %1553 = vrot.lane.b32.xlu1 %v4131_v12, %s3818_s22 }
 0x557   : > { %1641 = vrot.lane.b32.xlu1 %v4107_v6, %s3819_s24 }
 0x55b   : > { %1643 = vrot.lane.b32.xlu1 %v4210_v52, %s3819_s24 }
 0x55e   : > { %1179 = vrot.lane.b32.xlu0 %v4117_v9, %s3816_s17 }
 0x55f   : > { %1639 = vrot.lane.b32.xlu1 %v4210_v52, %s3820_s23 }
 0x562   : > { %1637 = vrot.lane.b32.xlu0 %v4107_v6, %s3820_s23 }
 0x5bb   : > { %v1168_v10 = vpop.xlane.xlu1 %1167 }
 0x5bd   : > { %v1350_v12 = vpop.xlane.xlu0 %1349 }
 0x5bf   : > { %v1162_v53 = vpop.xlane.xlu1 %1161 }
 0x5c0   : > { %3688 = vrcp.f32 %v1162_v53 }
 0x5c1   : > { %v1344_v54 = vpop.xlane.xlu0 %1343 }
 0x5c3   : > { %v1347_v56 = vpop.xlane.xlu1 %1346 }
 0x5c5   : > { %v1165_v55 = vpop.xlane.xlu0 %1164 }
 0x5c6   : > { %3690 = vrcp.f32 %v1165_v55 }
 0x5c7   : > { %3692 = vrcp.f32 %v1168_v10  ;;  %v1360_v62 = vpop.permute.xlu1 %1359 }
 0x5c8   : > { %3694 = vrcp.f32 %v1347_v56 }
 0x5c9   : > { %3696 = vrcp.f32 %v1344_v54 }
 0x5ca   : > { %v3689_v58 = vpop.eup %3688  ;;  %3698 = vrcp.f32 %v1350_v12 }
 0x5cb   : > { %v1172_v60 = vmul.f32 %v3689_v58, %v4169_v25  ;;  %v1362_v7 = vpop.permute.xlu1 %1361 }
 0x5cc   : > { %v1371_v22 = vand.u32 %v1362_v7, %v4222_v4 }
 0x5cd   : > { %v1542_v57 = vpop.xlane.xlu0 %1541 }
 0x5cf   : > { %v1552_v19 = vpop.permute.xlu1 %1551 }
 0x5d0   : > { %v3691_v9 = vpop.eup %3690 }
 0x5d1   : > { %v1536_v59 = vpop.xlane.xlu0 %1535  ;;  %v1173_v61 = vmul.f32 %v3691_v9, %v3679_v39  ;;  %v3693_v1 = vpop.eup %3692 }
 0x5d2   : > { %v3695_v2 = vpop.eup %3694  ;;  %v1174_v14 = vmul.f32 %v3693_v1, %v4167_v24 }
 0x5d3   : > { %v1175_v63 = vpack.c.bf16 %v1173_v61, %v1172_v60  ;;  %v3697_v11 = vpop.eup %3696  ;;  %v1355_v15 = vmul.f32 %v3695_v2, %v4183_v41  ;;  %v1554_v26 = vpop.permute.xlu1 %1553 }
 0x5d4   : > { %v1354_v16 = vmul.f32 %v3697_v11, %v4177_v32  ;;  %v1176_v17 = vpack.c.bf16 %v1174_v14, %v1174_v14  ;;  %v3699_v18 = vpop.eup %3698  ;;  %v1563_v32 = vand.u32 %v1554_v26, %v4222_v4 }
 0x5d5   : > { %3442 = vmatprep.mubr.msk.bf16.mxu1 %vm1140_vm9, %v1175_v63  ;;  %v1539_v0 = vpop.xlane.xlu0 %1538  ;;  %v1356_v24 = vmul.f32 %v3699_v18, %v4173_v28  ;;  %v1822_v18 = vld [vmem:[#allocation3 + $0x11] sm:$0xff] }
 0x5d6   : > { %3700 = vrcp.f32 %v1539_v0  ;;  %v1357_v20 = vpack.c.bf16 %v1355_v15, %v1354_v16 }
 0x5d7   : > { %3702 = vrcp.f32 %v1536_v59  ;;  %v1358_v29 = vpack.c.bf16 %v1356_v24, %v1356_v24  ;;  %v1642_v33 = vpop.permute.xlu1 %1641 }
 0x5d8   : > { %3704 = vrcp.f32 %v1542_v57  ;;  %v1652_v36 = vsel %vm1076_vm7, %v1642_v33, 0 }
 0x5d9   : > { %v1180_v8 = vpop.permute.xlu0 %1179 }
 0x5da   : > { %v1192_v13 = vand.u32 %v4222_v4, %v1180_v8 }
 0x5db   : > { %v1644_v37 = vpop.permute.xlu1 %1643 }
 0x5dc   : > { %3440 = vmatprep.subr.bf16.mxu1 %v1192_v13  ;;  %v1655_v38 = vsel %vm1076_vm7, %v1644_v37, 0 }
 0x5dd   : > { %3441 = vmatpush3.bf16.msra.mxu1 %v1192_v13  ;;  %v1638_v35 = vpop.permute.xlu0 %1637 }
 0x5de   : > { %3454 = vmatprep.subr.bf16.mxu1 %v1360_v62 }
 0x5df   : > { %v1640_v39 = vpop.permute.xlu1 %1639 }
 0x5e0   : > { %v3701_v21 = vpop.eup %3700  ;;  %3443 = vmatmul.mubr.msk.bf16.vlgmr.msra.gmra.mrb[16].mxu1 %vm1140_vm9, %v1176_v17  ;;  %v1823_v17 = vld [vmem:[#allocation3 + $0x19] sm:$0xff] }
 0x5e1   : > { %3455 = vmatpush3.bf16.msra.mxu1 %v1360_v62  ;;  %3458 = vmatprep.mubr.msk.bf16.mxu1 %vm1140_vm9, %v1357_v20  ;;  %v3703_v23 = vpop.eup %3702  ;;  %v1547_v25 = vmul.f32 %v3701_v21, %v4196_v49  ;;  %v1824_v20 = vld [vmem:[#allocation3 + $0x21] sm:$0x1] }
 0x5e2   : > { %3456 = vmatprep.subr.bf16.mxu1 %v1371_v22  ;;  %v1546_v27 = vmul.f32 %v3703_v23, %v4192_v47  ;;  %v3705_v30 = vpop.eup %3704  ;;  %v4274_v21 = vpack.c.bf16 %v1824_v20, %v1824_v20 }
 0x5e3   : > { %v1548_v28 = vmul.f32 %v3705_v30, %v4188_v45 }
 0x5e4   : > { %v1549_v31 = vpack.c.bf16 %v1547_v25, %v1546_v27 }
 0x5e5   : > { %3457 = vmatpush3.bf16.msra.mxu1 %v1371_v22  ;;  %v1550_v34 = vpack.c.bf16 %v1548_v28, %v1548_v28 }
 0x5e6   : > { %3470 = vmatprep.subr.bf16.mxu1 %v1552_v19 }
 0x5e8   : > { %3459 = vmatmul.mubr.msk.bf16.vlgmr.msra.gmra.mrb[20].mxu1 %vm1140_vm9, %v1358_v29 }
 0x5e9   : > { %3471 = vmatpush3.bf16.msra.mxu1 %v1552_v19  ;;  %3474 = vmatprep.mubr.msk.bf16.mxu1 %vm1140_vm9, %v1549_v31  ;;  %v4268_v19 = vpack.c.bf16 %v1823_v17, %v1822_v18 }
 0x5ea   : > { %3472 = vmatprep.subr.bf16.mxu1 %v1563_v32 }
 0x5ed   : > { %3473 = vmatpush3.bf16.msra.mxu1 %v1563_v32 }
 0x5ee   : > { %3624 = vmatprep.subr.msk.bf16.mxu1 %vm1076_vm7, %v1642_v33 }
 0x5f0   : > { %3475 = vmatmul.mubr.msk.bf16.vlgmr.msra.gmra.mrb[24].mxu1 %vm1140_vm9, %v1550_v34 }
 0x5f1   : > { %3482 = vmatprep.mubr.msk.bf16.mxu1 %vm1076_vm7, %v1638_v35 }
 0x5f6   : > { %3479 = vmatpush3.bf16.xpose.msra.mxu1 %v1652_v36 }
 0x5f7   : > { %3625 = vmatprep.subr.msk.bf16.mxu1 %vm1076_vm7, %v1644_v37 }
 0x5fe   : > { %3481 = vmatpush3.bf16.xpose.msra.mxu1 %v1655_v38 }
 0x605   : > { %3483 = vmatmul.mubr.msk.bf16.vlgmr.msra.gmra.mrb[28].mxu1 %vm1076_vm7, %v1640_v39 }
 0x6b3   : > { %v3444_v40 = vpop.f32.mrb[16].mxu1 }
 0x6b4   : > { %1245 = vst.msk [vmem:[#allocation4 + $0x10] sm:$0x1] %vm1244_vm12, %v3444_v40  ;;  %v1228_v41 = vpop.f32.mrb[17].mxu1 }
 0x6b5   : > { %1242 = vst.msk [vmem:[#allocation4] sm:$0xff] %vm1076_vm7, %v1228_v41  ;;  %v3445_v42 = vpop.f32.mrb[18].mxu1 }
 0x6b6   : > { %v1231_v43 = vpop.f32.mrb[19].mxu1 }
 0x6b7   : > { %1243 = vst.msk [vmem:[#allocation4 + $0x8] sm:$0xff] %vm1076_vm7, %v1231_v43 }
 0x6bb   : > { %v4248_v44 = vpop.f32.mrb[20].mxu1 }
 0x6bc   : > { %v4250_v45 = vpop.f32.mrb[21].mxu1 }
 0x6bd   : > { %v3461_v46 = vpop.f32.mrb[22].mxu1 }
 0x6be   : > { %v4252_v47 = vpop.f32.mrb[23].mxu1 }
 0x6c3   : > { %v4254_v48 = vpop.f32.mrb[24].mxu1 }
 0x6c4   : > { %v4256_v49 = vpop.f32.mrb[25].mxu1 }
 0x6c5   : > { %v3477_v50 = vpop.f32.mrb[26].mxu1 }
 0x6c6   : > { %v4258_v51 = vpop.f32.mrb[27].mxu1 }
 0x6d8   : > { %v3484_v10 = vpop.f32.mrb[28].mxu1 }
 0x6d9   : > { %v1691_v12 = vpop.f32.mrb[29].mxu1  ;;  %v1707_v56 = vmul.f32 0.35355338, %v3484_v10 }
 0x6da   : > { %v1705_v53 = vmul.f32 0.35355338, %v1691_v12  ;;  %v3485_v54 = vpop.f32.mrb[30].mxu1 }
 0x6db   : > { %v1694_v55 = vpop.f32.mrb[31].mxu1  ;;  %v1714_v59 = vsel %vm1147_vm10, %v1707_v56, -inf }
 0x6dc   : > { %v1706_v57 = vmul.f32 0.35355338, %v1694_v55  ;;  %v1708_v58 = vsel %vm1140_vm9, %v1705_v53, -inf }
 0x6dd   : > { %1709 = vmax.xlane.f32.xlu0 %v1708_v58 }
 0x6de   : > { %v1711_v9 = vsel %vm1140_vm9, %v1706_v57, -inf }
 0x6df   : > { %1712 = vmax.xlane.f32.xlu1 %v1711_v9 }
 0x6e1   : > { %1715 = vmax.xlane.f32.xlu0 %v1714_v59 }
 0x76a   : > { %v1710_v60 = vpop.xlane.xlu0 %1709 }
 0x76b   : > { %v1717_v61 = vsub.f32 %v1705_v53, %v1710_v60 }
 0x76c   : > { %v1713_v62 = vpop.xlane.xlu1 %1712 }
 0x76d   : > { %v1720_v63 = vmul.f32 1.442695, %v1717_v61  ;;  %v1718_v0 = vsub.f32 %v1706_v57, %v1713_v62 }
 0x76e   : > { %v1716_v1 = vpop.xlane.xlu0 %1715 }
 0x76f   : > { %3706 = vpow2.f32 %v1720_v63  ;;  %v1722_v2 = vmul.f32 1.442695, %v1718_v0  ;;  %v1719_v3 = vsub.f32 %v1707_v56, %v1716_v1 }
 0x771   : > { %3708 = vpow2.f32 %v1722_v2  ;;  %v1724_v7 = vmul.f32 1.442695, %v1719_v3 }
 0x773   : > { %3710 = vpow2.f32 %v1724_v7 }
 0x779   : > { %v3707_v8 = vpop.eup %3706 }
 0x77a   : > { %v1726_v11 = vsel %vm1140_vm9, %v3707_v8, 0.0 }
 0x77b   : > { %v3709_v13 = vpop.eup %3708  ;;  %1727 = vadd.xlane.f32.xlu0 %v1726_v11 }
 0x77c   : > { %v1729_v16 = vsel %vm1140_vm9, %v3709_v13, 0.0 }
 0x77d   : > { %v3711_v14 = vpop.eup %3710 }
 0x77e   : > { %v1732_v15 = vsel %vm1147_vm10, %v3711_v14, 0.0 }
 0x77f   : > { %1733 = vadd.xlane.f32.xlu1 %v1732_v15  ;;  %1730 = vadd.xlane.f32.xlu0 %v1729_v16 }
 0x790   : > { %1745 = vrot.lane.b32.xlu1 %v4210_v52, %s3822_s6 }
 0x794   : > { %1829 = vrot.lane.b32.xlu1 %v4268_v19, %s3811_s26 }
 0x795   : > { %1743 = vrot.lane.b32.xlu0 %v4107_v6, %s3822_s6 }
 0x798   : > { %1831 = vrot.lane.b32.xlu1 %v4274_v21, %s3811_s26  ;;  %s3824_s26 = smov 16  }
 0x808   : > { %v1728_v22 = vpop.xlane.xlu0 %1727 }
 0x809   : > { %3712 = vrcp.f32 %v1728_v22 }
 0x80c   : > { %v1731_v23 = vpop.xlane.xlu0 %1730  ;;  %v1734_v24 = vpop.xlane.xlu1 %1733 }
 0x80d   : > { %3714 = vrcp.f32 %v1731_v23 }
 0x80e   : > { %3716 = vrcp.f32 %v1734_v24 }
 0x810   : > { %v1744_v52 = vpop.permute.xlu0 %1743  ;;  %v1746_v25 = vpop.permute.xlu1 %1745 }
 0x811   : > { %v1755_v26 = vand.u32 %v1746_v25, %v4222_v4  ;;  %3486 = vmatprep.subr.bf16.mxu0 %v1744_v52 }
 0x812   : > { %3487 = vmatpush3.bf16.msra.mxu0 %v1744_v52 }
 0x813   : > { %3488 = vmatprep.subr.bf16.mxu0 %v1755_v26  ;;  %v3713_v27 = vpop.eup %3712 }
 0x814   : > { %v1830_v6 = vpop.permute.xlu1 %1829  ;;  %v1738_v31 = vmul.f32 %v3713_v27, %v3707_v8 }
 0x815   : > { %v1840_v35 = vsel %vm1076_vm7, %v1830_v6, 0 }
 0x816   : > { %3489 = vmatpush3.bf16.msra.mxu0 %v1755_v26 }
 0x817   : > { %v3715_v29 = vpop.eup %3714  ;;  %3626 = vmatprep.subr.msk.bf16.mxu0 %vm1076_vm7, %v1830_v6 }
 0x818   : > { %v3717_v30 = vpop.eup %3716  ;;  %v1739_v32 = vmul.f32 %v3715_v29, %v3709_v13  ;;  %v1832_v36 = vpop.permute.xlu1 %1831  ;;  %v1998_v13 = vld [vmem:[#allocation3 + $0x21] sm:$0x1] }
 0x819   : > { %v1740_v28 = vmul.f32 %v3717_v30, %v3711_v14  ;;  %v1843_v37 = vsel %vm1076_vm7, %v1832_v36, 0  ;;  %v4307_v14 = vpack.c.bf16 %v1998_v13, %v1998_v13 }
 0x81a   : > { %v1741_v33 = vpack.c.bf16 %v1739_v32, %v1738_v31 }
 0x81b   : > { %v1742_v34 = vpack.c.bf16 %v1740_v28, %v1740_v28 }
 0x81c   : > { %3490 = vmatprep.mubr.msk.bf16.mxu0 %vm1140_vm9, %v1741_v33 }
 0x81d   : > { %3491 = vmatmul.mubr.msk.bf16.vlgmr.msra.gmra.mrb[8].mxu0 %vm1140_vm9, %v1742_v34 }
 0x81e   : > { %3498 = vmatprep.mubr.msk.bf16.mxu0 %vm1076_vm7, %v4268_v19 }
 0x81f   : > { %3495 = vmatpush3.bf16.xpose.msra.mxu0 %v1840_v35 }
 0x820   : > { %3627 = vmatprep.subr.msk.bf16.mxu0 %vm1076_vm7, %v1832_v36 }
 0x827   : > { %3497 = vmatpush3.bf16.xpose.msra.mxu0 %v1843_v37 }
 0x82e   : > { %3499 = vmatmul.mubr.msk.bf16.vlgmr.msra.gmra.mrb[12].mxu0 %vm1076_vm7, %v4274_v21 }
 0x8f0   : > { %v4289_v38 = vpop.f32.mrb[8].mxu0 }
 0x8f1   : > { %v4291_v39 = vpop.f32.mrb[9].mxu0 }
 0x8f2   : > { %v3493_v40 = vpop.f32.mrb[10].mxu0 }
 0x8f3   : > { %v4293_v41 = vpop.f32.mrb[11].mxu0 }
 0x901   : > { %v3500_v42 = vpop.f32.mrb[12].mxu0 }
 0x902   : > { %v1879_v43 = vpop.f32.mrb[13].mxu0  ;;  %v1895_v12 = vmul.f32 0.35355338, %v3500_v42 }
 0x903   : > { %v1893_v46 = vmul.f32 0.35355338, %v1879_v43  ;;  %v3501_v50 = vpop.f32.mrb[14].mxu0 }
 0x904   : > { %v1882_v10 = vpop.f32.mrb[15].mxu0  ;;  %v1902_v56 = vsel %vm1147_vm10, %v1895_v12, -inf }
 0x905   : > { %v1894_v53 = vmul.f32 0.35355338, %v1882_v10  ;;  %v1896_v54 = vsel %vm1140_vm9, %v1893_v46, -inf }
 0x906   : > { %1897 = vmax.xlane.f32.xlu0 %v1896_v54 }
 0x907   : > { %v1899_v55 = vsel %vm1140_vm9, %v1894_v53, -inf }
 0x908   : > { %1900 = vmax.xlane.f32.xlu1 %v1899_v55 }
 0x90a   : > { %1903 = vmax.xlane.f32.xlu0 %v1902_v56 }
 0x993   : > { %v1898_v57 = vpop.xlane.xlu0 %1897 }
 0x994   : > { %v1905_v58 = vsub.f32 %v1893_v46, %v1898_v57 }
 0x995   : > { %v1901_v9 = vpop.xlane.xlu1 %1900 }
 0x996   : > { %v1908_v59 = vmul.f32 1.442695, %v1905_v58  ;;  %v1906_v60 = vsub.f32 %v1894_v53, %v1901_v9 }
 0x997   : > { %v1904_v61 = vpop.xlane.xlu0 %1903 }
 0x998   : > { %3718 = vpow2.f32 %v1908_v59  ;;  %v1910_v62 = vmul.f32 1.442695, %v1906_v60  ;;  %v1907_v63 = vsub.f32 %v1895_v12, %v1904_v61 }
 0x99a   : > { %3720 = vpow2.f32 %v1910_v62  ;;  %v1912_v0 = vmul.f32 1.442695, %v1907_v63 }
 0x99c   : > { %3722 = vpow2.f32 %v1912_v0 }
 0x9a2   : > { %v3719_v1 = vpop.eup %3718 }
 0x9a3   : > { %v1914_v2 = vsel %vm1140_vm9, %v3719_v1, 0.0 }
 0x9a4   : > { %v3721_v3 = vpop.eup %3720  ;;  %1915 = vadd.xlane.f32.xlu0 %v1914_v2 }
 0x9a5   : > { %v1917_v11 = vsel %vm1140_vm9, %v3721_v3, 0.0 }
 0x9a6   : > { %v3723_v7 = vpop.eup %3722 }
 0x9a7   : > { %v1920_v8 = vsel %vm1147_vm10, %v3723_v7, 0.0 }
 0x9a8   : > { %1921 = vadd.xlane.f32.xlu1 %v1920_v8  ;;  %1918 = vadd.xlane.f32.xlu0 %v1917_v11  ;;  %v2188_v11 = vld [vmem:[#allocation3 + $0x21] sm:$0x1] }
 0x9a9   : > { %v4339_v13 = vpack.c.bf16 %v2188_v11, %v2188_v11 }
 0x9b9   : > { %1933 = vrot.lane.b32.xlu1 %v4274_v21, %s3816_s17 }
 0x9bd   : > { %2007 = vrot.lane.b32.xlu1 %v4268_v19, %s3812_s9 }
 0x9be   : > { %1931 = vrot.lane.b32.xlu0 %v4268_v19, %s3816_s17  ;;  %s4692_s17 = scalar_lea.vmem %s4653_s10, %s3934_s20 }
 0x9c1   : > { %2009 = vrot.lane.b32.xlu1 %v4307_v14, %s3812_s9  ;;  %s3825_s9 = smov 24  }
 0x9c2   : > { %2003 = vrot.lane.b32.xlu0 %v4268_v19, %s3813_s21 }
 0x9c5   : > { %2005 = vrot.lane.b32.xlu1 %v4307_v14, %s3813_s21  ;;  %s4691_s21 = sld [smem:[#allocation6_spill]] }
 0xa31   : > { %v1916_v15 = vpop.xlane.xlu0 %1915 }
 0xa32   : > { %3724 = vrcp.f32 %v1916_v15 }
 0xa35   : > { %v1919_v16 = vpop.xlane.xlu0 %1918  ;;  %v1922_v17 = vpop.xlane.xlu1 %1921 }
 0xa36   : > { %3726 = vrcp.f32 %v1919_v16 }
 0xa37   : > { %3728 = vrcp.f32 %v1922_v17 }
 0xa39   : > { %v1932_v18 = vpop.permute.xlu0 %1931  ;;  %v1934_v20 = vpop.permute.xlu1 %1933 }
 0xa3a   : > { %v1943_v21 = vand.u32 %v1934_v20, %v4222_v4  ;;  %3502 = vmatprep.subr.bf16.mxu1 %v1932_v18 }
 0xa3b   : > { %3503 = vmatpush3.bf16.msra.mxu1 %v1932_v18 }
 0xa3c   : > { %3504 = vmatprep.subr.bf16.mxu1 %v1943_v21  ;;  %v3725_v22 = vpop.eup %3724 }
 0xa3d   : > { %v2008_v23 = vpop.permute.xlu1 %2007  ;;  %v1926_v25 = vmul.f32 %v3725_v22, %v3719_v1  ;;  %v2004_v30 = vpop.permute.xlu0 %2003 }
 0xa3e   : > { %v2018_v31 = vsel %vm1076_vm7, %v2008_v23, 0 }
 0xa3f   : > { %3505 = vmatpush3.bf16.msra.mxu1 %v1943_v21 }
 0xa40   : > { %v3727_v24 = vpop.eup %3726  ;;  %3628 = vmatprep.subr.msk.bf16.mxu1 %vm1076_vm7, %v2008_v23 }
 0xa41   : > { %v3729_v52 = vpop.eup %3728  ;;  %v1927_v26 = vmul.f32 %v3727_v24, %v3721_v3  ;;  %v2010_v32 = vpop.permute.xlu1 %2009 }
 0xa42   : > { %v1928_v27 = vmul.f32 %v3729_v52, %v3723_v7  ;;  %v2021_v28 = vsel %vm1076_vm7, %v2010_v32, 0 }
 0xa43   : > { %v1929_v6 = vpack.c.bf16 %v1927_v26, %v1926_v25 }
 0xa44   : > { %v1930_v29 = vpack.c.bf16 %v1928_v27, %v1928_v27 }
 0xa45   : > { %3506 = vmatprep.mubr.msk.bf16.mxu1 %vm1140_vm9, %v1929_v6  ;;  %v2006_v33 = vpop.permute.xlu1 %2005 }
 0xa46   : > { %3507 = vmatmul.mubr.msk.bf16.vlgmr.msra.gmra.mrb[32].mxu1 %vm1140_vm9, %v1930_v29 }
 0xa47   : > { %3514 = vmatprep.mubr.msk.bf16.mxu1 %vm1076_vm7, %v2004_v30 }
 0xa48   : > { %3511 = vmatpush3.bf16.xpose.msra.mxu1 %v2018_v31 }
 0xa49   : > { %3629 = vmatprep.subr.msk.bf16.mxu1 %vm1076_vm7, %v2010_v32 }
 0xa50   : > { %3513 = vmatpush3.bf16.xpose.msra.mxu1 %v2021_v28 }
 0xa57   : > { %3515 = vmatmul.mubr.msk.bf16.vlgmr.msra.gmra.mrb[36].mxu1 %vm1076_vm7, %v2006_v33 }
 0xb19   : > { %v3508_v34 = vpop.f32.mrb[32].mxu1 }
 0xb1a   : > { %1995 = vst.msk [vmem:[#allocation4 + $0x21] sm:$0x1] %vm1244_vm12, %v3508_v34  ;;  %v1979_v35 = vpop.f32.mrb[33].mxu1 }
 0xb1b   : > { %1993 = vst.msk [vmem:[#allocation4 + $0x11] sm:$0xff] %vm1076_vm7, %v1979_v35  ;;  %v3509_v36 = vpop.f32.mrb[34].mxu1 }
 0xb1c   : > { %v1982_v37 = vpop.f32.mrb[35].mxu1 }
 0xb1d   : > { %1994 = vst.msk [vmem:[#allocation4 + $0x19] sm:$0xff] %vm1076_vm7, %v1982_v37 }
 0xb2a   : > { %v3516_v40 = vpop.f32.mrb[36].mxu1 }
 0xb2b   : > { %v2057_v42 = vpop.f32.mrb[37].mxu1  ;;  %v2073_v10 = vmul.f32 0.35355338, %v3516_v40 }
 0xb2c   : > { %v2071_v43 = vmul.f32 0.35355338, %v2057_v42  ;;  %v3517_v46 = vpop.f32.mrb[38].mxu1 }
 0xb2d   : > { %v2060_v50 = vpop.f32.mrb[39].mxu1  ;;  %v2080_v55 = vsel %vm1147_vm10, %v2073_v10, -inf }
 0xb2e   : > { %v2072_v12 = vmul.f32 0.35355338, %v2060_v50  ;;  %v2074_v53 = vsel %vm1140_vm9, %v2071_v43, -inf }
 0xb2f   : > { %2075 = vmax.xlane.f32.xlu0 %v2074_v53 }
 0xb30   : > { %v2077_v54 = vsel %vm1140_vm9, %v2072_v12, -inf }
 0xb31   : > { %2078 = vmax.xlane.f32.xlu1 %v2077_v54 }
 0xb33   : > { %2081 = vmax.xlane.f32.xlu0 %v2080_v55 }
 0xbbc   : > { %v2076_v56 = vpop.xlane.xlu0 %2075 }
 0xbbd   : > { %v2083_v57 = vsub.f32 %v2071_v43, %v2076_v56 }
 0xbbe   : > { %v2079_v58 = vpop.xlane.xlu1 %2078 }
 0xbbf   : > { %v2086_v9 = vmul.f32 1.442695, %v2083_v57  ;;  %v2084_v59 = vsub.f32 %v2072_v12, %v2079_v58 }
 0xbc0   : > { %v2082_v60 = vpop.xlane.xlu0 %2081 }
 0xbc1   : > { %3730 = vpow2.f32 %v2086_v9  ;;  %v2088_v61 = vmul.f32 1.442695, %v2084_v59  ;;  %v2085_v62 = vsub.f32 %v2073_v10, %v2082_v60 }
 0xbc3   : > { %3732 = vpow2.f32 %v2088_v61  ;;  %v2090_v63 = vmul.f32 1.442695, %v2085_v62 }
 0xbc5   : > { %3734 = vpow2.f32 %v2090_v63 }
 0xbcb   : > { %v3731_v0 = vpop.eup %3730 }
 0xbcc   : > { %v2092_v1 = vsel %vm1140_vm9, %v3731_v0, 0.0 }
 0xbcd   : > { %v3733_v2 = vpop.eup %3732  ;;  %2093 = vadd.xlane.f32.xlu0 %v2092_v1 }
 0xbce   : > { %v2095_v8 = vsel %vm1140_vm9, %v3733_v2, 0.0 }
 0xbcf   : > { %v3735_v3 = vpop.eup %3734 }
 0xbd0   : > { %v2098_v7 = vsel %vm1147_vm10, %v3735_v3, 0.0 }
 0xbd1   : > { %2099 = vadd.xlane.f32.xlu1 %v2098_v7  ;;  %2096 = vadd.xlane.f32.xlu0 %v2095_v8  ;;  %v2378_v8 = vld [vmem:[#allocation3 + $0x21] sm:$0x1] }
 0xbd2   : > { %v4374_v11 = vpack.c.bf16 %v2378_v8, %v2378_v8 }
 0xbe2   : > { %2111 = vrot.lane.b32.xlu1 %v4307_v14, %s3817_s18 }
 0xbe6   : > { %2197 = vrot.lane.b32.xlu1 %v4268_v19, %s3815_s0 }
 0xbe7   : > { %2109 = vrot.lane.b32.xlu0 %v4268_v19, %s3817_s18 }
 0xbea   : > { %2199 = vrot.lane.b32.xlu1 %v4339_v13, %s3815_s0 }
 0xbeb   : > { %2193 = vrot.lane.b32.xlu0 %v4268_v19, %s3814_s28 }
 0xbee   : > { %2195 = vrot.lane.b32.xlu1 %v4339_v13, %s3814_s28  ;;  %s4696_s28 = sld [smem:[#allocation14_spill]] }
 0xc5a   : > { %v2094_v15 = vpop.xlane.xlu0 %2093 }
 0xc5b   : > { %3736 = vrcp.f32 %v2094_v15 }
 0xc5e   : > { %v2097_v14 = vpop.xlane.xlu0 %2096  ;;  %v2100_v16 = vpop.xlane.xlu1 %2099 }
 0xc5f   : > { %3738 = vrcp.f32 %v2097_v14 }
 0xc60   : > { %3740 = vrcp.f32 %v2100_v16 }
 0xc62   : > { %v2110_v17 = vpop.permute.xlu0 %2109  ;;  %v2112_v18 = vpop.permute.xlu1 %2111 }
 0xc63   : > { %v2121_v20 = vand.u32 %v2112_v18, %v4222_v4  ;;  %3518 = vmatprep.subr.bf16.mxu0 %v2110_v17 }
 0xc64   : > { %3519 = vmatpush3.bf16.msra.mxu0 %v2110_v17 }
 0xc65   : > { %3520 = vmatprep.subr.bf16.mxu0 %v2121_v20  ;;  %v3737_v21 = vpop.eup %3736 }
 0xc66   : > { %v2198_v22 = vpop.permute.xlu1 %2197  ;;  %v2104_v52 = vmul.f32 %v3737_v21, %v3731_v0  ;;  %v2194_v29 = vpop.permute.xlu0 %2193 }
 0xc67   : > { %v2208_v30 = vsel %vm1076_vm7, %v2198_v22, 0 }
 0xc68   : > { %3521 = vmatpush3.bf16.msra.mxu0 %v2121_v20 }
 0xc69   : > { %v3739_v23 = vpop.eup %3738  ;;  %3630 = vmatprep.subr.msk.bf16.mxu0 %vm1076_vm7, %v2198_v22 }
 0xc6a   : > { %v3741_v24 = vpop.eup %3740  ;;  %v2105_v25 = vmul.f32 %v3739_v23, %v3733_v2  ;;  %v2200_v31 = vpop.permute.xlu1 %2199 }
 0xc6b   : > { %v2106_v26 = vmul.f32 %v3741_v24, %v3735_v3  ;;  %v2211_v32 = vsel %vm1076_vm7, %v2200_v31, 0 }
 0xc6c   : > { %v2107_v27 = vpack.c.bf16 %v2105_v25, %v2104_v52 }
 0xc6d   : > { %v2108_v6 = vpack.c.bf16 %v2106_v26, %v2106_v26 }
 0xc6e   : > { %3522 = vmatprep.mubr.msk.bf16.mxu0 %vm1140_vm9, %v2107_v27  ;;  %v2196_v28 = vpop.permute.xlu1 %2195 }
 0xc6f   : > { %3523 = vmatmul.mubr.msk.bf16.vlgmr.msra.gmra.mrb[16].mxu0 %vm1140_vm9, %v2108_v6 }
 0xc70   : > { %3530 = vmatprep.mubr.msk.bf16.mxu0 %vm1076_vm7, %v2194_v29 }
 0xc71   : > { %3527 = vmatpush3.bf16.xpose.msra.mxu0 %v2208_v30 }
 0xc72   : > { %3631 = vmatprep.subr.msk.bf16.mxu0 %vm1076_vm7, %v2200_v31 }
 0xc79   : > { %3529 = vmatpush3.bf16.xpose.msra.mxu0 %v2211_v32 }
 0xc80   : > { %3531 = vmatmul.mubr.msk.bf16.vlgmr.msra.gmra.mrb[20].mxu0 %vm1076_vm7, %v2196_v28 }
 0xd42   : > { %v4356_v33 = vpop.f32.mrb[16].mxu0 }
 0xd43   : > { %v4358_v34 = vpop.f32.mrb[17].mxu0 }
 0xd44   : > { %v3525_v35 = vpop.f32.mrb[18].mxu0 }
 0xd45   : > { %v4360_v36 = vpop.f32.mrb[19].mxu0 }
 0xd53   : > { %v3532_v37 = vpop.f32.mrb[20].mxu0 }
 0xd54   : > { %v2247_v40 = vpop.f32.mrb[21].mxu0  ;;  %v2263_v50 = vmul.f32 0.35355338, %v3532_v37 }
 0xd55   : > { %v2261_v42 = vmul.f32 0.35355338, %v2247_v40  ;;  %v3533_v43 = vpop.f32.mrb[22].mxu0 }
 0xd56   : > { %v2250_v46 = vpop.f32.mrb[23].mxu0  ;;  %v2270_v54 = vsel %vm1147_vm10, %v2263_v50, -inf }
 0xd57   : > { %v2262_v10 = vmul.f32 0.35355338, %v2250_v46  ;;  %v2264_v12 = vsel %vm1140_vm9, %v2261_v42, -inf }
 0xd58   : > { %2265 = vmax.xlane.f32.xlu0 %v2264_v12 }
 0xd59   : > { %v2267_v53 = vsel %vm1140_vm9, %v2262_v10, -inf }
 0xd5a   : > { %2268 = vmax.xlane.f32.xlu1 %v2267_v53 }
 0xd5c   : > { %2271 = vmax.xlane.f32.xlu0 %v2270_v54 }
 0xde5   : > { %v2266_v55 = vpop.xlane.xlu0 %2265 }
 0xde6   : > { %v2273_v56 = vsub.f32 %v2261_v42, %v2266_v55 }
 0xde7   : > { %v2269_v57 = vpop.xlane.xlu1 %2268 }
 0xde8   : > { %v2276_v58 = vmul.f32 1.442695, %v2273_v56  ;;  %v2274_v9 = vsub.f32 %v2262_v10, %v2269_v57 }
 0xde9   : > { %v2272_v59 = vpop.xlane.xlu0 %2271 }
 0xdea   : > { %3742 = vpow2.f32 %v2276_v58  ;;  %v2278_v60 = vmul.f32 1.442695, %v2274_v9  ;;  %v2275_v61 = vsub.f32 %v2263_v50, %v2272_v59 }
 0xdec   : > { %3744 = vpow2.f32 %v2278_v60  ;;  %v2280_v62 = vmul.f32 1.442695, %v2275_v61 }
 0xdee   : > { %3746 = vpow2.f32 %v2280_v62 }
 0xdf4   : > { %v3743_v63 = vpop.eup %3742 }
 0xdf5   : > { %v2282_v0 = vsel %vm1140_vm9, %v3743_v63, 0.0 }
 0xdf6   : > { %v3745_v1 = vpop.eup %3744  ;;  %2283 = vadd.xlane.f32.xlu0 %v2282_v0 }
 0xdf7   : > { %v2285_v7 = vsel %vm1140_vm9, %v3745_v1, 0.0 }
 0xdf8   : > { %v3747_v2 = vpop.eup %3746 }
 0xdf9   : > { %v2288_v3 = vsel %vm1147_vm10, %v3747_v2, 0.0 }
 0xdfa   : > { %2289 = vadd.xlane.f32.xlu1 %v2288_v3  ;;  %2286 = vadd.xlane.f32.xlu0 %v2285_v7 }
 0xe0b   : > { %2301 = vrot.lane.b32.xlu1 %v4339_v13, %s3818_s22 }
 0xe0f   : > { %2387 = vrot.lane.b32.xlu1 %v4268_v19, %s3819_s24 }
 0xe10   : > { %2299 = vrot.lane.b32.xlu0 %v4268_v19, %s3818_s22  ;;  %s4693_s22 = scalar_lea.vmem %s4654_s11, %s3934_s20 }
 0xe13   : > { %2389 = vrot.lane.b32.xlu1 %v4374_v11, %s3819_s24 }
 0xe14   : > { %2383 = vrot.lane.b32.xlu0 %v4268_v19, %s3820_s23 }
 0xe17   : > { %2385 = vrot.lane.b32.xlu1 %v4374_v11, %s3820_s23 }
 0xe83   : > { %v2284_v15 = vpop.xlane.xlu0 %2283 }
 0xe84   : > { %3748 = vrcp.f32 %v2284_v15 }
 0xe87   : > { %v2287_v13 = vpop.xlane.xlu0 %2286  ;;  %v2290_v14 = vpop.xlane.xlu1 %2289 }
 0xe88   : > { %3750 = vrcp.f32 %v2287_v13 }
 0xe89   : > { %3752 = vrcp.f32 %v2290_v14 }
 0xe8b   : > { %v2300_v16 = vpop.permute.xlu0 %2299  ;;  %v2302_v17 = vpop.permute.xlu1 %2301 }
 0xe8c   : > { %v2311_v18 = vand.u32 %v2302_v17, %v4222_v4  ;;  %3534 = vmatprep.subr.bf16.mxu1 %v2300_v16 }
 0xe8d   : > { %3535 = vmatpush3.bf16.msra.mxu1 %v2300_v16 }
 0xe8e   : > { %3536 = vmatprep.subr.bf16.mxu1 %v2311_v18  ;;  %v3749_v20 = vpop.eup %3748 }
 0xe8f   : > { %v2388_v21 = vpop.permute.xlu1 %2387  ;;  %v2294_v24 = vmul.f32 %v3749_v20, %v3743_v63  ;;  %v2384_v6 = vpop.permute.xlu0 %2383 }
 0xe90   : > { %v2398_v29 = vsel %vm1076_vm7, %v2388_v21, 0 }
 0xe91   : > { %3537 = vmatpush3.bf16.msra.mxu1 %v2311_v18 }
 0xe92   : > { %v3751_v22 = vpop.eup %3750  ;;  %3632 = vmatprep.subr.msk.bf16.mxu1 %vm1076_vm7, %v2388_v21 }
 0xe93   : > { %v3753_v23 = vpop.eup %3752  ;;  %v2295_v52 = vmul.f32 %v3751_v22, %v3745_v1  ;;  %v2390_v30 = vpop.permute.xlu1 %2389  ;;  %v2573_v22 = vld [vmem:[%s4691_s21 + $0x10] sm:$0xff] }
 0xe94   : > { %v2296_v25 = vmul.f32 %v3753_v23, %v3747_v2  ;;  %v2401_v31 = vsel %vm1076_vm7, %v2390_v30, 0  ;;  %v2574_v23 = vld [vmem:[%s4691_s21 + $0x18] sm:$0xff] }
 0xe95   : > { %v2297_v26 = vpack.c.bf16 %v2295_v52, %v2294_v24 }
 0xe96   : > { %v2298_v27 = vpack.c.bf16 %v2296_v25, %v2296_v25  ;;  %v2579_v25 = vpack.c.bf16 %v2574_v23, %v2573_v22 }
 0xe97   : > { %3538 = vmatprep.mubr.msk.bf16.mxu1 %vm1140_vm9, %v2297_v26  ;;  %v2386_v32 = vpop.permute.xlu1 %2385 }
 0xe98   : > { %3539 = vmatmul.mubr.msk.bf16.vlgmr.msra.gmra.mrb[40].mxu1 %vm1140_vm9, %v2298_v27 }
 0xe99   : > { %3546 = vmatprep.mubr.msk.bf16.mxu1 %vm1076_vm7, %v2384_v6 }
 0xe9a   : > { %3543 = vmatpush3.bf16.xpose.msra.mxu1 %v2398_v29 }
 0xe9b   : > { %3633 = vmatprep.subr.msk.bf16.mxu1 %vm1076_vm7, %v2390_v30 }
 0xea2   : > { %3545 = vmatpush3.bf16.xpose.msra.mxu1 %v2401_v31 }
 0xea3   : > { %3574 = vmatprep.subr.bf16.mxu1 %v3809_v5 }
 0xea9   : > { %3547 = vmatmul.mubr.msk.bf16.vlgmr.msra.gmra.mrb[44].mxu1 %vm1076_vm7, %v2386_v32 }
 0xeaa   : > { %3578 = vmatprep.mubr.msk.bf16.mxu1 %vm3810_vm5, %v3809_v5 }
 0xf6b   : > { %v4394_v28 = vpop.f32.mrb[40].mxu1 }
 0xf6c   : > { %v2347_v35 = vpop.f32.mrb[41].mxu1 }
 0xf6d   : > { %v3541_v37 = vpop.f32.mrb[42].mxu1 }
 0xf6e   : > { %v2350_v40 = vpop.f32.mrb[43].mxu1 }
 0xf7c   : > { %v3548_v42 = vpop.f32.mrb[44].mxu1 }
 0xf7d   : > { %v2437_v43 = vpop.f32.mrb[45].mxu1  ;;  %v2453_v12 = vmul.f32 0.35355338, %v3548_v42 }
 0xf7e   : > { %v2451_v46 = vmul.f32 0.35355338, %v2437_v43  ;;  %v3549_v50 = vpop.f32.mrb[46].mxu1 }
 0xf7f   : > { %v2440_v10 = vpop.f32.mrb[47].mxu1  ;;  %v2460_v56 = vsel %vm1147_vm10, %v2453_v12, -inf }
 0xf80   : > { %v2452_v53 = vmul.f32 0.35355338, %v2440_v10  ;;  %v2454_v54 = vsel %vm1140_vm9, %v2451_v46, -inf }
 0xf81   : > { %2455 = vmax.xlane.f32.xlu0 %v2454_v54 }
 0xf82   : > { %v2457_v55 = vsel %vm1140_vm9, %v2452_v53, -inf }
 0xf83   : > { %2458 = vmax.xlane.f32.xlu1 %v2457_v55  ;;  %v3290_v55 = vld [vmem:[%s4692_s17] ss:$0 sm:$0xff] }
 0xf85   : > { %2461 = vmax.xlane.f32.xlu0 %v2460_v56 }
0x100e   : > { %v2456_v57 = vpop.xlane.xlu0 %2455 }
0x100f   : > { %v2463_v58 = vsub.f32 %v2451_v46, %v2456_v57  ;;  %v3796_v57 = vld [vmem:[#allocation2] sm:$0xff] }
0x1010   : > { %v2459_v9 = vpop.xlane.xlu1 %2458 }
0x1011   : > { %v2466_v59 = vmul.f32 1.442695, %v2463_v58  ;;  %v2464_v60 = vsub.f32 %v2452_v53, %v2459_v9 }
0x1012   : > { %v2462_v61 = vpop.xlane.xlu0 %2461 }
0x1013   : > { %3754 = vpow2.f32 %v2466_v59  ;;  %v2468_v62 = vmul.f32 1.442695, %v2464_v60  ;;  %v2465_v63 = vsub.f32 %v2453_v12, %v2462_v61 }
0x1015   : > { %3756 = vpow2.f32 %v2468_v62  ;;  %v2470_v0 = vmul.f32 1.442695, %v2465_v63 }
0x1017   : > { %3758 = vpow2.f32 %v2470_v0 }
0x101d   : > { %v3755_v1 = vpop.eup %3754 }
0x101e   : > { %v2472_v2 = vsel %vm1140_vm9, %v3755_v1, 0.0 }
0x101f   : > { %v3757_v3 = vpop.eup %3756  ;;  %2473 = vadd.xlane.f32.xlu0 %v2472_v2 }
0x1020   : > { %v2475_v15 = vsel %vm1140_vm9, %v3757_v3, 0.0 }
0x1021   : > { %v3759_v7 = vpop.eup %3758 }
0x1022   : > { %v2478_v8 = vsel %vm1147_vm10, %v3759_v7, 0.0 }
0x1023   : > { %2479 = vadd.xlane.f32.xlu1 %v2478_v8  ;;  %2476 = vadd.xlane.f32.xlu0 %v2475_v15 }
0x1034   : > { %2491 = vrot.lane.b32.xlu1 %v4374_v11, %s3822_s6 }
0x1038   : > { %1424 = vrot.lane.b32.xlu1 %v4250_v45, %s3823_s30 }
0x1039   : > { %2489 = vrot.lane.b32.xlu0 %v4268_v19, %s3822_s6  ;;  %s4694_s6 = scalar_lea.vmem %s4655_s12, %s3934_s20 }
0x103c   : > { %1426 = vrot.lane.b32.xlu1 %v4252_v47, %s3823_s30 }
0x103d   : > { %1616 = vrot.lane.b32.xlu0 %v4256_v49, %s3824_s26 }
0x1040   : > { %1618 = vrot.lane.b32.xlu1 %v4258_v51, %s3824_s26 }
0x1041   : > { %1808 = vrot.lane.b32.xlu0 %v4291_v39, %s3825_s9 }
0x1044   : > { %1810 = vrot.lane.b32.xlu1 %v4293_v41, %s3825_s9 }
0x1045   : > { %1428 = vrot.lane.b32.xlu0 %v4248_v44, %s3823_s30 }
0x1048   : > { %2174 = vrot.lane.b32.xlu1 %v4358_v34, %s3823_s30  ;;  %v2572_v34 = vld [vmem:[%s4691_s21 + $0x8] sm:$0xff] }
0x1049   : > { %2176 = vrot.lane.b32.xlu0 %v4360_v36, %s3823_s30 }
0x104c   : > { %1620 = vrot.lane.b32.xlu1 %v4254_v48, %s3824_s26 }
0x104d   : > { %2364 = vrot.lane.b32.xlu0 %v2347_v35, %s3824_s26 }
0x1050   : > { %2366 = vrot.lane.b32.xlu1 %v2350_v40, %s3824_s26 }
0x1051   : > { %1812 = vrot.lane.b32.xlu0 %v4289_v38, %s3825_s9 }
0x10ac   : > { %v2474_v45 = vpop.xlane.xlu0 %2473 }
0x10ad   : > { %3760 = vrcp.f32 %v2474_v45 }
0x10b0   : > { %v2477_v47 = vpop.xlane.xlu0 %2476  ;;  %v2480_v44 = vpop.xlane.xlu1 %2479 }
0x10b1   : > { %3762 = vrcp.f32 %v2477_v47 }
0x10b2   : > { %3764 = vrcp.f32 %v2480_v44 }
0x10b4   : > { %v2490_v49 = vpop.permute.xlu0 %2489  ;;  %v2492_v51 = vpop.permute.xlu1 %2491 }
0x10b5   : > { %v2501_v19 = vand.u32 %v2492_v51, %v4222_v4  ;;  %3550 = vmatprep.subr.bf16.mxu0 %v2490_v49  ;;  %v2571_v4 = vld [vmem:[%s4691_s21] sm:$0xff] }
0x10b6   : > { %3551 = vmatpush3.bf16.msra.mxu0 %v2490_v49  ;;  %v2578_v20 = vpack.c.bf16 %v2572_v34, %v2571_v4  ;;  %v3798_v4 = vld [vmem:[#allocation2 + $0x10] sm:$0xff] }
0x10b7   : > { %3552 = vmatprep.subr.bf16.mxu0 %v2501_v19  ;;  %v3761_v38 = vpop.eup %3760 }
0x10b8   : > { %v1617_v48 = vpop.permute.xlu0 %1616  ;;  %v1425_v39 = vpop.permute.xlu1 %1424  ;;  %v2484_v14 = vmul.f32 %v3761_v38, %v3755_v1 }
0x10b9   : > { %1434 = vst.msk [vmem:[#allocation4] sm:$0xff] %vm1433_vm13, %v1425_v39 }
0x10ba   : > { %3553 = vmatpush3.bf16.msra.mxu0 %v2501_v19  ;;  %1626 = vst.msk [vmem:[#allocation4] sm:$0xff] %vm1625_vm14, %v1617_v48 }
0x10bb   : > { %v3763_v41 = vpop.eup %3762  ;;  %3558 = vmatprep.subr.bf16.mxu0 %v3809_v5 }
0x10bc   : > { %v3765_v36 = vpop.eup %3764  ;;  %v1809_v11 = vpop.permute.xlu0 %1808  ;;  %v2485_v16 = vmul.f32 %v3763_v41, %v3757_v3 }
0x10bd   : > { %v1427_v13 = vpop.permute.xlu1 %1426  ;;  %v2486_v17 = vmul.f32 %v3765_v36, %v3759_v7  ;;  %1818 = vst.msk [vmem:[#allocation4] sm:$0xff] %vm1817_vm15, %v1809_v11 }
0x10be   : > { %1435 = vst.msk [vmem:[#allocation4 + $0x8] sm:$0xff] %vm1433_vm13, %v1427_v13  ;;  %v2487_v18 = vpack.c.bf16 %v2485_v16, %v2484_v14  ;;  %v3799_v14 = vld [vmem:[#allocation2 + $0x18] sm:$0xff] }
0x10bf   : > { %v2488_v21 = vpack.c.bf16 %v2486_v17, %v2486_v17 }
0x10c0   : > { %3554 = vmatprep.mubr.msk.bf16.mxu0 %vm1140_vm9, %v2487_v18  ;;  %v1429_v24 = vpop.permute.xlu0 %1428 }
0x10c1   : > { %v1619_v52 = vpop.permute.xlu1 %1618  ;;  %1437 = vst.msk [vmem:[#allocation4 + $0x10] sm:$0x1] %vm1436_vm0, %v1429_v24  ;;  %3555 = vmatmul.mubr.msk.bf16.vlgmr.msra.gmra.mrb[24].mxu0 %vm1140_vm9, %v2488_v21 }
0x10c2   : > { %1627 = vst.msk [vmem:[#allocation4 + $0x8] sm:$0xff] %vm1625_vm14, %v1619_v52  ;;  %3559 = vmatpush3.bf16.msra.mxu0 %v2578_v20  ;;  %3562 = vmatprep.mubr.msk.bf16.mxu0 %vm3810_vm5, %v3809_v5  ;;  %v3800_v52 = vld [vmem:[#allocation2 + $0x20] sm:$0x3] }
0x10c3   : > { %3560 = vmatprep.subr.bf16.mxu0 %v3809_v5 }
0x10c4   : > { %v2177_v26 = vpop.permute.xlu0 %2176  ;;  %v2566_v32 = vld [vmem:[#allocation4] sm:$0xff] }
0x10c5   : > { %v1811_v27 = vpop.permute.xlu1 %1810  ;;  %2184 = vst.msk [vmem:[#allocation4 + $0x19] sm:$0xff] %vm1433_vm13, %v2177_v26 }
0x10c6   : > { %1819 = vst.msk [vmem:[#allocation4 + $0x8] sm:$0xff] %vm1817_vm15, %v1811_v27  ;;  %3561 = vmatpush3.bf16.msra.mxu0 %v2579_v25 }
0x10c7   : > { %3590 = vmatprep.subr.bf16.mxu0 %v3809_v5 }
0x10c8   : > { %v2365_v6 = vpop.permute.xlu0 %2364 }
0x10c9   : > { %v2175_v29 = vpop.permute.xlu1 %2174 }
0x10ca   : > { %2183 = vst.msk [vmem:[#allocation4 + $0x11] sm:$0xff] %vm1433_vm13, %v2175_v29 }
0x10cb   : > { %2373 = vst.msk [vmem:[#allocation4 + $0x11] sm:$0xff] %vm1625_vm14, %v2365_v6 }
0x10cc   : > { %v1813_v30 = vpop.permute.xlu0 %1812 }
0x10cd   : > { %v1621_v31 = vpop.permute.xlu1 %1620  ;;  %v2567_v35 = vld [vmem:[#allocation4 + $0x8] sm:$0xff] }
0x10ce   : > { %1629 = vst.msk [vmem:[#allocation4 + $0x10] sm:$0x1] %vm1628_vm1, %v1621_v31  ;;  %v2575_v37 = vpack.c.bf16 %v2567_v35, %v2566_v32  ;;  %v2747_v31 = vld [vmem:[%s3974_s7 + $0x8] sm:$0xff]  ;;  %v2748_v35 = vld [vmem:[%s3974_s7 + $0x10] sm:$0xff] }
0x10cf   : > { %1821 = vst.msk [vmem:[#allocation4 + $0x10] sm:$0x1] %vm1820_vm2, %v1813_v30  ;;  %v2746_v30 = vld [vmem:[%s3974_s7] sm:$0xff] }
0x10d0   : > { %3563 = vmatmul.mubr.msk.bf16.vlgmr.msra.gmra.mrb[28].mxu0 %vm887_vm3, %v2575_v37  ;;  %v2753_v32 = vpack.c.bf16 %v2747_v31, %v2746_v30  ;;  %v2749_v37 = vld [vmem:[%s3974_s7 + $0x18] sm:$0xff]  ;;  %v2886_v31 = vld [vmem:[%s3984_s2 + $0x70] sm:$0xff]  ;;  %s4697_s7 = sld [smem:[#allocation15_spill]] }
0x10d1   : > { %v2367_v40 = vpop.permute.xlu1 %2366  ;;  %3566 = vmatprep.mubr.msk.bf16.mxu0 %vm3810_vm5, %v3809_v5 }
0x10d2   : > { %2374 = vst.msk [vmem:[#allocation4 + $0x19] sm:$0xff] %vm1625_vm14, %v2367_v40  ;;  %3575 = vmatpush3.bf16.msra.mxu1 %v2753_v32  ;;  %v2754_v40 = vpack.c.bf16 %v2749_v37, %v2748_v35  ;;  %v2887_v32 = vld [vmem:[%s3984_s2 + $0x78] sm:$0xff] }
0x10d3   : > { %3576 = vmatprep.subr.bf16.mxu1 %v3809_v5  ;;  %v2898_v37 = vpack.c.bf16 %v2887_v32, %v2886_v31 }
0x10d6   : > { %3577 = vmatpush3.bf16.msra.mxu1 %v2754_v40 }
0x1194   : > { %v3556_v42 = vpop.f32.mrb[24].mxu0 }
0x1195   : > { %v2537_v43 = vpop.f32.mrb[25].mxu0 }
0x1196   : > { %2554 = vrot.lane.b32.xlu1 %v2537_v43, %s3825_s9  ;;  %v3557_v46 = vpop.f32.mrb[26].mxu0 }
0x1197   : > { %v2540_v50 = vpop.f32.mrb[27].mxu0 }
0x1198   : > { %2556 = vrot.lane.b32.xlu0 %v2540_v50, %s3825_s9 }
0x119a   : > { %2178 = vrot.lane.b32.xlu1 %v4356_v33, %s3823_s30 }
0x119c   : > { %2368 = vrot.lane.b32.xlu0 %v4394_v28, %s3824_s26  ;;  %v3797_v28 = vld [vmem:[#allocation2 + $0x8] sm:$0xff]  ;;  %s4695_s26 = scalar_lea.vmem %s4657_s14, %s3934_s20 }
0x119e   : > { %2558 = vrot.lane.b32.xlu1 %v3556_v42, %s3825_s9 }
0x11a3   : > { %v2630_v10 = vpop.f32.mrb[28].mxu0 }
0x11a4   : > { %v3564_v12 = vpop.f32.mrb[29].mxu0  ;;  %v2631_v56 = vadd.f32 %v3290_v55, %v2630_v10 }
0x11a5   : > { %v2633_v53 = vpop.f32.mrb[30].mxu0 }
0x11a6   : > { %v3565_v54 = vpop.f32.mrb[31].mxu0  ;;  %v4470_v58 = vadd.f32 %v3796_v57, %v2631_v56  ;;  %v2634_v9 = vadd.f32 %v3290_v55, %v2633_v53 }
0x11a8   : > { %v2659_v33 = vsel %vm887_vm3, %v4470_v58, 0.0  ;;  %v4474_v59 = vadd.f32 %v3797_v28, %v2634_v9 }
0x11aa   : > { %v2662_v60 = vsel %vm887_vm3, %v4474_v59, 0.0 }
0x11bb   : > { %2660 = vadd.xlane.f32.xlu0 %v2659_v33 }
0x11c2   : > { %2663 = vadd.xlane.f32.xlu1 %v2662_v60 }
0x1208   : > { %v2555_v61 = vpop.permute.xlu1 %2554 }
0x1209   : > { %2563 = vst.msk [vmem:[#allocation4 + $0x11] sm:$0xff] %vm1817_vm15, %v2555_v61 }
0x120a   : > { %v2557_v62 = vpop.permute.xlu0 %2556 }
0x120b   : > { %2564 = vst.msk [vmem:[#allocation4 + $0x19] sm:$0xff] %vm1817_vm15, %v2557_v62 }
0x120c   : > { %v2179_v63 = vpop.permute.xlu1 %2178 }
0x120d   : > { %2185 = vst.msk [vmem:[#allocation4 + $0x21] sm:$0x1] %vm1436_vm0, %v2179_v63 }
0x120e   : > { %v2369_v0 = vpop.permute.xlu0 %2368 }
0x120f   : > { %2375 = vst.msk [vmem:[#allocation4 + $0x21] sm:$0x1] %vm1628_vm1, %v2369_v0 }
0x1210   : > { %v2559_v1 = vpop.permute.xlu1 %2558  ;;  %v2568_v2 = vld [vmem:[#allocation4 + $0x10] sm:$0xff] }
0x1211   : > { %2565 = vst.msk [vmem:[#allocation4 + $0x21] sm:$0x1] %vm1820_vm2, %v2559_v1 }
0x1212   : > { %v2569_v3 = vld [vmem:[#allocation4 + $0x18] sm:$0xff] }
0x1213   : > { %v2576_v7 = vpack.c.bf16 %v2569_v3, %v2568_v2 }
0x1215   : > { %3567 = vmatmul.mubr.msk.bf16.gmra.mrb[32].mxu0 %vm887_vm3, %v2576_v7 }
0x1216   : > { %3570 = vmatprep.mubr.msk.bf16.mxu0 %vm3810_vm5, %v3809_v5 }
0x1218   : > { %v2570_v8 = vld [vmem:[#allocation4 + $0x20] sm:$0x3] }
0x1219   : > { %v2577_v15 = vpack.c.bf16 %v2570_v8, %v2570_v8  ;;  %v4538_v8 = vld [vmem:[%s4693_s22] ss:$0 sm:$0xff] }
0x121d   : > { %3571 = vmatmul.mubr.msk.bf16.gmra.mrb[36].mxu0 %vm887_vm3, %v2577_v15 }
0x121e   : > { %3606 = vmatprep.mubr.msk.bf16.mxu0 %vm3810_vm5, %v3809_v5 }
0x1248   : > { %v2661_v45 = vpop.xlane.xlu0 %2660 }
0x1249   : > { %v2674_v47 = vmul.f32 0.03125, %v2661_v45 }
0x124b   : > { %v4490_v44 = vsub.f32 %v4470_v58, %v2674_v47 }
0x124d   : > { %v2684_v49 = vmul.f32 %v4490_v44, %v4490_v44 }
0x124f   : > { %v2689_v51 = vsel %vm887_vm3, %v2684_v49, 0.0  ;;  %v2664_v38 = vpop.xlane.xlu1 %2663  ;;  %v4546_v49 = vld [vmem:[%s4694_s6] ss:$0 sm:$0xff] }
0x1250   : > { %2690 = vadd.xlane.f32.xlu1 %v2689_v51  ;;  %v2675_v13 = vmul.f32 0.03125, %v2664_v38  ;;  %v2873_v38 = vld [vmem:[%s3984_s2 + $0x8] sm:$0xff] }
0x1252   : > { %v2680_v20 = vsub.f32 %v4474_v59, %v2675_v13  ;;  %v2876_v13 = vld [vmem:[%s3984_s2 + $0x20] sm:$0xff] }
0x1254   : > { %v2685_v6 = vmul.f32 %v2680_v20, %v2680_v20 }
0x1256   : > { %v2692_v29 = vsel %vm887_vm3, %v2685_v6, 0.0  ;;  %v2884_v6 = vld [vmem:[%s3984_s2 + $0x60] sm:$0xff] }
0x12dd   : > { %v2691_v42 = vpop.xlane.xlu1 %2690 }
0x12de   : > { %v2704_v50 = vmul.f32 0.03125, %v2691_v42 }
0x12e8   : > { %v2638_v19 = vpop.f32.mrb[32].mxu0 }
0x12e9   : > { %v2639_v48 = vadd.f32 %v3290_v55, %v2638_v19  ;;  %v3568_v39 = vpop.f32.mrb[33].mxu0 }
0x12ea   : > { %v2641_v41 = vpop.f32.mrb[34].mxu0  ;;  %v2872_v39 = vld [vmem:[%s3984_s2] sm:$0xff] }
0x12eb   : > { %v4495_v34 = vadd.f32 %v3798_v4, %v2639_v48  ;;  %v2642_v36 = vadd.f32 %v3290_v55, %v2641_v41  ;;  %v3569_v11 = vpop.f32.mrb[35].mxu0  ;;  %v2891_v41 = vpack.c.bf16 %v2873_v38, %v2872_v39  ;;  %v2874_v4 = vld [vmem:[%s3984_s2 + $0x10] sm:$0xff] }
0x12ed   : > { %v4497_v16 = vadd.f32 %v3799_v14, %v2642_v36  ;;  %v2665_v17 = vsel %vm887_vm3, %v4495_v34, 0.0  ;;  %3591 = vmatpush3.bf16.msra.mxu0 %v2891_v41  ;;  %v2875_v36 = vld [vmem:[%s3984_s2 + $0x18] sm:$0xff]  ;;  %v2877_v14 = vld [vmem:[%s3984_s2 + $0x28] sm:$0xff] }
0x12ee   : > { %2666 = vadd.xlane.f32.xlu0 %v2665_v17  ;;  %3592 = vmatprep.subr.bf16.mxu0 %v3809_v5  ;;  %v2892_v11 = vpack.c.bf16 %v2875_v36, %v2874_v4  ;;  %v2893_v17 = vpack.c.bf16 %v2877_v14, %v2876_v13 }
0x12ef   : > { %v2668_v23 = vsel %vm887_vm3, %v4497_v16, 0.0 }
0x12f0   : > { %v2646_v18 = vpop.f32.mrb[36].mxu0 }
0x12f1   : > { %v2647_v21 = vadd.f32 %v3290_v55, %v2646_v18  ;;  %v3572_v22 = vpop.f32.mrb[37].mxu0  ;;  %v2709_v55 = vadd.f32 1e-06, %v2704_v50  ;;  %3593 = vmatpush3.bf16.msra.mxu0 %v2892_v11  ;;  %v2878_v18 = vld [vmem:[%s3984_s2 + $0x30] sm:$0xff] }
0x12f2   : > { %2669 = vadd.xlane.f32.xlu0 %v2668_v23  ;;  %v2649_v24 = vpop.f32.mrb[38].mxu0  ;;  %3594 = vmatprep.subr.bf16.mxu0 %v3809_v5  ;;  %v2880_v22 = vld [vmem:[%s3984_s2 + $0x40] sm:$0xff]  ;;  %v2881_v23 = vld [vmem:[%s3984_s2 + $0x48] sm:$0xff] }
0x12f3   : > { %v4504_v25 = vadd.f32 %v3800_v52, %v2647_v21  ;;  %v3573_v26 = vpop.f32.mrb[39].mxu0  ;;  %3766 = vrsqrt.f32 %v2709_v55  ;;  %v2895_v24 = vpack.c.bf16 %v2881_v23, %v2880_v22  ;;  %v2882_v52 = vld [vmem:[%s3984_s2 + $0x50] sm:$0xff] }
0x12f4   : > { %v2883_v26 = vld [vmem:[%s3984_s2 + $0x58] sm:$0xff] }
0x12f5   : > { %v2671_v27 = vsel %vm900_vm4, %v4504_v25, 0.0  ;;  %3595 = vmatpush3.bf16.msra.mxu0 %v2893_v17 }
0x12f6   : > { %2672 = vadd.xlane.f32.xlu0 %v2671_v27  ;;  %3596 = vmatprep.subr.bf16.mxu0 %v3809_v5  ;;  %v2896_v27 = vpack.c.bf16 %v2883_v26, %v2882_v52 }
0x12fa   : > { %2693 = vadd.xlane.f32.xlu0 %v2692_v29  ;;  %v2885_v29 = vld [vmem:[%s3984_s2 + $0x68] sm:$0xff] }
0x12fb   : > { %v2897_v30 = vpack.c.bf16 %v2885_v29, %v2884_v6 }
0x12fd   : > { %v3767_v3 = vpop.eup %3766 }
0x12fe   : > { %v2719_v7 = vmul.f32 %v3767_v3, %v4490_v44 }
0x1300   : > { %v2730_v45 = vmul.f32 %v4538_v8, %v2719_v7  ;;  %v3296_v7 = vld [vmem:[%s4695_s26] ss:$0 sm:$0xff] }
0x1302   : > { %v2741_v51 = vadd.f32 %v4546_v49, %v2730_v45 }
0x137b   : > { %v2667_v43 = vpop.xlane.xlu0 %2666 }
0x137c   : > { %v2676_v46 = vmul.f32 0.03125, %v2667_v43 }
0x137e   : > { %v4515_v10 = vsub.f32 %v4495_v34, %v2676_v46 }
0x137f   : > { %v2670_v12 = vpop.xlane.xlu0 %2669 }
0x1380   : > { %v2677_v53 = vmul.f32 0.03125, %v2670_v12  ;;  %v2686_v54 = vmul.f32 %v4515_v10, %v4515_v10 }
0x1382   : > { %v4520_v56 = vsub.f32 %v4497_v16, %v2677_v53  ;;  %v2695_v57 = vsel %vm887_vm3, %v2686_v54, 0.0 }
0x1383   : > { %2696 = vadd.xlane.f32.xlu1 %v2695_v57  ;;  %v2673_v9 = vpop.xlane.xlu0 %2672 }
0x1384   : > { %v2678_v33 = vmul.f32 0.03125, %v2673_v9  ;;  %v2687_v28 = vmul.f32 %v4520_v56, %v4520_v56 }
0x1386   : > { %v4526_v60 = vsub.f32 %v4504_v25, %v2678_v33  ;;  %v2698_v61 = vsel %vm887_vm3, %v2687_v28, 0.0 }
0x1387   : > { %2699 = vadd.xlane.f32.xlu0 %v2698_v61  ;;  %v2694_v62 = vpop.xlane.xlu0 %2693 }
0x1388   : > { %v2705_v63 = vmul.f32 0.03125, %v2694_v62  ;;  %v2688_v0 = vmul.f32 %v4526_v60, %v4526_v60 }
0x138a   : > { %v2710_v1 = vadd.f32 1e-06, %v2705_v63  ;;  %v2701_v2 = vsel %vm900_vm4, %v2688_v0, 0.0 }
0x138b   : > { %2702 = vadd.xlane.f32.xlu1 %v2701_v2 }
0x138c   : > { %3768 = vrsqrt.f32 %v2710_v1 }
0x1396   : > { %v3769_v15 = vpop.eup %3768 }
0x1397   : > { %v2720_v47 = vmul.f32 %v3769_v15, %v2680_v20  ;;  %v2879_v20 = vld [vmem:[%s3984_s2 + $0x38] sm:$0xff] }
0x1398   : > { %v2894_v21 = vpack.c.bf16 %v2879_v20, %v2878_v18 }
0x1399   : > { %v2731_v44 = vmul.f32 %v4538_v8, %v2720_v47 }
0x139a   : > { %3597 = vmatpush3.bf16.msra.mxu0 %v2894_v21 }
0x139b   : > { %v2742_v19 = vadd.f32 %v4546_v49, %v2731_v44  ;;  %3598 = vmatprep.subr.bf16.mxu0 %v3809_v5 }
0x139d   : > { %v2750_v48 = vpack.c.bf16 %v2742_v19, %v2741_v51 }
0x139e   : > { %3599 = vmatpush3.bf16.msra.mxu0 %v2895_v24 }
0x139f   : > { %3579 = vmatmul.mubr.msk.bf16.vlgmr.msra.gmra.mrb[48].mxu1 %vm887_vm3, %v2750_v48  ;;  %3600 = vmatprep.subr.bf16.mxu0 %v3809_v5 }
0x13a0   : > { %3582 = vmatprep.mubr.msk.bf16.mxu1 %vm3810_vm5, %v3809_v5 }
0x13a2   : > { %3601 = vmatpush3.bf16.msra.mxu0 %v2896_v27 }
0x13a3   : > { %3602 = vmatprep.subr.bf16.mxu0 %v3809_v5 }
0x13a6   : > { %3603 = vmatpush3.bf16.msra.mxu0 %v2897_v30 }
0x13a7   : > { %3604 = vmatprep.subr.bf16.mxu0 %v3809_v5 }
0x13aa   : > { %3605 = vmatpush3.bf16.msra.mxu0 %v2898_v37 }
0x1410   : > { %v2697_v35 = vpop.xlane.xlu1 %2696 }
0x1411   : > { %v2706_v40 = vmul.f32 0.03125, %v2697_v35 }
0x1413   : > { %v2711_v42 = vadd.f32 1e-06, %v2706_v40 }
0x1414   : > { %v2700_v43 = vpop.xlane.xlu0 %2699 }
0x1415   : > { %3770 = vrsqrt.f32 %v2711_v42  ;;  %v2707_v46 = vmul.f32 0.03125, %v2700_v43 }
0x1417   : > { %v2712_v50 = vadd.f32 1e-06, %v2707_v46 }
0x1418   : > { %v2703_v12 = vpop.xlane.xlu1 %2702 }
0x1419   : > { %3772 = vrsqrt.f32 %v2712_v50  ;;  %v2708_v53 = vmul.f32 0.03125, %v2703_v12 }
0x141b   : > { %v2713_v54 = vadd.f32 1e-06, %v2708_v53 }
0x141d   : > { %3774 = vrsqrt.f32 %v2713_v54 }
0x141f   : > { %v3771_v55 = vpop.eup %3770 }
0x1420   : > { %v2721_v57 = vmul.f32 %v3771_v55, %v4515_v10 }
0x1422   : > { %v2732_v28 = vmul.f32 %v4538_v8, %v2721_v57 }
0x1423   : > { %v3773_v9 = vpop.eup %3772 }
0x1424   : > { %v2722_v33 = vmul.f32 %v3773_v9, %v4520_v56  ;;  %v2743_v63 = vadd.f32 %v4546_v49, %v2732_v28 }
0x1426   : > { %v2733_v61 = vmul.f32 %v4538_v8, %v2722_v33 }
0x1427   : > { %v3775_v62 = vpop.eup %3774 }
0x1428   : > { %v2744_v0 = vadd.f32 %v4546_v49, %v2733_v61  ;;  %v2723_v1 = vmul.f32 %v3775_v62, %v4526_v60 }
0x142a   : > { %v2751_v2 = vpack.c.bf16 %v2744_v0, %v2743_v63  ;;  %v2734_v3 = vmul.f32 %v4538_v8, %v2723_v1 }
0x142c   : > { %3583 = vmatmul.mubr.msk.bf16.gmra.mrb[52].mxu1 %vm887_vm3, %v2751_v2  ;;  %v2745_v10 = vadd.f32 %v4546_v49, %v2734_v3 }
0x142d   : > { %3586 = vmatprep.mubr.msk.bf16.mxu1 %vm3810_vm5, %v3809_v5 }
0x142e   : > { %v2752_v56 = vpack.c.bf16 %v2745_v10, %v2745_v10 }
0x1434   : > { %3587 = vmatmul.mubr.msk.bf16.gmra.mrb[56].mxu1 %vm887_vm3, %v2752_v56 }
0x1472   : > { %v2805_v15 = vpop.f32.mrb[48].mxu1 }
0x1473   : > { %v2806_v60 = vadd.f32 %v3296_v7, %v2805_v15  ;;  %v3580_v45 = vpop.f32.mrb[49].mxu1 }
0x1474   : > { %v2808_v47 = vpop.f32.mrb[50].mxu1 }
0x1475   : > { %v2827_v8 = vmul.f32 %v2806_v60, %v2806_v60  ;;  %v2809_v44 = vadd.f32 %v3296_v7, %v2808_v47  ;;  %v3581_v51 = vpop.f32.mrb[51].mxu1 }
0x1477   : > { %v2832_v19 = vmul.f32 %v2827_v8, %v2806_v60  ;;  %v2828_v48 = vmul.f32 %v2809_v44, %v2809_v44 }
0x1479   : > { %v2837_v39 = vmul.f32 0.044715, %v2832_v19  ;;  %v2833_v38 = vmul.f32 %v2828_v48, %v2809_v44  ;;  %v3300_v48 = vld [vmem:[%s769_s3] ss:$0 sm:$0xff] }
0x147b   : > { %v2842_v49 = vadd.f32 %v2837_v39, %v2806_v60  ;;  %v2838_v41 = vmul.f32 0.044715, %v2833_v38 }
0x147d   : > { %v2847_v4 = vmul.f32 0.7978846, %v2842_v49  ;;  %v2843_v36 = vadd.f32 %v2838_v41, %v2809_v44 }
0x147f   : > { %3776 = vtanh.f32 %v2847_v4  ;;  %v2848_v11 = vmul.f32 0.7978846, %v2843_v36 }
0x1481   : > { %3778 = vtanh.f32 %v2848_v11 }
0x1489   : > { %v3777_v13 = vpop.eup %3776 }
0x148a   : > { %v2857_v14 = vadd.f32 1.0, %v3777_v13 }
0x148b   : > { %v3779_v17 = vpop.eup %3778 }
0x148c   : > { %v2862_v18 = vmul.f32 0.5, %v2857_v14  ;;  %v2858_v20 = vadd.f32 1.0, %v3779_v17 }
0x148e   : > { %v2863_v21 = vmul.f32 0.5, %v2858_v20  ;;  %v2867_v22 = vmul.f32 %v2862_v18, %v2806_v60 }
0x1490   : > { %v2868_v23 = vmul.f32 %v2863_v21, %v2809_v44 }
0x1492   : > { %v2888_v24 = vpack.c.bf16 %v2868_v23, %v2867_v22 }
0x1494   : > { %3607 = vmatmul.mubr.bf16.vlgmr.msra.gmra.mrb[40].mxu0 %v2888_v24 }
0x1495   : > { %3610 = vmatprep.mubr.msk.bf16.mxu0 %vm3810_vm5, %v3809_v5 }
0x14ff   : > { %v2813_v52 = vpop.f32.mrb[52].mxu1 }
0x1500   : > { %v2814_v26 = vadd.f32 %v3296_v7, %v2813_v52  ;;  %v3584_v27 = vpop.f32.mrb[53].mxu1 }
0x1501   : > { %v2816_v6 = vpop.f32.mrb[54].mxu1 }
0x1502   : > { %v2829_v29 = vmul.f32 %v2814_v26, %v2814_v26  ;;  %v2817_v30 = vadd.f32 %v3296_v7, %v2816_v6  ;;  %v3585_v31 = vpop.f32.mrb[55].mxu1 }
0x1504   : > { %v2834_v32 = vmul.f32 %v2829_v29, %v2814_v26  ;;  %v2830_v35 = vmul.f32 %v2817_v30, %v2817_v30 }
0x1506   : > { %v2839_v37 = vmul.f32 0.044715, %v2834_v32  ;;  %v2835_v40 = vmul.f32 %v2830_v35, %v2817_v30 }
0x1507   : > { %v2821_v42 = vpop.f32.mrb[56].mxu1 }
0x1508   : > { %v2844_v43 = vadd.f32 %v2839_v37, %v2814_v26  ;;  %v2840_v46 = vmul.f32 0.044715, %v2835_v40  ;;  %v2822_v50 = vadd.f32 %v3296_v7, %v2821_v42  ;;  %v3588_v12 = vpop.f32.mrb[57].mxu1 }
0x1509   : > { %v2824_v53 = vpop.f32.mrb[58].mxu1 }
0x150a   : > { %v2849_v54 = vmul.f32 0.7978846, %v2844_v43  ;;  %v2845_v55 = vadd.f32 %v2840_v46, %v2817_v30  ;;  %v2831_v57 = vmul.f32 %v2822_v50, %v2822_v50  ;;  %v3589_v9 = vpop.f32.mrb[59].mxu1 }
0x150c   : > { %3780 = vtanh.f32 %v2849_v54  ;;  %v2850_v33 = vmul.f32 0.7978846, %v2845_v55  ;;  %v2836_v28 = vmul.f32 %v2831_v57, %v2822_v50 }
0x150e   : > { %3782 = vtanh.f32 %v2850_v33  ;;  %v2841_v61 = vmul.f32 0.044715, %v2836_v28 }
0x1510   : > { %v2846_v62 = vadd.f32 %v2841_v61, %v2822_v50 }
0x1512   : > { %v2851_v63 = vmul.f32 0.7978846, %v2846_v62 }
0x1514   : > { %3784 = vtanh.f32 %v2851_v63 }
0x1516   : > { %v3781_v0 = vpop.eup %3780 }
0x1517   : > { %v2859_v1 = vadd.f32 1.0, %v3781_v0 }
0x1518   : > { %v3783_v2 = vpop.eup %3782 }
0x1519   : > { %v2860_v3 = vadd.f32 1.0, %v3783_v2  ;;  %v2864_v10 = vmul.f32 0.5, %v2859_v1 }
0x151b   : > { %v2865_v56 = vmul.f32 0.5, %v2860_v3  ;;  %v2869_v7 = vmul.f32 %v2864_v10, %v2814_v26 }
0x151d   : > { %v2870_v15 = vmul.f32 %v2865_v56, %v2817_v30 }
0x151e   : > { %v3785_v60 = vpop.eup %3784 }
0x151f   : > { %v2889_v45 = vpack.c.bf16 %v2870_v15, %v2869_v7  ;;  %v2861_v47 = vadd.f32 1.0, %v3785_v60 }
0x1521   : > { %3611 = vmatmul.mubr.bf16.gmra.mrb[44].mxu0 %v2889_v45  ;;  %v2866_v8 = vmul.f32 0.5, %v2861_v47  ;;  %v3301_v47 = vld [vmem:[%s4696_s28] ss:$0 sm:$0xff] }
0x1522   : > { %3614 = vmatprep.mubr.msk.bf16.mxu0 %vm3810_vm5, %v3809_v5 }
0x1523   : > { %v2871_v44 = vmul.f32 %v2866_v8, %v2822_v50 }
0x1525   : > { %v2890_v51 = vpack.c.bf16 %v2871_v44, %v2871_v44  ;;  %v3302_v44 = vld [vmem:[%s4697_s7] ss:$0 sm:$0xff] }
0x1529   : > { %3615 = vmatmul.mubr.bf16.gmra.mrb[48].mxu0 %v2890_v51 }
0x1567   : > { %v2933_v19 = vpop.f32.mrb[40].mxu0 }
0x1568   : > { %v2955_v39 = vadd.f32 %v2933_v19, %v4470_v58  ;;  %v3608_v38 = vpop.f32.mrb[41].mxu0 }
0x1569   : > { %v2936_v49 = vpop.f32.mrb[42].mxu0 }
0x156a   : > { %v2967_v41 = vadd.f32 %v3300_v48, %v2955_v39  ;;  %v2956_v4 = vadd.f32 %v2936_v49, %v4474_v59  ;;  %v3609_v36 = vpop.f32.mrb[43].mxu0 }
0x156c   : > { %2972 = vst.msk [vmem:[#allocation2] sm:$0xff] %vm887_vm3, %v2967_v41  ;;  %v2968_v5 = vadd.f32 %v3300_v48, %v2956_v4  ;;  %v2979_v11 = vsel %vm887_vm3, %v2967_v41, 0.0 }
0x156d   : > { %2980 = vadd.xlane.f32.xlu0 %v2979_v11 }
0x156e   : > { %2973 = vst.msk [vmem:[#allocation2 + $0x8] sm:$0xff] %vm887_vm3, %v2968_v5  ;;  %v2982_v13 = vsel %vm887_vm3, %v2968_v5, 0.0 }
0x156f   : > { %2983 = vadd.xlane.f32.xlu1 %v2982_v13 }
0x15f4   : > { %v2941_v14 = vpop.f32.mrb[44].mxu0 }
0x15f5   : > { %v2957_v58 = vadd.f32 %v2941_v14, %v4495_v34  ;;  %v3612_v17 = vpop.f32.mrb[45].mxu0 }
0x15f6   : > { %v2944_v18 = vpop.f32.mrb[46].mxu0 }
0x15f7   : > { %v2969_v20 = vadd.f32 %v3300_v48, %v2957_v58  ;;  %v2958_v59 = vadd.f32 %v2944_v18, %v4497_v16  ;;  %v3613_v21 = vpop.f32.mrb[47].mxu0 }
0x15f9   : > { %2974 = vst.msk [vmem:[#allocation2 + $0x10] sm:$0xff] %vm887_vm3, %v2969_v20  ;;  %v2970_v22 = vadd.f32 %v3300_v48, %v2958_v59  ;;  %v2985_v23 = vsel %vm887_vm3, %v2969_v20, 0.0 }
0x15fa   : > { %v2981_v24 = vpop.xlane.xlu0 %2980  ;;  %2986 = vadd.xlane.f32.xlu0 %v2985_v23 }
0x15fb   : > { %2975 = vst.msk [vmem:[#allocation2 + $0x18] sm:$0xff] %vm887_vm3, %v2970_v22  ;;  %v2994_v52 = vmul.f32 0.03125, %v2981_v24  ;;  %v2988_v26 = vsel %vm887_vm3, %v2970_v22, 0.0 }
0x15fc   : > { %2989 = vadd.xlane.f32.xlu1 %v2988_v26  ;;  %v2949_v34 = vpop.f32.mrb[48].mxu0  ;;  %v2984_v27 = vpop.xlane.xlu1 %2983 }
0x15fd   : > { %v2999_v6 = vsub.f32 %v2967_v41, %v2994_v52  ;;  %v2959_v29 = vadd.f32 %v2949_v34, %v4504_v25  ;;  %v2995_v16 = vmul.f32 0.03125, %v2984_v27  ;;  %v3616_v30 = vpop.f32.mrb[49].mxu0 }
0x15fe   : > { %v2952_v31 = vpop.f32.mrb[50].mxu0 }
0x15ff   : > { %v2971_v32 = vadd.f32 %v3300_v48, %v2959_v29  ;;  %v3000_v35 = vsub.f32 %v2968_v5, %v2995_v16  ;;  %v3617_v37 = vpop.f32.mrb[51].mxu0  ;;  %v3004_v40 = vmul.f32 %v2999_v6, %v2999_v6 }
0x1601   : > { %2976 = vst.msk [vmem:[#allocation2 + $0x20] sm:$0x3] %vm900_vm4, %v2971_v32  ;;  %v3009_v42 = vsel %vm887_vm3, %v3004_v40, 0.0  ;;  %v2991_v43 = vsel %vm900_vm4, %v2971_v32, 0.0  ;;  %v3005_v46 = vmul.f32 %v3000_v35, %v3000_v35 }
0x1602   : > { %3010 = vadd.xlane.f32.xlu1 %v3009_v42  ;;  %2992 = vadd.xlane.f32.xlu0 %v2991_v43 }
0x1603   : > { %v3012_v50 = vsel %vm887_vm3, %v3005_v46, 0.0 }
0x1606   : > { %3013 = vadd.xlane.f32.xlu0 %v3012_v50 }
0x1687   : > { %v2987_v25 = vpop.xlane.xlu0 %2986 }
0x1688   : > { %v2996_v12 = vmul.f32 0.03125, %v2987_v25 }
0x1689   : > { %v2990_v53 = vpop.xlane.xlu1 %2989 }
0x168a   : > { %v3001_v54 = vsub.f32 %v2969_v20, %v2996_v12  ;;  %v2997_v55 = vmul.f32 0.03125, %v2990_v53 }
0x168c   : > { %v3002_v57 = vsub.f32 %v2970_v22, %v2997_v55  ;;  %v3006_v9 = vmul.f32 %v3001_v54, %v3001_v54 }
0x168e   : > { %v3015_v33 = vsel %vm887_vm3, %v3006_v9, 0.0  ;;  %v3007_v28 = vmul.f32 %v3002_v57, %v3002_v57 }
0x168f   : > { %3016 = vadd.xlane.f32.xlu1 %v3015_v33  ;;  %v2993_v61 = vpop.xlane.xlu0 %2992  ;;  %v3011_v62 = vpop.xlane.xlu1 %3010 }
0x1690   : > { %v2998_v63 = vmul.f32 0.03125, %v2993_v61  ;;  %v3024_v0 = vmul.f32 0.03125, %v3011_v62  ;;  %v3018_v1 = vsel %vm887_vm3, %v3007_v28, 0.0 }
0x1691   : > { %3019 = vadd.xlane.f32.xlu0 %v3018_v1 }
0x1692   : > { %v3003_v2 = vsub.f32 %v2971_v32, %v2998_v63  ;;  %v3029_v3 = vadd.f32 1e-06, %v3024_v0 }
0x1693   : > { %v3014_v10 = vpop.xlane.xlu0 %3013 }
0x1694   : > { %3786 = vrsqrt.f32 %v3029_v3  ;;  %v3025_v56 = vmul.f32 0.03125, %v3014_v10  ;;  %v3008_v7 = vmul.f32 %v3003_v2, %v3003_v2 }
0x1696   : > { %v3030_v15 = vadd.f32 1e-06, %v3025_v56  ;;  %v3021_v60 = vsel %vm900_vm4, %v3008_v7, 0.0 }
0x1697   : > { %3022 = vadd.xlane.f32.xlu1 %v3021_v60 }
0x1698   : > { %3788 = vrsqrt.f32 %v3030_v15 }
0x169e   : > { %v3787_v45 = vpop.eup %3786 }
0x169f   : > { %v3039_v8 = vmul.f32 %v3787_v45, %v2999_v6 }
0x16a1   : > { %v3050_v51 = vmul.f32 %v3301_v47, %v3039_v8 }
0x16a2   : > { %v3789_v19 = vpop.eup %3788 }
0x16a3   : > { %v3061_v48 = vadd.f32 %v3302_v44, %v3050_v51  ;;  %v3040_v39 = vmul.f32 %v3789_v19, %v3000_v35 }
0x16a5   : > { %3066 = vst.msk [vmem:[%s3994_s25] sm:$0xff] %vm887_vm3, %v3061_v48  ;;  %v3051_v38 = vmul.f32 %v3301_v47, %v3040_v39 }
0x16a7   : > { %v3062_v49 = vadd.f32 %v3302_v44, %v3051_v38 }
0x16a9   : > { %3067 = vst.msk [vmem:[%s3994_s25 + $0x8] sm:$0xff] %vm887_vm3, %v3062_v49 }
0x171c   : > { %v3017_v41 = vpop.xlane.xlu1 %3016 }
0x171d   : > { %v3026_v4 = vmul.f32 0.03125, %v3017_v41 }
0x171e   : > { %v3020_v36 = vpop.xlane.xlu0 %3019 }
0x171f   : > { %v3031_v5 = vadd.f32 1e-06, %v3026_v4  ;;  %v3027_v11 = vmul.f32 0.03125, %v3020_v36 }
0x1721   : > { %3790 = vrsqrt.f32 %v3031_v5  ;;  %v3032_v13 = vadd.f32 1e-06, %v3027_v11 }
0x1723   : > { %3792 = vrsqrt.f32 %v3032_v13 }
0x1724   : > { %v3023_v14 = vpop.xlane.xlu1 %3022 }
0x1725   : > { %v3028_v58 = vmul.f32 0.03125, %v3023_v14 }
0x1727   : > { %v3033_v17 = vadd.f32 1e-06, %v3028_v58 }
0x1729   : > { %3794 = vrsqrt.f32 %v3033_v17 }
0x172b   : > { %v3791_v18 = vpop.eup %3790 }
0x172c   : > { %v3041_v20 = vmul.f32 %v3791_v18, %v3001_v54 }
0x172d   : > { %v3793_v59 = vpop.eup %3792 }
0x172e   : > { %v3052_v21 = vmul.f32 %v3301_v47, %v3041_v20  ;;  %v3042_v22 = vmul.f32 %v3793_v59, %v3002_v57 }
0x1730   : > { %v3063_v23 = vadd.f32 %v3302_v44, %v3052_v21  ;;  %v3053_v24 = vmul.f32 %v3301_v47, %v3042_v22 }
0x1732   : > { %3068 = vst.msk [vmem:[%s3994_s25 + $0x10] sm:$0xff] %vm887_vm3, %v3063_v23  ;;  %v3064_v52 = vadd.f32 %v3302_v44, %v3053_v24 }
0x1733   : > { %v3795_v26 = vpop.eup %3794 }
0x1734   : > { %3069 = vst.msk [vmem:[%s3994_s25 + $0x18] sm:$0xff] %vm887_vm3, %v3064_v52  ;;  %v3043_v34 = vmul.f32 %v3795_v26, %v3003_v2 }
0x1736   : > { %v3054_v27 = vmul.f32 %v3301_v47, %v3043_v34 }
0x1738   : > { %v3065_v6 = vadd.f32 %v3302_v44, %v3054_v27 }
0x173a   : > { %3070 = vst.msk [vmem:[%s3994_s25 + $0x20] sm:$0x3] %vm900_vm4, %v3065_v6 }
0x173b PF: > { %s4698_s18 = sld [smem:[#allocation5_spill]] }
0x1741   : > { %s29_s0 = sadd.s32 1, %s4698_s18  }
0x1742   : > { %p26_p5 = scmp.ge.s32.totalorder %s29_s0, 10  }
0x1744   :  { %28 = sbr.rel (!%p26_p5) target bundleno = 10 (0xa), region = 163 }

</bundles_post_ra>
